<compile_context>
chip_gen: v6e
topology: v6e:2x2x1
jax: 0.10.0
libtpu: 0.0.40
codegen_flags: <defaults>
</compile_context>

<pallas_src>
import jax
import jax.numpy as jnp
from jax.experimental import pallas as pl
from jax.experimental.pallas import tpu as pltpu


def _round_up(x, m):
    return (x + m - 1) // m * m


def _visual_base_kernel(x_ref, w_ref, b_ref, o_ref, acc_ref):
    # x_ref:   (TB, 512, THW)  activation tile, native NCHW (C on sublanes,
    #                          HW on lanes), original dtype
    # w_ref:   (512, E)        weight^T pre-scaled by 1/HW, f32
    # b_ref:   (1, E)          bias, f32
    # o_ref:   (TB, E)         output tile
    # acc_ref: (TB, 512)       f32 running spatial sum (scratch)
    hw = pl.program_id(1)

    @pl.when(hw == 0)
    def _():
        acc_ref[...] = jnp.zeros_like(acc_ref)

    # Raw spatial sum in f32 (cast needed on v5e's no-bf16 VPU, harmless
    # elsewhere).  Lane-axis reduce -> XLU, a free slot next to the DMA.
    acc_ref[...] += jnp.sum(x_ref[...].astype(jnp.float32), axis=-1)

    @pl.when(hw == pl.num_programs(1) - 1)
    def _():
        # Mean scale already folded into w_ref; single tiny MXU matmul.
        y = jnp.dot(acc_ref[...], w_ref[...],
                    preferred_element_type=jnp.float32)          # (TB, E)
        o_ref[...] = (y + b_ref[...]).astype(o_ref.dtype)


def visual_base_forward(f4, weight, bias):
    """f4: (B, 512, H, W); weight: (E, 512); bias: (E,).  Returns (B, E)."""
    B, C, H, W = f4.shape
    assert C == 512, "Visual_base expects 512 input channels"
    E = weight.shape[0]
    HW = H * W
    out_dtype = f4.dtype
    itemsize = jnp.dtype(out_dtype).itemsize

    # Free layout change: merge the two minor dims (no HBM copy).
    x = f4.reshape(B, C, HW)                                     # (B, 512, HW)

    # Batch tile: largest divisor of B that is <= 8 (never pad the batch).
    tb = 1
    for d in range(min(B, 8), 0, -1):
        if B % d == 0:
            tb = d
            break

    # Spatial tile: keep each input block around <= 4 MiB so the
    # double-buffered stream fits comfortably in scoped VMEM on all chips.
    cap_bytes = 4 << 20
    max_thw = max(128, cap_bytes // (tb * 512 * itemsize))
    HW_pad = HW
    if HW % 128 == 0:
        # Largest multiple of 128 that divides HW and fits the budget.
        thw, t = 128, 128
        while t <= min(HW, max_thw):
            if HW % t == 0:
                thw = t
            t += 128
    elif HW <= max_thw:
        # Ragged but small: one full-extent spatial tile (legal BlockSpec).
        thw = HW
    else:
        # Rare: large AND ragged -> zero-pad the lane axis (exact, since the
        # true 1/HW is folded into the weight below).
        thw = (max_thw // 128) * 128
        HW_pad = _round_up(HW, thw)
        x = jnp.pad(x, ((0, 0), (0, 0), (0, HW_pad - HW)))

    # Fold mean scale into the pre-transposed weight; cast params to f32 once.
    w_t = (weight.T.astype(jnp.float32) / jnp.float32(HW))       # (512, E)
    b2 = bias.reshape(1, E).astype(jnp.float32)                  # (1, E)

    grid = (B // tb, HW_pad // thw)

    bytes_accessed = (B * 512 * HW_pad * itemsize
                      + w_t.size * 4 + b2.size * 4
                      + B * E * itemsize)
    cost = pl.CostEstimate(
        flops=int(B * 512 * HW_pad + 2 * B * 512 * E),
        transcendentals=0,
        bytes_accessed=int(bytes_accessed),
    )

    out = pl.pallas_call(
        _visual_base_kernel,
        out_shape=jax.ShapeDtypeStruct((B, E), out_dtype),
        grid_spec=pltpu.PrefetchScalarGridSpec(
            num_scalar_prefetch=0,
            grid=grid,                                  # (batch, hw-reduce)
            in_specs=[
                pl.BlockSpec((tb, 512, thw), lambda b, h: (b, 0, h)),
                pl.BlockSpec((512, E), lambda b, h: (0, 0)),
                pl.BlockSpec((1, E), lambda b, h: (0, 0)),
            ],
            out_specs=pl.BlockSpec((tb, E), lambda b, h: (b, 0)),
            scratch_shapes=[pltpu.VMEM((tb, 512), jnp.float32)],
        ),
        compiler_params=pltpu.CompilerParams(
            dimension_semantics=("parallel", "arbitrary"),
        ),
        cost_estimate=cost,
    )(x, w_t, b2)

    return out


def _reference(f4, weight, bias):
    B, C, H, W = f4.shape
    m = jnp.mean(f4.reshape(B, C, H * W), axis=-1)
    return m @ weight.T + bias


if __name__ == "__main__":
    key = jax.random.PRNGKey(0)
    k_x, k_w, k_b = jax.random.split(key, 3)

    B, C, Hs, Ws = 2, 512, 4, 4     # channel dim fixed at 512 by the module
    embed_dim = 32

    # features[3] tensor (the only element the forward pass uses)
    f4 = jax.random.normal(k_x, (B, C, Hs, Ws), dtype=jnp.float32)

    # deterministic nn.Linear(512, embed_dim) parameters
    weight = jax.random.normal(k_w, (embed_dim, C), dtype=jnp.float32) * 0.02
    bias = jax.random.normal(k_b, (embed_dim,), dtype=jnp.float32) * 0.01

    out = visual_base_forward(f4, weight, bias)
    out = jax.block_until_ready(out)

    ref = _reference(f4, weight, bias)
    assert out.shape == (B, embed_dim)
    assert jnp.allclose(out, ref, atol=1e-4, rtol=1e-4), "mismatch vs reference"

    print("KERNEL_OK")
</pallas_src>

<mosaic_0001>
module attributes {stable_mosaic.version = 11 : i64} {
  func.func @_visual_base_kernel(%arg0: i32, %arg1: i32, %arg2: memref<2x512x16xf32, #tpu.memory_space<vmem>>, %arg3: memref<512x32xf32, #tpu.memory_space<vmem>>, %arg4: memref<1x32xf32, #tpu.memory_space<vmem>>, %arg5: memref<2x32xf32, #tpu.memory_space<vmem>>, %arg6: memref<2x512xf32, #tpu.memory_space<vmem>>) attributes {dimension_semantics = [#tpu.dimension_semantics<parallel>, #tpu.dimension_semantics<arbitrary>], iteration_bounds = array<i64: 1, 1>, scalar_prefetch = 0 : i64, scratch_operands = 1 : i64, tpu.core_type = #tpu.core_type<tc>, window_params = [{transform_indices = @transform_0, window_bounds = array<i64: 2, 512, 16>}, {pipeline_mode = #tpu.pipeline_mode<synchronous>, transform_indices = @transform_1, window_bounds = array<i64: 512, 32>}, {pipeline_mode = #tpu.pipeline_mode<synchronous>, transform_indices = @transform_2, window_bounds = array<i64: 1, 32>}, {transform_indices = @transform_3, window_bounds = array<i64: 2, 32>}]} {
    %c0_i32 = arith.constant 0 : i32
    %0 = arith.cmpi eq, %arg1, %c0_i32 : i32
    %1 = arith.extui %0 : i1 to i32
    %c0_i32_0 = arith.constant 0 : i32
    %2 = arith.cmpi ne, %1, %c0_i32_0 : i32
    scf.if %2 {
      %cst_9 = arith.constant 0.000000e+00 : f32
      %11 = vector.broadcast %cst_9 : f32 to vector<2x512xf32>
      %c0_10 = arith.constant 0 : index
      %c0_11 = arith.constant 0 : index
      %12 = vector.load %arg6[%c0_10, %c0_11] : memref<2x512xf32, #tpu.memory_space<vmem>>, vector<2x512xf32>
      tpu.vector_store %arg6[%c0_10, %c0_11], %11 {strides = array<i32>} : memref<2x512xf32, #tpu.memory_space<vmem>>, vector<2x512xf32>,
    } else {
    }
    %c0 = arith.constant 0 : index
    %c0_1 = arith.constant 0 : index
    %3 = vector.load %arg6[%c0, %c0_1] : memref<2x512xf32, #tpu.memory_space<vmem>>, vector<2x512xf32>
    %c0_2 = arith.constant 0 : index
    %c0_3 = arith.constant 0 : index
    %c0_4 = arith.constant 0 : index
    %4 = vector.load %arg2[%c0_2, %c0_3, %c0_4] : memref<2x512x16xf32, #tpu.memory_space<vmem>>, vector<2x512x16xf32>
    %cst = arith.constant dense<0.000000e+00> : vector<2x512xf32>
    %5 = vector.multi_reduction <add>, %4, %cst [2] : vector<2x512x16xf32> to vector<2x512xf32>
    %6 = arith.addf %3, %5 : vector<2x512xf32>
    %c0_5 = arith.constant 0 : index
    %c0_6 = arith.constant 0 : index
    %7 = vector.load %arg6[%c0_5, %c0_6] : memref<2x512xf32, #tpu.memory_space<vmem>>, vector<2x512xf32>
    tpu.vector_store %arg6[%c0_5, %c0_6], %6 {strides = array<i32>} : memref<2x512xf32, #tpu.memory_space<vmem>>, vector<2x512xf32>,
    %c0_i32_7 = arith.constant 0 : i32
    %8 = arith.cmpi eq, %arg1, %c0_i32_7 : i32
    %9 = arith.extui %8 : i1 to i32
    %c0_i32_8 = arith.constant 0 : i32
    %10 = arith.cmpi ne, %9, %c0_i32_8 : i32
    scf.if %10 {
      %c0_9 = arith.constant 0 : index
      %c0_10 = arith.constant 0 : index
      %11 = vector.load %arg6[%c0_9, %c0_10] : memref<2x512xf32, #tpu.memory_space<vmem>>, vector<2x512xf32>
      %c0_11 = arith.constant 0 : index
      %c0_12 = arith.constant 0 : index
      %12 = vector.load %arg3[%c0_11, %c0_12] : memref<512x32xf32, #tpu.memory_space<vmem>>, vector<512x32xf32>
      %cst_13 = arith.constant dense<0.000000e+00> : vector<2x32xf32>
      %13 = tpu.matmul %11, %12, %cst_13 {dimension_numbers = #tpu.dot_dimension_numbers<[1], [0], [0], [1], [0, 0, 1, 1], [], []>} : vector<2x512xf32>, vector<512x32xf32>, vector<2x32xf32> -> vector<2x32xf32>
      %c0_14 = arith.constant 0 : index
      %c0_15 = arith.constant 0 : index
      %14 = vector.load %arg4[%c0_14, %c0_15] : memref<1x32xf32, #tpu.memory_space<vmem>>, vector<1x32xf32>
      %15 = vector.broadcast %14 : vector<1x32xf32> to vector<2x32xf32>
      %16 = arith.addf %13, %15 : vector<2x32xf32>
      %c0_16 = arith.constant 0 : index
      %c0_17 = arith.constant 0 : index
      %17 = vector.load %arg5[%c0_16, %c0_17] : memref<2x32xf32, #tpu.memory_space<vmem>>, vector<2x32xf32>
      tpu.vector_store %arg5[%c0_16, %c0_17], %16 {strides = array<i32>} : memref<2x32xf32, #tpu.memory_space<vmem>>, vector<2x32xf32>,
    } else {
    }
    return
  }
  func.func @transform_0(%arg0: i32, %arg1: i32) -> (i32, i32, i32) {
    %c0_i32 = arith.constant 0 : i32
    %c0_i32_0 = arith.constant 0 : i32
    return %arg0, %c0_i32, %arg1 : i32, i32, i32
  }
  func.func @transform_1(%arg0: i32, %arg1: i32) -> (i32, i32) {
    %c0_i32 = arith.constant 0 : i32
    %c0_i32_0 = arith.constant 0 : i32
    %c0_i32_1 = arith.constant 0 : i32
    return %c0_i32, %c0_i32_0 : i32, i32
  }
  func.func @transform_2(%arg0: i32, %arg1: i32) -> (i32, i32) {
    %c0_i32 = arith.constant 0 : i32
    %c0_i32_0 = arith.constant 0 : i32
    %c0_i32_1 = arith.constant 0 : i32
    return %c0_i32, %c0_i32_0 : i32, i32
  }
  func.func @transform_3(%arg0: i32, %arg1: i32) -> (i32, i32) {
    %c0_i32 = arith.constant 0 : i32
    %c0_i32_0 = arith.constant 0 : i32
    return %arg0, %c0_i32 : i32, i32
  }
}

</mosaic_0001>

<bundles_post_ra>
// kernel: tpu_custom_call.1
= control target key start
LH: loop header
LB: loop body
LE: loop exit
PB: predicated region body
PF: predicated region fallthrough
CT: control target
= control target key end

     0   :  { %vm149_vm0 = vcmask 130048   ;;  %s11473_s0 = inlined_call_operand.vmem [shape: f32[2,512,16], index: 0, kind: input, shape index: {}]   ;;  %s11474_s1 = inlined_call_operand.vmem [shape: f32[512,32], index: 1, kind: input, shape index: {}]   ;;  %s11475_s2 = inlined_call_operand.vmem [shape: f32[1,32], index: 2, kind: input, shape index: {}]   ;;  %s11476_s3 = inlined_call_operand.hbm [shape: f32[2,32], index: 3, kind: output, shape index: {}]  }
   0x1   :  { %v23_v0 = vld [vmem:[%s11473_s0 + $0x10] sm:$0xff]  ;;  %v21_v1 = vld [vmem:[%s11473_s0] sm:$0xff]  ;;  %v24_v2 = vld [vmem:[%s11473_s0 + $0x18] sm:$0xff] }
   0x2   :  { %v156_v3 = vsel %vm149_vm0, %v23_v0, 0.0  ;;  %v150_v4 = vsel %vm149_vm0, %v21_v1, 0.0  ;;  %v22_v5 = vld [vmem:[%s11473_s0 + $0x8] sm:$0xff]  ;;  %v159_v6 = vsel %vm149_vm0, %v24_v2, 0.0  ;;  %v25_v9 = vld [vmem:[%s11473_s0 + $0x20] sm:$0xff]  ;;  %v28_v12 = vld [vmem:[%s11473_s0 + $0x38] sm:$0xff] }
   0x3   :  { %157 = vadd.xlane.f32.xlu1 %v156_v3  ;;  %151 = vadd.xlane.f32.xlu0 %v150_v4  ;;  %v153_v7 = vsel %vm149_vm0, %v22_v5, 0.0  ;;  %v26_v8 = vld [vmem:[%s11473_s0 + $0x28] sm:$0xff]  ;;  %v162_v11 = vsel %vm149_vm0, %v25_v9, 0.0  ;;  %v27_v13 = vld [vmem:[%s11473_s0 + $0x30] sm:$0xff]  ;;  %v171_v14 = vsel %vm149_vm0, %v28_v12, 0.0  ;;  %v29_v17 = vld [vmem:[%s11473_s0 + $0x40] sm:$0xff] }
   0x4   :  { %v165_v10 = vsel %vm149_vm0, %v26_v8, 0.0  ;;  %v168_v15 = vsel %vm149_vm0, %v27_v13, 0.0  ;;  %v30_v16 = vld [vmem:[%s11473_s0 + $0x48] sm:$0xff]  ;;  %v174_v19 = vsel %vm149_vm0, %v29_v17, 0.0  ;;  %v32_v20 = vld [vmem:[%s11473_s0 + $0x58] sm:$0xff]  ;;  %v31_v21 = vld [vmem:[%s11473_s0 + $0x50] sm:$0xff] }
   0x5   :  { %v177_v18 = vsel %vm149_vm0, %v30_v16, 0.0  ;;  %v183_v22 = vsel %vm149_vm0, %v32_v20, 0.0  ;;  %v180_v23 = vsel %vm149_vm0, %v31_v21, 0.0  ;;  %v34_v24 = vld [vmem:[%s11473_s0 + $0x68] sm:$0xff]  ;;  %v33_v25 = vld [vmem:[%s11473_s0 + $0x60] sm:$0xff]  ;;  %v36_v28 = vld [vmem:[%s11473_s0 + $0x78] sm:$0xff] }
   0x6   :  { %v189_v26 = vsel %vm149_vm0, %v34_v24, 0.0  ;;  %v186_v27 = vsel %vm149_vm0, %v33_v25, 0.0  ;;  %v35_v29 = vld [vmem:[%s11473_s0 + $0x70] sm:$0xff]  ;;  %v195_v30 = vsel %vm149_vm0, %v36_v28, 0.0  ;;  %v38_v32 = vld [vmem:[%s11473_s0 + $0x88] sm:$0xff]  ;;  %v37_v33 = vld [vmem:[%s11473_s0 + $0x80] sm:$0xff] }
   0x7   :  { %160 = vadd.xlane.f32.xlu1 %v159_v6  ;;  %154 = vadd.xlane.f32.xlu0 %v153_v7  ;;  %v192_v31 = vsel %vm149_vm0, %v35_v29, 0.0 }
   0xb   :  { %166 = vadd.xlane.f32.xlu1 %v165_v10  ;;  %163 = vadd.xlane.f32.xlu0 %v162_v11 }
   0xf   :  { %172 = vadd.xlane.f32.xlu1 %v171_v14  ;;  %169 = vadd.xlane.f32.xlu0 %v168_v15 }
  0x13   :  { %178 = vadd.xlane.f32.xlu1 %v177_v18  ;;  %175 = vadd.xlane.f32.xlu0 %v174_v19 }
  0x17   :  { %184 = vadd.xlane.f32.xlu1 %v183_v22  ;;  %181 = vadd.xlane.f32.xlu0 %v180_v23 }
  0x1b   :  { %190 = vadd.xlane.f32.xlu1 %v189_v26  ;;  %187 = vadd.xlane.f32.xlu0 %v186_v27 }
  0x1c   :  { %8 = vsyncpa [#allocation4], 0  ;;  %v201_v34 = vsel %vm149_vm0, %v38_v32, 0.0  ;;  %v198_v35 = vsel %vm149_vm0, %v37_v33, 0.0  ;;  %v40_v36 = vld [vmem:[%s11473_s0 + $0x98] sm:$0xff]  ;;  %v39_v37 = vld [vmem:[%s11473_s0 + $0x90] sm:$0xff] }
  0x1d   :  { %v207_v38 = vsel %vm149_vm0, %v40_v36, 0.0  ;;  %v204_v39 = vsel %vm149_vm0, %v39_v37, 0.0  ;;  %v42_v40 = vld [vmem:[%s11473_s0 + $0xa8] sm:$0xff]  ;;  %v41_v41 = vld [vmem:[%s11473_s0 + $0xa0] sm:$0xff]  ;;  %v44_v44 = vld [vmem:[%s11473_s0 + $0xb8] sm:$0xff]  ;;  %vm6817_vm1 = vcmask 130112  }
  0x1e   :  { %v213_v42 = vsel %vm149_vm0, %v42_v40, 0.0  ;;  %v210_v43 = vsel %vm149_vm0, %v41_v41, 0.0  ;;  %v43_v45 = vld [vmem:[%s11473_s0 + $0xb0] sm:$0xff]  ;;  %v219_v46 = vsel %vm149_vm0, %v44_v44, 0.0  ;;  %v46_v48 = vld [vmem:[%s11473_s0 + $0xc8] sm:$0xff]  ;;  %v45_v49 = vld [vmem:[%s11473_s0 + $0xc0] sm:$0xff] }
  0x1f   :  { %196 = vadd.xlane.f32.xlu1 %v195_v30  ;;  %193 = vadd.xlane.f32.xlu0 %v192_v31  ;;  %v216_v47 = vsel %vm149_vm0, %v43_v45, 0.0  ;;  %v225_v50 = vsel %vm149_vm0, %v46_v48, 0.0  ;;  %v222_v51 = vsel %vm149_vm0, %v45_v49, 0.0  ;;  %v48_v52 = vld [vmem:[%s11473_s0 + $0xd8] sm:$0xff]  ;;  %v47_v53 = vld [vmem:[%s11473_s0 + $0xd0] sm:$0xff]  ;;  %v50_v56 = vld [vmem:[%s11473_s0 + $0xe8] sm:$0xff] }
  0x20   :  { %v231_v54 = vsel %vm149_vm0, %v48_v52, 0.0  ;;  %v228_v55 = vsel %vm149_vm0, %v47_v53, 0.0  ;;  %v49_v57 = vld [vmem:[%s11473_s0 + $0xe0] sm:$0xff]  ;;  %v237_v58 = vsel %vm149_vm0, %v50_v56, 0.0  ;;  %v52_v60 = vld [vmem:[%s11473_s0 + $0xf8] sm:$0xff]  ;;  %v51_v61 = vld [vmem:[%s11473_s0 + $0xf0] sm:$0xff] }
  0x21   :  { %v234_v59 = vsel %vm149_vm0, %v49_v57, 0.0  ;;  %v243_v62 = vsel %vm149_vm0, %v52_v60, 0.0  ;;  %v240_v63 = vsel %vm149_vm0, %v51_v61, 0.0  ;;  %v54_v0 = vld [vmem:[%s11473_s0 + $0x108] sm:$0xff]  ;;  %v53_v1 = vld [vmem:[%s11473_s0 + $0x100] sm:$0xff]  ;;  %v56_v4 = vld [vmem:[%s11473_s0 + $0x118] sm:$0xff] }
  0x22   :  { %v249_v2 = vsel %vm149_vm0, %v54_v0, 0.0  ;;  %v246_v3 = vsel %vm149_vm0, %v53_v1, 0.0  ;;  %v55_v5 = vld [vmem:[%s11473_s0 + $0x110] sm:$0xff]  ;;  %v255_v6 = vsel %vm149_vm0, %v56_v4, 0.0  ;;  %v58_v8 = vld [vmem:[%s11473_s0 + $0x128] sm:$0xff]  ;;  %v57_v9 = vld [vmem:[%s11473_s0 + $0x120] sm:$0xff] }
  0x23   :  { %202 = vadd.xlane.f32.xlu1 %v201_v34  ;;  %199 = vadd.xlane.f32.xlu0 %v198_v35  ;;  %v252_v7 = vsel %vm149_vm0, %v55_v5, 0.0  ;;  %v261_v10 = vsel %vm149_vm0, %v58_v8, 0.0  ;;  %v258_v11 = vsel %vm149_vm0, %v57_v9, 0.0  ;;  %v60_v12 = vld [vmem:[%s11473_s0 + $0x138] sm:$0xff]  ;;  %v59_v13 = vld [vmem:[%s11473_s0 + $0x130] sm:$0xff]  ;;  %v62_v16 = vld [vmem:[%s11473_s0 + $0x148] sm:$0xff] }
  0x24   :  { %v267_v14 = vsel %vm149_vm0, %v60_v12, 0.0  ;;  %v264_v15 = vsel %vm149_vm0, %v59_v13, 0.0  ;;  %v61_v17 = vld [vmem:[%s11473_s0 + $0x140] sm:$0xff]  ;;  %v273_v18 = vsel %vm149_vm0, %v62_v16, 0.0  ;;  %v64_v20 = vld [vmem:[%s11473_s0 + $0x158] sm:$0xff]  ;;  %v63_v21 = vld [vmem:[%s11473_s0 + $0x150] sm:$0xff] }
  0x25   :  { %v270_v19 = vsel %vm149_vm0, %v61_v17, 0.0  ;;  %v279_v22 = vsel %vm149_vm0, %v64_v20, 0.0  ;;  %v276_v23 = vsel %vm149_vm0, %v63_v21, 0.0  ;;  %v66_v24 = vld [vmem:[%s11473_s0 + $0x168] sm:$0xff]  ;;  %v65_v25 = vld [vmem:[%s11473_s0 + $0x160] sm:$0xff]  ;;  %v68_v28 = vld [vmem:[%s11473_s0 + $0x178] sm:$0xff] }
  0x26   :  { %v285_v26 = vsel %vm149_vm0, %v66_v24, 0.0  ;;  %v282_v27 = vsel %vm149_vm0, %v65_v25, 0.0  ;;  %v67_v29 = vld [vmem:[%s11473_s0 + $0x170] sm:$0xff]  ;;  %v291_v30 = vsel %vm149_vm0, %v68_v28, 0.0  ;;  %v70_v32 = vld [vmem:[%s11473_s0 + $0x188] sm:$0xff]  ;;  %v69_v33 = vld [vmem:[%s11473_s0 + $0x180] sm:$0xff] }
  0x27   :  { %208 = vadd.xlane.f32.xlu1 %v207_v38  ;;  %205 = vadd.xlane.f32.xlu0 %v204_v39  ;;  %v288_v31 = vsel %vm149_vm0, %v67_v29, 0.0  ;;  %v297_v34 = vsel %vm149_vm0, %v70_v32, 0.0  ;;  %v294_v35 = vsel %vm149_vm0, %v69_v33, 0.0  ;;  %v72_v36 = vld [vmem:[%s11473_s0 + $0x198] sm:$0xff]  ;;  %v71_v37 = vld [vmem:[%s11473_s0 + $0x190] sm:$0xff]  ;;  %v74_v40 = vld [vmem:[%s11473_s0 + $0x1a8] sm:$0xff] }
  0x28   :  { %v303_v38 = vsel %vm149_vm0, %v72_v36, 0.0  ;;  %v300_v39 = vsel %vm149_vm0, %v71_v37, 0.0  ;;  %v73_v41 = vld [vmem:[%s11473_s0 + $0x1a0] sm:$0xff]  ;;  %v76_v44 = vld [vmem:[%s11473_s0 + $0x1b8] sm:$0xff]  ;;  %v75_v45 = vld [vmem:[%s11473_s0 + $0x1b0] sm:$0xff]  ;;  %v7851_v24 = vmov 0  }
  0x29   :  { %v78_v48 = vld [vmem:[%s11473_s0 + $0x1c8] sm:$0xff]  ;;  %v77_v49 = vld [vmem:[%s11473_s0 + $0x1c0] sm:$0xff]  ;;  %v80_v52 = vld [vmem:[%s11473_s0 + $0x1d8] sm:$0xff]  ;;  %7828 = vset.pattern.permute.xlu1 %v7851_v24  ;;  %7827 = vset.pattern.permute.xlu0 %v7851_v24  ;;  %vm6824_vm2 = vcmask 195712   ;;  %vm6831_vm3 = vcmask 261312   ;;  %vm6838_vm4 = vcmask 326912  }
  0x2a   :  { %v79_v53 = vld [vmem:[%s11473_s0 + $0x1d0] sm:$0xff]  ;;  %v82_v56 = vld [vmem:[%s11473_s0 + $0x1e8] sm:$0xff]  ;;  %v81_v57 = vld [vmem:[%s11473_s0 + $0x1e0] sm:$0xff]  ;;  %vm6845_vm5 = vcmask 392512   ;;  %vm6852_vm6 = vcmask 458112   ;;  %vm6859_vm7 = vcmask 523712  }
  0x2b   :  { %214 = vadd.xlane.f32.xlu1 %v213_v42  ;;  %211 = vadd.xlane.f32.xlu0 %v210_v43  ;;  %v309_v42 = vsel %vm149_vm0, %v74_v40, 0.0  ;;  %v306_v43 = vsel %vm149_vm0, %v73_v41, 0.0  ;;  %v84_v60 = vld [vmem:[%s11473_s0 + $0x1f8] sm:$0xff]  ;;  %v83_v61 = vld [vmem:[%s11473_s0 + $0x1f0] sm:$0xff]  ;;  %v86_v0 = vld [vmem:[%s11473_s0 + $0x208] sm:$0xff]  ;;  %vm6866_vm8 = vcmask 589312  }
  0x2c   :  { %v85_v1 = vld [vmem:[%s11473_s0 + $0x200] sm:$0xff]  ;;  %v88_v4 = vld [vmem:[%s11473_s0 + $0x218] sm:$0xff]  ;;  %v87_v5 = vld [vmem:[%s11473_s0 + $0x210] sm:$0xff]  ;;  %vm6873_vm9 = vcmask 654912   ;;  %vm6880_vm10 = vcmask 720512   ;;  %vm6887_vm11 = vcmask 786112  }
  0x2d   :  { %v90_v8 = vld [vmem:[%s11473_s0 + $0x228] sm:$0xff]  ;;  %v89_v9 = vld [vmem:[%s11473_s0 + $0x220] sm:$0xff]  ;;  %v92_v12 = vld [vmem:[%s11473_s0 + $0x238] sm:$0xff]  ;;  %vm6894_vm12 = vcmask 851712   ;;  %vm6901_vm13 = vcmask 917312   ;;  %vm6908_vm14 = vcmask 982912  }
  0x2e   :  { %v91_v13 = vld [vmem:[%s11473_s0 + $0x230] sm:$0xff]  ;;  %v96_v25 = vld [vmem:[%s11473_s0 + $0x258] sm:$0xff]  ;;  %v97_v32 = vld [vmem:[%s11473_s0 + $0x260] sm:$0xff]  ;;  %vm6915_vm15 = vcmask 1048512   ;;  %s7857_s14 = smov [#allocation3]  }
  0x2f   :  { %220 = vadd.xlane.f32.xlu1 %v219_v46  ;;  %217 = vadd.xlane.f32.xlu0 %v216_v47  ;;  %v315_v46 = vsel %vm149_vm0, %v76_v44, 0.0  ;;  %v312_v47 = vsel %vm149_vm0, %v75_v45, 0.0  ;;  %v360_v16 = vsel %vm149_vm0, %v91_v13, 0.0  ;;  %v375_v28 = vsel %vm149_vm0, %v96_v25, 0.0  ;;  %v100_v37 = vld [vmem:[%s11473_s0 + $0x278] sm:$0xff]  ;;  %v101_v44 = vld [vmem:[%s11473_s0 + $0x280] sm:$0xff] }
  0x30   :  { %v387_v40 = vsel %vm149_vm0, %v100_v37, 0.0  ;;  %s7740_s15 = sshll.u32 %s7857_s14, 4  ;;  %s7741_s15 = int_to_ptr.vmem [resolvable:$true] %s7740_s15 }
  0x31   :  { %s7829_s16 = scalar_lea.vmem %s7741_s15, 32  ;;  %p7834_p1 = scmp.lt.s32.totalorder %s7741_s15, %s7741_s15 }
  0x32   :  { %p7830_p0 = scmp.ne.s32.totalorder %s7741_s15, %s7829_s16  ;;  %p7835_p2 = scmp.lt.s32.totalorder %s7829_s16, %s7829_s16 }
  0x33   :  { %226 = vadd.xlane.f32.xlu1 %v225_v50  ;;  %223 = vadd.xlane.f32.xlu0 %v222_v51  ;;  %v321_v50 = vsel %vm149_vm0, %v78_v48, 0.0  ;;  %v318_v51 = vsel %vm149_vm0, %v77_v49, 0.0  ;;  %v104_v49 = vld [vmem:[%s11473_s0 + $0x298] sm:$0xff] }
  0x34   :  { %p7836_p3 = por %p7835_p2, %p7834_p1 }
  0x36   :  { %p7837_p4 = pnand %p7836_p3, %p7830_p0 }
  0x37   :  { %232 = vadd.xlane.f32.xlu1 %v231_v54  ;;  %229 = vadd.xlane.f32.xlu0 %v228_v55  ;;  %v327_v54 = vsel %vm149_vm0, %v80_v52, 0.0  ;;  %v324_v55 = vsel %vm149_vm0, %v79_v53, 0.0  ;;  %v399_v52 = vsel %vm149_vm0, %v104_v49, 0.0 }
  0x3b   :  { %238 = vadd.xlane.f32.xlu1 %v237_v58  ;;  %235 = vadd.xlane.f32.xlu0 %v234_v59  ;;  %v333_v58 = vsel %vm149_vm0, %v82_v56, 0.0  ;;  %v330_v59 = vsel %vm149_vm0, %v81_v57, 0.0  ;;  %v105_v56 = vld [vmem:[%s11473_s0 + $0x2a0] sm:$0xff] }
  0x3f   :  { %244 = vadd.xlane.f32.xlu1 %v243_v62  ;;  %241 = vadd.xlane.f32.xlu0 %v240_v63  ;;  %v339_v62 = vsel %vm149_vm0, %v84_v60, 0.0  ;;  %v336_v63 = vsel %vm149_vm0, %v83_v61, 0.0  ;;  %v108_v61 = vld [vmem:[%s11473_s0 + $0x2b8] sm:$0xff] }
  0x43   :  { %250 = vadd.xlane.f32.xlu1 %v249_v2  ;;  %247 = vadd.xlane.f32.xlu0 %v246_v3  ;;  %v345_v2 = vsel %vm149_vm0, %v86_v0, 0.0  ;;  %v342_v3 = vsel %vm149_vm0, %v85_v1, 0.0  ;;  %v411_v0 = vsel %vm149_vm0, %v108_v61, 0.0 }
  0x47   :  { %256 = vadd.xlane.f32.xlu1 %v255_v6  ;;  %253 = vadd.xlane.f32.xlu0 %v252_v7  ;;  %v351_v6 = vsel %vm149_vm0, %v88_v4, 0.0  ;;  %v348_v7 = vsel %vm149_vm0, %v87_v5, 0.0  ;;  %v109_v4 = vld [vmem:[%s11473_s0 + $0x2c0] sm:$0xff] }
  0x4b   :  { %262 = vadd.xlane.f32.xlu1 %v261_v10  ;;  %259 = vadd.xlane.f32.xlu0 %v258_v11  ;;  %v357_v10 = vsel %vm149_vm0, %v90_v8, 0.0  ;;  %v354_v11 = vsel %vm149_vm0, %v89_v9, 0.0  ;;  %v112_v9 = vld [vmem:[%s11473_s0 + $0x2d8] sm:$0xff] }
  0x4f   :  { %268 = vadd.xlane.f32.xlu1 %v267_v14  ;;  %265 = vadd.xlane.f32.xlu0 %v264_v15  ;;  %v363_v15 = vsel %vm149_vm0, %v92_v12, 0.0  ;;  %v423_v12 = vsel %vm149_vm0, %v112_v9, 0.0  ;;  %v119_v9 = vld [vmem:[%s11473_s0 + $0x310] sm:$0xff] }
  0x53   :  { %274 = vadd.xlane.f32.xlu1 %v273_v18  ;;  %271 = vadd.xlane.f32.xlu0 %v270_v19  ;;  %v94_v18 = vld [vmem:[%s11473_s0 + $0x248] sm:$0xff]  ;;  %v93_v19 = vld [vmem:[%s11473_s0 + $0x240] sm:$0xff] }
  0x54   :  { %v369_v21 = vsel %vm149_vm0, %v94_v18, 0.0  ;;  %v113_v18 = vld [vmem:[%s11473_s0 + $0x2e0] sm:$0xff] }
  0x55   :  { %v426_v24 = vsel %vm149_vm0, %v113_v18, 0.0 }
  0x57   :  { %280 = vadd.xlane.f32.xlu1 %v279_v22  ;;  %277 = vadd.xlane.f32.xlu0 %v276_v23  ;;  %v366_v22 = vsel %vm149_vm0, %v93_v19, 0.0  ;;  %v11477_v19 = vlaneseq }
  0x5b   :  { %286 = vadd.xlane.f32.xlu1 %v285_v26  ;;  %283 = vadd.xlane.f32.xlu0 %v282_v27  ;;  %v95_v26 = vld [vmem:[%s11473_s0 + $0x250] sm:$0xff] }
  0x5c   :  { %v372_v29 = vsel %vm149_vm0, %v95_v26, 0.0  ;;  %v7852_v26 = vmov 269488144  }
  0x5f   :  { %292 = vadd.xlane.f32.xlu1 %v291_v30  ;;  %289 = vadd.xlane.f32.xlu0 %v288_v31  ;;  %v98_v31 = vld [vmem:[%s11473_s0 + $0x268] sm:$0xff] }
  0x63   :  { %298 = vadd.xlane.f32.xlu1 %v297_v34  ;;  %295 = vadd.xlane.f32.xlu0 %v294_v35  ;;  %v381_v34 = vsel %vm149_vm0, %v98_v31, 0.0  ;;  %v378_v35 = vsel %vm149_vm0, %v97_v32, 0.0  ;;  %v116_v32 = vld [vmem:[%s11473_s0 + $0x2f8] sm:$0xff] }
  0x67   :  { %304 = vadd.xlane.f32.xlu1 %v303_v38  ;;  %301 = vadd.xlane.f32.xlu0 %v300_v39  ;;  %v99_v38 = vld [vmem:[%s11473_s0 + $0x270] sm:$0xff] }
  0x68   :  { %v384_v41 = vsel %vm149_vm0, %v99_v38, 0.0  ;;  %v7855_v38 = vmov 1987475062  }
  0x6b   :  { %310 = vadd.xlane.f32.xlu1 %v309_v42  ;;  %307 = vadd.xlane.f32.xlu0 %v306_v43  ;;  %v102_v43 = vld [vmem:[%s11473_s0 + $0x288] sm:$0xff] }
  0x6f   :  { %316 = vadd.xlane.f32.xlu1 %v315_v46  ;;  %313 = vadd.xlane.f32.xlu0 %v312_v47  ;;  %v393_v46 = vsel %vm149_vm0, %v102_v43, 0.0  ;;  %v390_v47 = vsel %vm149_vm0, %v101_v44, 0.0  ;;  %v435_v43 = vsel %vm149_vm0, %v116_v32, 0.0  ;;  %v444_v32 = vsel %vm149_vm0, %v119_v9, 0.0 }
  0x73   :  { %322 = vadd.xlane.f32.xlu1 %v321_v50  ;;  %319 = vadd.xlane.f32.xlu0 %v318_v51  ;;  %v103_v50 = vld [vmem:[%s11473_s0 + $0x290] sm:$0xff] }
  0x74   :  { %v396_v53 = vsel %vm149_vm0, %v103_v50, 0.0 }
  0x77   :  { %328 = vadd.xlane.f32.xlu1 %v327_v54  ;;  %325 = vadd.xlane.f32.xlu0 %v324_v55  ;;  %v106_v55 = vld [vmem:[%s11473_s0 + $0x2a8] sm:$0xff] }
  0x7b   :  { %334 = vadd.xlane.f32.xlu1 %v333_v58  ;;  %331 = vadd.xlane.f32.xlu0 %v330_v59  ;;  %v405_v58 = vsel %vm149_vm0, %v106_v55, 0.0  ;;  %v402_v59 = vsel %vm149_vm0, %v105_v56, 0.0  ;;  %v118_v55 = vld [vmem:[%s11473_s0 + $0x308] sm:$0xff]  ;;  %v117_v56 = vld [vmem:[%s11473_s0 + $0x300] sm:$0xff] }
  0x7f   :  { %340 = vadd.xlane.f32.xlu1 %v339_v62  ;;  %337 = vadd.xlane.f32.xlu0 %v336_v63  ;;  %v107_v62 = vld [vmem:[%s11473_s0 + $0x2b0] sm:$0xff] }
  0x80   :  { %v408_v1 = vsel %vm149_vm0, %v107_v62, 0.0  ;;  %v441_v62 = vsel %vm149_vm0, %v118_v55, 0.0 }
  0x83   :  { %346 = vadd.xlane.f32.xlu1 %v345_v2  ;;  %343 = vadd.xlane.f32.xlu0 %v342_v3  ;;  %v110_v3 = vld [vmem:[%s11473_s0 + $0x2c8] sm:$0xff] }
  0x87   :  { %352 = vadd.xlane.f32.xlu1 %v351_v6  ;;  %349 = vadd.xlane.f32.xlu0 %v348_v7  ;;  %v417_v6 = vsel %vm149_vm0, %v110_v3, 0.0  ;;  %v414_v7 = vsel %vm149_vm0, %v109_v4, 0.0 }
  0x8b   :  { %358 = vadd.xlane.f32.xlu1 %v357_v10  ;;  %355 = vadd.xlane.f32.xlu0 %v354_v11  ;;  %v111_v10 = vld [vmem:[%s11473_s0 + $0x2d0] sm:$0xff] }
  0x8c   :  { %v8164_v14 = vpop.xlane.xlu1 %157  ;;  %v8168_v17 = vpop.xlane.xlu0 %151  ;;  %v420_v13 = vsel %vm149_vm0, %v111_v10, 0.0  ;;  %v122_v10 = vld [vmem:[%s11473_s0 + $0x328] sm:$0xff] }
  0x8f   :  { %364 = vadd.xlane.f32.xlu1 %v363_v15  ;;  %361 = vadd.xlane.f32.xlu0 %v360_v16  ;;  %v114_v16 = vld [vmem:[%s11473_s0 + $0x2e8] sm:$0xff] }
  0x90   :  { %v8176_v20 = vpop.xlane.xlu1 %160  ;;  %v8180_v23 = vpop.xlane.xlu0 %154 }
  0x93   :  { %370 = vadd.xlane.f32.xlu1 %v369_v21  ;;  %367 = vadd.xlane.f32.xlu0 %v366_v22  ;;  %v429_v22 = vsel %vm149_vm0, %v114_v16, 0.0  ;;  %v123_v16 = vld [vmem:[%s11473_s0 + $0x330] sm:$0xff] }
  0x94   :  { %v8188_v27 = vpop.xlane.xlu1 %166  ;;  %v8192_v30 = vpop.xlane.xlu0 %163 }
  0x97   :  { %376 = vadd.xlane.f32.xlu1 %v375_v28  ;;  %373 = vadd.xlane.f32.xlu0 %v372_v29  ;;  %v663_v28 = vunpack.c.l.s4 %v7852_v26  ;;  %v7853_v29 = vmov 842150450   ;;  %v128_v26 = vld [vmem:[%s11473_s0 + $0x358] sm:$0xff] }
  0x98   :  { %v8200_v33 = vpop.xlane.xlu1 %172  ;;  %v8204_v36 = vpop.xlane.xlu0 %169  ;;  %v670_v31 = vunpack.c.l.s4 %v7853_v29 }
  0x99   :  { %v664_v50 = vunpack.c.0.s8 %v663_v28 }
  0x9b   :  { %382 = vadd.xlane.f32.xlu1 %v381_v34  ;;  %379 = vadd.xlane.f32.xlu0 %v378_v35  ;;  %v115_v34 = vld [vmem:[%s11473_s0 + $0x2f0] sm:$0xff]  ;;  %v7854_v35 = vmov 1414812756  }
  0x9c   :  { %v8212_v39 = vpop.xlane.xlu1 %178  ;;  %v8216_v42 = vpop.xlane.xlu0 %175  ;;  %v677_v37 = vunpack.c.l.s4 %v7854_v35  ;;  %v432_v44 = vsel %vm149_vm0, %v115_v34, 0.0  ;;  %v127_v35 = vld [vmem:[%s11473_s0 + $0x350] sm:$0xff] }
  0x9f   :  { %388 = vadd.xlane.f32.xlu1 %v387_v40  ;;  %385 = vadd.xlane.f32.xlu0 %v384_v41  ;;  %v684_v40 = vunpack.c.l.s4 %v7855_v38  ;;  %v129_v38 = vld [vmem:[%s11473_s0 + $0x360] sm:$0xff] }
  0xa0   :  { %v8224_v45 = vpop.xlane.xlu1 %184  ;;  %v8228_v48 = vpop.xlane.xlu0 %181 }
  0xa3   :  { %394 = vadd.xlane.f32.xlu1 %v393_v46  ;;  %391 = vadd.xlane.f32.xlu0 %v390_v47  ;;  %v7856_v47 = vmov 1983009808  }
  0xa4   :  { %v8236_v51 = vpop.xlane.xlu1 %190  ;;  %v8240_v54 = vpop.xlane.xlu0 %187  ;;  %v4249_v49 = vunpack.c.l.s4 %v7856_v47  ;;  %v453_v47 = vsel %vm149_vm0, %v122_v10, 0.0 }
  0xa6   :  { %v4250_v3 = vunpack.c.0.s8 %v4249_v49 }
  0xa7   :  { %400 = vadd.xlane.f32.xlu1 %v399_v52  ;;  %397 = vadd.xlane.f32.xlu0 %v396_v53  ;;  %v8315_v52 = vshrl.u32 %v11477_v19, 7  ;;  %v671_v53 = vunpack.c.0.s8 %v670_v31  ;;  %v135_v19 = vld [vmem:[%s11473_s0 + $0x390] sm:$0xff] }
  0xa8   :  { %v8248_v57 = vpop.xlane.xlu1 %196  ;;  %v8252_v60 = vpop.xlane.xlu0 %193 }
  0xa9   :  { %11559 = vst [vmem:[#allocation9_spill] sm:$0xff] %v8315_v52  ;;  %v8330_v4 = vsub.s32 %v664_v50, %v8315_v52 }
  0xab   :  { %406 = vadd.xlane.f32.xlu1 %v405_v58  ;;  %403 = vadd.xlane.f32.xlu0 %v402_v59  ;;  %v678_v58 = vunpack.c.0.s8 %v677_v37  ;;  %v685_v59 = vunpack.c.0.s8 %v684_v40  ;;  %v130_v37 = vld [vmem:[%s11473_s0 + $0x368] sm:$0xff]  ;;  %v8384_v40 = vsub.s32 %v4250_v3, %v8315_v52  ;;  %v668_v9 = vrot.slane %v8168_v17, %v8330_v4 }
  0xac   :  { %v8260_v63 = vpop.xlane.xlu1 %202  ;;  %v8264_v2 = vpop.xlane.xlu0 %199 }
  0xad   :  { %v8354_v18 = vsub.s32 %v678_v58, %v8315_v52  ;;  %v8366_v28 = vsub.s32 %v685_v59, %v8315_v52  ;;  %v8401_v58 = vsel %vm149_vm0, %v128_v26, 0.0  ;;  %v8404_v59 = vsel %vm149_vm0, %v127_v35, 0.0 }
  0xae   :  { %v696_v35 = vrot.slane %v8180_v23, %v8330_v4 }
  0xaf   :  { %412 = vadd.xlane.f32.xlu1 %v411_v0  ;;  %409 = vadd.xlane.f32.xlu0 %v408_v1  ;;  %v438_v0 = vsel %vm149_vm0, %v117_v56, 0.0  ;;  %v738_v3 = vrot.slane %v8164_v14, %v8354_v18  ;;  %v689_v26 = vrot.slane %v8168_v17, %v8366_v28 }
  0xb0   :  { %v8272_v5 = vpop.xlane.xlu1 %208  ;;  %v8276_v8 = vpop.xlane.xlu0 %205 }
  0xb3   :  { %418 = vadd.xlane.f32.xlu1 %v417_v6  ;;  %415 = vadd.xlane.f32.xlu0 %v414_v7  ;;  %v8333_v6 = vsub.s32 %v671_v53, %v8315_v52  ;;  %v120_v7 = vld [vmem:[%s11473_s0 + $0x318] sm:$0xff]  ;;  %v456_v53 = vsel %vm149_vm0, %v123_v16, 0.0 }
  0xb4   :  { %v8284_v11 = vpop.xlane.xlu1 %214  ;;  %v8288_v15 = vpop.xlane.xlu0 %211  ;;  %v447_v31 = vsel %vm149_vm0, %v120_v7, 0.0  ;;  %v745_v7 = vrot.slane %v8164_v14, %v8366_v28  ;;  %v132_v16 = vld [vmem:[%s11473_s0 + $0x378] sm:$0xff] }
  0xb5   :  { %v675_v10 = vrot.slane %v8168_v17, %v8333_v6  ;;  %v759_v52 = vrot.slane %v8176_v20, %v8333_v6 }
  0xb7   :  { %424 = vadd.xlane.f32.xlu1 %v423_v12  ;;  %421 = vadd.xlane.f32.xlu0 %v420_v13  ;;  %v121_v12 = vld [vmem:[%s11473_s0 + $0x320] sm:$0xff]  ;;  %v124_v13 = vld [vmem:[%s11473_s0 + $0x338] sm:$0xff] }
  0xb8   :  { %v8296_v21 = vpop.xlane.xlu1 %220  ;;  %v8300_v25 = vpop.xlane.xlu0 %217  ;;  %v450_v49 = vsel %vm149_vm0, %v121_v12, 0.0  ;;  %v459_v50 = vsel %vm149_vm0, %v124_v13, 0.0 }
  0xb9   :  { %11556 = vst [vmem:[#allocation6_spill] sm:$0xff] %v8300_v25  ;;  %v920_v25 = vrot.slane %v8212_v39, %v8330_v4 }
  0xbb   :  { %430 = vadd.xlane.f32.xlu1 %v429_v22  ;;  %427 = vadd.xlane.f32.xlu0 %v426_v24  ;;  %v126_v22 = vld [vmem:[%s11473_s0 + $0x348] sm:$0xff]  ;;  %v125_v24 = vld [vmem:[%s11473_s0 + $0x340] sm:$0xff] }
  0xbc   :  { %v8308_v41 = vpop.xlane.xlu1 %226  ;;  %v8312_v46 = vpop.xlane.xlu0 %223  ;;  %v8395_v55 = vsel %vm149_vm0, %v126_v22, 0.0  ;;  %v8398_v56 = vsel %vm149_vm0, %v125_v24, 0.0  ;;  %v752_v24 = vrot.slane %v8176_v20, %v8330_v4 }
  0xbd   :  { %11557 = vst [vmem:[#allocation7_spill] sm:$0xff] %v8308_v41  ;;  %11558 = vst [vmem:[#allocation8_spill] sm:$0xff] %v8312_v46 }
  0xbf   :  { %436 = vadd.xlane.f32.xlu1 %v435_v43  ;;  %433 = vadd.xlane.f32.xlu0 %v432_v44  ;;  %v724_v43 = vrot.slane %v8164_v14, %v8330_v4  ;;  %v731_v44 = vrot.slane %v8164_v14, %v8333_v6  ;;  %v682_v14 = vrot.slane %v8168_v17, %v8354_v18 }
  0xc0   :  { %v8323_v61 = vpop.xlane.xlu1 %232  ;;  %v8327_v1 = vpop.xlane.xlu0 %229  ;;  %v717_v17 = vrot.slane %v8180_v23, %v8366_v28 }
  0xc1   :  { %11560 = vst [vmem:[#allocation10_spill] sm:$0xff] %v8323_v61  ;;  %11561 = vst [vmem:[#allocation11_spill] sm:$0xff] %v8327_v1  ;;  %v8427_v22 = vcombine.low %v724_v43, %v731_v44  ;;  %v133_v43 = vld [vmem:[%s11473_s0 + $0x380] sm:$0xff]  ;;  %v136_v44 = vld [vmem:[%s11473_s0 + $0x398] sm:$0xff] }
  0xc3   :  { %442 = vadd.xlane.f32.xlu1 %v441_v62  ;;  %439 = vadd.xlane.f32.xlu0 %v438_v0  ;;  %v8407_v62 = vsel %vm149_vm0, %v130_v37, 0.0  ;;  %v8410_v0 = vsel %vm149_vm0, %v129_v38, 0.0  ;;  %v703_v37 = vrot.slane %v8180_v23, %v8333_v6  ;;  %v710_v38 = vrot.slane %v8180_v23, %v8354_v18 }
  0xc4   :  { %v8368_v29 = vpop.xlane.xlu1 %238  ;;  %v8372_v34 = vpop.xlane.xlu0 %235  ;;  %v773_v23 = vrot.slane %v8176_v20, %v8366_v28 }
  0xc5   :  { %11562 = vst [vmem:[#allocation12_spill] sm:$0xff] %v8368_v29  ;;  %11563 = vst [vmem:[#allocation13_spill] sm:$0xff] %v8372_v34  ;;  %v4281_v34 = vcombine.low %v738_v3, %v745_v7  ;;  %v8467_v29 = vcombine.low %v668_v9, %v675_v10  ;;  %v8488_v3 = vsel %vm149_vm0, %v136_v44, 0.0  ;;  %v8491_v7 = vsel %vm149_vm0, %v135_v19, 0.0 }
  0xc6   :  { %v808_v9 = vrot.slane %v8188_v27, %v8330_v4  ;;  %v815_v10 = vrot.slane %v8188_v27, %v8333_v6  ;;  %v4288_v19 = vrot.slane %v8427_v22, %v8384_v40  ;;  %v829_v44 = vrot.slane %v8188_v27, %v8366_v28 }
  0xc7   :  { %448 = vadd.xlane.f32.xlu1 %v447_v31  ;;  %445 = vadd.xlane.f32.xlu0 %v444_v32  ;;  %v131_v31 = vld [vmem:[%s11473_s0 + $0x370] sm:$0xff]  ;;  %v134_v32 = vld [vmem:[%s11473_s0 + $0x388] sm:$0xff]  ;;  %v780_v22 = vrot.slane %v8192_v30, %v8330_v4 }
  0xc8   :  { %v8420_v12 = vpop.xlane.xlu1 %244  ;;  %v8422_v13 = vpop.xlane.xlu0 %241  ;;  %v8474_v46 = vsel %vm149_vm0, %v131_v31, 0.0  ;;  %v8477_v41 = vsel %vm149_vm0, %v134_v32, 0.0  ;;  %v4264_v31 = vcombine.low %v710_v38, %v717_v17  ;;  %v8497_v32 = vcombine.low %v752_v24, %v759_v52 }
  0xc9   :  { %11564 = vst [vmem:[#allocation14_spill] sm:$0xff] %v8420_v12  ;;  %11565 = vst [vmem:[#allocation15_spill] sm:$0xff] %v8422_v13  ;;  %v766_v13 = vrot.slane %v8176_v20, %v8354_v18  ;;  %v8465_v12 = vsel %vm149_vm0, %v132_v16, 0.0  ;;  %v138_v20 = vld [vmem:[%s11473_s0 + $0x3a8] sm:$0xff]  ;;  %v4263_v16 = vcombine.low %v696_v35, %v703_v37  ;;  %v787_v24 = vrot.slane %v8192_v30, %v8333_v6 }
  0xca   :  { %v801_v37 = vrot.slane %v8192_v30, %v8366_v28  ;;  %v8528_v38 = vcombine.low %v808_v9, %v815_v10  ;;  %v836_v9 = vrot.slane %v8204_v36, %v8330_v4  ;;  %v843_v10 = vrot.slane %v8204_v36, %v8333_v6 }
  0xcb   :  { %454 = vadd.xlane.f32.xlu1 %v453_v47  ;;  %451 = vadd.xlane.f32.xlu0 %v450_v49  ;;  %v8482_v47 = vcombine.low %v682_v14, %v689_v26  ;;  %v8485_v49 = vsel %vm149_vm0, %v133_v43, 0.0  ;;  %v8499_v14 = vcombine.low %v766_v13, %v773_v23  ;;  %v8502_v26 = vsel %vm149_vm0, %v138_v20, 0.0 }
  0xcc   :  { %v8469_v1 = vpop.xlane.xlu1 %250  ;;  %v8471_v61 = vpop.xlane.xlu0 %247  ;;  %v822_v43 = vrot.slane %v8188_v27, %v8354_v18  ;;  %v794_v27 = vrot.slane %v8192_v30, %v8354_v18  ;;  %v4271_v17 = vrot.slane %v4263_v16, %v8384_v40  ;;  %v4278_v23 = vrot.slane %v4264_v31, %v8384_v40 }
  0xcd   :  { %11566 = vst [vmem:[#allocation16_spill] sm:$0xff] %v8469_v1  ;;  %11567 = vst [vmem:[#allocation17_spill] sm:$0xff] %v8471_v61  ;;  %v871_v20 = vrot.slane %v8200_v33, %v8333_v6  ;;  %v878_v13 = vrot.slane %v8200_v33, %v8354_v18  ;;  %v850_v16 = vrot.slane %v8204_v36, %v8354_v18 }
  0xce   :  { %v857_v31 = vrot.slane %v8204_v36, %v8366_v28  ;;  %v8564_v61 = vcombine.low %v794_v27, %v801_v37  ;;  %v927_v36 = vrot.slane %v8212_v39, %v8333_v6  ;;  %v899_v37 = vrot.slane %v8216_v42, %v8333_v6 }
  0xcf   :  { %460 = vadd.xlane.f32.xlu1 %v459_v50  ;;  %457 = vadd.xlane.f32.xlu0 %v456_v53  ;;  %v137_v50 = vld [vmem:[%s11473_s0 + $0x3a0] sm:$0xff]  ;;  %v4295_v53 = vrot.slane %v4281_v34, %v8384_v40  ;;  %v864_v34 = vrot.slane %v8200_v33, %v8330_v4 }
  0xd0   :  { %v8510_v35 = vpop.xlane.xlu1 %256  ;;  %v8512_v52 = vpop.xlane.xlu0 %253  ;;  %v8543_v30 = vsel %vm149_vm0, %v137_v50, 0.0  ;;  %v8560_v50 = vcombine.low %v822_v43, %v829_v44 }
  0xd1   :  { %11568 = vst [vmem:[#allocation18_spill] sm:$0xff] %v8510_v35  ;;  %11569 = vst [vmem:[#allocation19_spill] sm:$0xff] %v8512_v52  ;;  %v885_v52 = vrot.slane %v8200_v33, %v8366_v28  ;;  %v8562_v35 = vcombine.low %v780_v22, %v787_v24  ;;  %v8566_v1 = vcombine.low %v4288_v19, %v4295_v53 }
  0xd2   :  { %v8576_v43 = vcombine.low %v864_v34, %v871_v20  ;;  %v8585_v53 = vcombine.low %v4271_v17, %v4278_v23  ;;  %v8587_v22 = vcombine.low %v836_v9, %v843_v10  ;;  %v8589_v24 = vcombine.low %v850_v16, %v857_v31 }
  0xd3   :  { %466 = vadd.xlane.f32.xlu1 %v8395_v55  ;;  %463 = vadd.xlane.f32.xlu0 %v8398_v56  ;;  %v140_v56 = vld [vmem:[%s11473_s0 + $0x3b8] sm:$0xff]  ;;  %11572 = vst [vmem:[#allocation22_spill] sm:$0xff] %v8566_v1  ;;  %v8578_v44 = vcombine.low %v878_v13, %v885_v52  ;;  %v139_v52 = vld [vmem:[%s11473_s0 + $0x3b0] sm:$0xff]  ;;  %v892_v13 = vrot.slane %v8216_v42, %v8330_v4 }
  0xd4   :  { %v8553_v33 = vpop.xlane.xlu1 %262  ;;  %v8555_v55 = vpop.xlane.xlu0 %259  ;;  %v8583_v19 = vsel %vm149_vm0, %v140_v56, 0.0  ;;  %v906_v34 = vrot.slane %v8216_v42, %v8354_v18  ;;  %v913_v17 = vrot.slane %v8216_v42, %v8366_v28  ;;  %v4399_v23 = vcombine.low %v920_v25, %v927_v36 }
  0xd5   :  { %11570 = vst [vmem:[#allocation20_spill] sm:$0xff] %v8553_v33  ;;  %11571 = vst [vmem:[#allocation21_spill] sm:$0xff] %v8555_v55  ;;  %v934_v55 = vrot.slane %v8212_v39, %v8354_v18  ;;  %v941_v33 = vrot.slane %v8212_v39, %v8366_v28  ;;  %v983_v9 = vrot.slane %v8224_v45, %v8333_v6  ;;  %v8623_v42 = vsel %vm149_vm0, %v139_v52, 0.0 }
  0xd6   :  { %v990_v10 = vrot.slane %v8224_v45, %v8354_v18  ;;  %v997_v16 = vrot.slane %v8224_v45, %v8366_v28  ;;  %v948_v25 = vrot.slane %v8228_v48, %v8330_v4  ;;  %v962_v31 = vrot.slane %v8228_v48, %v8354_v18 }
  0xd7   :  { %472 = vadd.xlane.f32.xlu1 %v8401_v58  ;;  %469 = vadd.xlane.f32.xlu0 %v8404_v59  ;;  %v4261_v58 = vrot.slane %v8482_v47, %v8384_v40  ;;  %v4305_v59 = vrot.slane %v8497_v32, %v8384_v40  ;;  %v4400_v20 = vcombine.low %v934_v55, %v941_v33 }
  0xd8   :  { %v8591_v27 = vpop.xlane.xlu1 %268  ;;  %v8593_v39 = vpop.xlane.xlu0 %265  ;;  %v976_v47 = vrot.slane %v8224_v45, %v8330_v4  ;;  %v4312_v32 = vrot.slane %v8499_v14, %v8384_v40  ;;  %v955_v14 = vrot.slane %v8228_v48, %v8333_v6  ;;  %v969_v33 = vrot.slane %v8228_v48, %v8366_v28 }
  0xd9   :  { %v8640_v55 = vcombine.low %v892_v13, %v899_v37  ;;  %v8642_v56 = vcombine.low %v906_v34, %v913_v17  ;;  %v11574_v36 = vrot.slane %v8467_v29, %v8384_v40  ;;  %v4322_v48 = vrot.slane %v8562_v35, %v8384_v40 }
  0xda   :  { %v1032_v1 = vrot.slane %v8236_v51, %v8330_v4  ;;  %v1046_v13 = vrot.slane %v8236_v51, %v8354_v18  ;;  %v1053_v37 = vrot.slane %v8236_v51, %v8366_v28  ;;  %v8659_v34 = vcombine.low %v976_v47, %v983_v9  ;;  %v141_v47 = vld [vmem:[%s11473_s0 + $0x3c0] sm:$0xff] }
  0xdb   :  { %478 = vadd.xlane.f32.xlu1 %v8407_v62  ;;  %475 = vadd.xlane.f32.xlu0 %v8410_v0  ;;  %v142_v0 = vld [vmem:[%s11473_s0 + $0x3c8] sm:$0xff]  ;;  %v8647_v52 = vcombine.low %v11574_v36, %v4261_v58  ;;  %v8661_v29 = vcombine.low %v990_v10, %v997_v16  ;;  %v8668_v58 = vcombine.low %v4305_v59, %v4312_v32 }
  0xdc   :  { %v8633_v45 = vpop.xlane.xlu1 %274  ;;  %v8635_v62 = vpop.xlane.xlu0 %271  ;;  %v8666_v35 = vsel %vm149_vm0, %v142_v0, 0.0  ;;  %v8670_v17 = vcombine.low %v948_v25, %v955_v14  ;;  %v8672_v36 = vcombine.low %v962_v31, %v969_v33  ;;  %v1004_v59 = vrot.slane %v8240_v54, %v8330_v4 }
  0xdd   :  { %11573 = vst [vmem:[#allocation23_spill] sm:$0xff] %v8635_v62  ;;  %11575 = vst [vmem:[#allocation24_spill] sm:$0xff] %v8647_v52  ;;  %v1039_v62 = vrot.slane %v8236_v51, %v8333_v6  ;;  %v1011_v32 = vrot.slane %v8240_v54, %v8333_v6  ;;  %v1018_v9 = vrot.slane %v8240_v54, %v8354_v18 }
  0xde   :  { %v1025_v10 = vrot.slane %v8240_v54, %v8366_v28  ;;  %v8693_v25 = vcombine.low %v1046_v13, %v1053_v37  ;;  %v1095_v14 = vrot.slane %v8248_v57, %v8333_v6  ;;  %v1102_v31 = vrot.slane %v8248_v57, %v8354_v18 }
  0xdf   :  { %484 = vadd.xlane.f32.xlu1 %v8465_v12  ;;  %481 = vadd.xlane.f32.xlu0 %v8474_v46  ;;  %v4407_v12 = vrot.slane %v4399_v23, %v8384_v40  ;;  %v4414_v46 = vrot.slane %v4400_v20, %v8384_v40  ;;  %v8691_v16 = vcombine.low %v1032_v1, %v1039_v62  ;;  %v8708_v54 = vsel %vm149_vm0, %v141_v47, 0.0 }
  0xe0   :  { %v8674_v52 = vpop.xlane.xlu1 %280  ;;  %v8676_v51 = vpop.xlane.xlu0 %277  ;;  %v1088_v23 = vrot.slane %v8248_v57, %v8330_v4  ;;  %v4329_v20 = vrot.slane %v8564_v61, %v8384_v40  ;;  %v1109_v33 = vrot.slane %v8248_v57, %v8366_v28  ;;  %v1060_v1 = vrot.slane %v8252_v60, %v8330_v4 }
  0xe1   :  { %11576 = vst [vmem:[#allocation25_spill] sm:$0xff] %v8674_v52  ;;  %11577 = vst [vmem:[#allocation26_spill] sm:$0xff] %v8676_v51  ;;  %v1067_v61 = vrot.slane %v8252_v60, %v8333_v6  ;;  %v1074_v62 = vrot.slane %v8252_v60, %v8354_v18  ;;  %v1081_v0 = vrot.slane %v8252_v60, %v8366_v28 }
  0xe2   :  { %v8725_v13 = vcombine.low %v1004_v59, %v1011_v32  ;;  %v8727_v37 = vcombine.low %v1018_v9, %v1025_v10  ;;  %v8729_v47 = vcombine.low %v4407_v12, %v4414_v46  ;;  %v4441_v51 = vrot.slane %v8659_v34, %v8384_v40 }
  0xe3   :  { %490 = vadd.xlane.f32.xlu1 %v8477_v41  ;;  %487 = vadd.xlane.f32.xlu0 %v8485_v49  ;;  %v144_v49 = vld [vmem:[%s11473_s0 + $0x3d8] sm:$0xff]  ;;  %v1144_v60 = vrot.slane %v8260_v63, %v8330_v4  ;;  %v1165_v59 = vrot.slane %v8260_v63, %v8366_v28  ;;  %v8741_v32 = vcombine.low %v1088_v23, %v1095_v14  ;;  %v143_v23 = vld [vmem:[%s11473_s0 + $0x3d0] sm:$0xff] }
  0xe4   :  { %v8718_v57 = vpop.xlane.xlu1 %286  ;;  %v8720_v41 = vpop.xlane.xlu0 %283  ;;  %11580 = vst [vmem:[#allocation29_spill] sm:$0xff] %v8729_v47  ;;  %v8743_v9 = vcombine.low %v1102_v31, %v1109_v33  ;;  %v8748_v34 = vsel %vm149_vm0, %v144_v49, 0.0  ;;  %v8750_v12 = vcombine.low %v4322_v48, %v4329_v20  ;;  %v8752_v46 = vcombine.low %v1060_v1, %v1067_v61 }
  0xe5   :  { %11578 = vst [vmem:[#allocation27_spill] sm:$0xff] %v8718_v57  ;;  %11579 = vst [vmem:[#allocation28_spill] sm:$0xff] %v8720_v41  ;;  %v1151_v57 = vrot.slane %v8260_v63, %v8333_v6  ;;  %v1158_v41 = vrot.slane %v8260_v63, %v8354_v18  ;;  %v8754_v10 = vcombine.low %v1074_v62, %v1081_v0 }
  0xe6   :  { %11581 = vst [vmem:[#allocation30_spill] sm:$0xff] %v8750_v12  ;;  %11582 = vst [vmem:[#allocation31_spill] sm:$0xff] %v8752_v46  ;;  %v1116_v48 = vrot.slane %v8264_v2, %v8330_v4  ;;  %v1123_v20 = vrot.slane %v8264_v2, %v8333_v6  ;;  %v1130_v14 = vrot.slane %v8264_v2, %v8354_v18 }
  0xe7   :  { %496 = vadd.xlane.f32.xlu1 %v8488_v3  ;;  %493 = vadd.xlane.f32.xlu0 %v8491_v7  ;;  %11583 = vst [vmem:[#allocation32_spill] sm:$0xff] %v8754_v10  ;;  %v4448_v3 = vrot.slane %v8661_v29, %v8384_v40  ;;  %v4339_v7 = vrot.slane %v8528_v38, %v8384_v40 }
  0xe8   :  { %v8756_v52 = vpop.xlane.xlu1 %292  ;;  %v8758_v63 = vpop.xlane.xlu0 %289  ;;  %v1137_v31 = vrot.slane %v8264_v2, %v8366_v28  ;;  %v8775_v33 = vcombine.low %v1144_v60, %v1151_v57  ;;  %v8777_v1 = vcombine.low %v1158_v41, %v1165_v59  ;;  %v1200_v29 = vrot.slane %v8272_v5, %v8330_v4 }
  0xe9   :  { %11584 = vst [vmem:[#allocation33_spill] sm:$0xff] %v8756_v52  ;;  %11585 = vst [vmem:[#allocation34_spill] sm:$0xff] %v8758_v63  ;;  %v4346_v38 = vrot.slane %v8560_v50, %v8384_v40  ;;  %v1207_v61 = vrot.slane %v8272_v5, %v8333_v6  ;;  %v1214_v62 = vrot.slane %v8272_v5, %v8354_v18  ;;  %v516_v2 = vsel %vm149_vm0, %v143_v23, 0.0 }
  0xea   :  { %v1221_v0 = vrot.slane %v8272_v5, %v8366_v28  ;;  %v1172_v57 = vrot.slane %v8276_v8, %v8330_v4  ;;  %v1179_v50 = vrot.slane %v8276_v8, %v8333_v6  ;;  %v1186_v41 = vrot.slane %v8276_v8, %v8354_v18 }
  0xeb   :  { %502 = vadd.xlane.f32.xlu1 %v8502_v26  ;;  %499 = vadd.xlane.f32.xlu0 %v8543_v30  ;;  %v1193_v49 = vrot.slane %v8276_v8, %v8366_v28  ;;  %v146_v26 = vld [vmem:[%s11473_s0 + $0x3e8] sm:$0xff]  ;;  %v8807_v30 = vcombine.low %v1116_v48, %v1123_v20  ;;  %v8809_v59 = vcombine.low %v1130_v14, %v1137_v31 }
  0xec   :  { %v8800_v60 = vpop.xlane.xlu1 %298  ;;  %v8802_v5 = vpop.xlane.xlu0 %295  ;;  %v8811_v23 = vcombine.low %v4441_v51, %v4448_v3  ;;  %v4475_v63 = vrot.slane %v8691_v16, %v8384_v40  ;;  %v1256_v8 = vrot.slane %v8284_v11, %v8330_v4  ;;  %v1277_v48 = vrot.slane %v8284_v11, %v8366_v28 }
  0xed   :  { %11586 = vst [vmem:[#allocation35_spill] sm:$0xff] %v8800_v60  ;;  %11587 = vst [vmem:[#allocation36_spill] sm:$0xff] %v8802_v5  ;;  %v1263_v60 = vrot.slane %v8284_v11, %v8333_v6  ;;  %v1270_v5 = vrot.slane %v8284_v11, %v8354_v18  ;;  %v8823_v20 = vcombine.low %v1200_v29, %v1207_v61  ;;  %v525_v51 = vsel %vm149_vm0, %v146_v26, 0.0  ;;  %v145_v11 = vld [vmem:[%s11473_s0 + $0x3e0] sm:$0xff] }
  0xee   :  { %11588 = vst [vmem:[#allocation37_spill] sm:$0xff] %v8807_v30  ;;  %11589 = vst [vmem:[#allocation38_spill] sm:$0xff] %v8809_v59  ;;  %v8825_v14 = vcombine.low %v1214_v62, %v1221_v0  ;;  %v8830_v16 = vcombine.low %v4339_v7, %v4346_v38  ;;  %v8832_v3 = vcombine.low %v1172_v57, %v1179_v50 }
  0xef   :  { %11590 = vst [vmem:[#allocation39_spill] sm:$0xff] %v8811_v23  ;;  %508 = vadd.xlane.f32.xlu1 %v8583_v19  ;;  %505 = vadd.xlane.f32.xlu0 %v8623_v42  ;;  %v8834_v31 = vcombine.low %v1186_v41, %v1193_v49  ;;  %v4482_v19 = vrot.slane %v8693_v25, %v8384_v40 }
  0xf0   :  { %11591 = vst [vmem:[#allocation40_spill] sm:$0xff] %v8830_v16  ;;  %11592 = vst [vmem:[#allocation41_spill] sm:$0xff] %v8832_v3  ;;  %v8836_v59 = vpop.xlane.xlu1 %304  ;;  %v8838_v30 = vpop.xlane.xlu0 %301  ;;  %v4356_v42 = vrot.slane %v8587_v22, %v8384_v40  ;;  %v1228_v7 = vrot.slane %v8288_v15, %v8330_v4  ;;  %v1235_v29 = vrot.slane %v8288_v15, %v8333_v6 }
  0xf1   :  { %11593 = vst [vmem:[#allocation42_spill] sm:$0xff] %v8834_v31  ;;  %11594 = vst [vmem:[#allocation43_spill] sm:$0xff] %v8836_v59  ;;  %v1242_v38 = vrot.slane %v8288_v15, %v8354_v18  ;;  %v1249_v61 = vrot.slane %v8288_v15, %v8366_v28  ;;  %v8855_v62 = vcombine.low %v1256_v8, %v1263_v60  ;;  %v522_v15 = vsel %vm149_vm0, %v145_v11, 0.0  ;;  %v11600_v59 = vld [vmem:[#allocation8_spill] sm:$0xff] }
  0xf2   :  { %11595 = vst [vmem:[#allocation44_spill] sm:$0xff] %v8838_v30  ;;  %v8857_v0 = vcombine.low %v1270_v5, %v1277_v48  ;;  %v4363_v25 = vrot.slane %v8589_v24, %v8384_v40  ;;  %v4509_v22 = vrot.slane %v8741_v32, %v8384_v40  ;;  %v1312_v57 = vrot.slane %v8296_v21, %v8330_v4  ;;  %v11596_v32 = vld [vmem:[#allocation6_spill] sm:$0xff] }
  0xf3   :  { %v1319_v50 = vrot.slane %v8296_v21, %v8333_v6  ;;  %v1326_v41 = vrot.slane %v8296_v21, %v8354_v18  ;;  %514 = vadd.xlane.f32.xlu1 %v8666_v35  ;;  %511 = vadd.xlane.f32.xlu0 %v8708_v54  ;;  %v1333_v24 = vrot.slane %v8296_v21, %v8366_v28  ;;  %v148_v35 = vld [vmem:[%s11473_s0 + $0x3f8] sm:$0xff]  ;;  %v11599_v54 = vld [vmem:[#allocation7_spill] sm:$0xff] }
  0xf4   :  { %v1284_v49 = vrot.slane %v11596_v32, %v8330_v4  ;;  %v1291_v60 = vrot.slane %v11596_v32, %v8333_v6  ;;  %v1298_v5 = vrot.slane %v11596_v32, %v8354_v18  ;;  %v8880_v26 = vpop.xlane.xlu1 %310  ;;  %v8882_v8 = vpop.xlane.xlu0 %307  ;;  %v1368_v21 = vrot.slane %v11599_v54, %v8330_v4 }
  0xf5   :  { %11597 = vst [vmem:[#allocation6_spill] sm:$0xff] %v8880_v26  ;;  %11598 = vst [vmem:[#allocation45_spill] sm:$0xff] %v8882_v8  ;;  %v1375_v48 = vrot.slane %v11599_v54, %v8333_v6  ;;  %v1305_v11 = vrot.slane %v11596_v32, %v8366_v28  ;;  %v4516_v30 = vrot.slane %v8743_v9, %v8384_v40  ;;  %v531_v9 = vsel %vm149_vm0, %v148_v35, 0.0 }
  0xf6   :  { %v1382_v26 = vrot.slane %v11599_v54, %v8354_v18  ;;  %v1389_v8 = vrot.slane %v11599_v54, %v8366_v28  ;;  %v1340_v31 = vrot.slane %v11600_v59, %v8330_v4  ;;  %v1347_v3 = vrot.slane %v11600_v59, %v8333_v6 }
  0xf7   :  { %v1354_v16 = vrot.slane %v11600_v59, %v8354_v18  ;;  %v1361_v32 = vrot.slane %v11600_v59, %v8366_v28  ;;  %520 = vadd.xlane.f32.xlu1 %v8748_v34  ;;  %517 = vadd.xlane.f32.xlu0 %v516_v2  ;;  %v8909_v52 = vcombine.low %v4475_v63, %v4482_v19  ;;  %v147_v34 = vld [vmem:[%s11473_s0 + $0x3f0] sm:$0xff] }
  0xf8   :  { %v8911_v54 = vcombine.low %v1312_v57, %v1319_v50  ;;  %v8913_v23 = vcombine.low %v1326_v41, %v1333_v24  ;;  %v8915_v12 = vcombine.low %v1228_v7, %v1235_v29  ;;  %v8917_v10 = vcombine.low %v1242_v38, %v1249_v61  ;;  %v8919_v47 = vpop.xlane.xlu1 %316  ;;  %v8921_v46 = vpop.xlane.xlu0 %313 }
  0xf9   :  { %11603 = vst [vmem:[#allocation46_spill] sm:$0xff] %v8919_v47  ;;  %11604 = vst [vmem:[#allocation47_spill] sm:$0xff] %v8921_v46  ;;  %v8926_v2 = vcombine.low %v1284_v49, %v1291_v60  ;;  %v8928_v63 = vcombine.low %v1298_v5, %v1305_v11  ;;  %v8930_v59 = vcombine.low %v4356_v42, %v4363_v25  ;;  %v528_v50 = vsel %vm149_vm0, %v147_v34, 0.0  ;;  %v11609_v25 = vld [vmem:[#allocation10_spill] sm:$0xff]  ;;  %v11613_v49 = vld [vmem:[#allocation12_spill] sm:$0xff] }
  0xfa   :  { %11601 = vst [vmem:[#allocation7_spill] sm:$0xff] %v8915_v12  ;;  %11602 = vst [vmem:[#allocation8_spill] sm:$0xff] %v8917_v10  ;;  %v4373_v19 = vrot.slane %v8576_v43, %v8384_v40  ;;  %v8934_v7 = vcombine.low %v1368_v21, %v1375_v48  ;;  %v8936_v29 = vcombine.low %v1382_v26, %v1389_v8  ;;  %v11614_v21 = vld [vmem:[#allocation13_spill] sm:$0xff]  ;;  %vm7470_vm0 = vcmask 1041409  }
  0xfb   :  { %11605 = vst [vmem:[#allocation48_spill] sm:$0xff] %v8926_v2  ;;  %11606 = vst [vmem:[#allocation49_spill] sm:$0xff] %v8928_v63  ;;  %v8938_v38 = vcombine.low %v1340_v31, %v1347_v3  ;;  %v8940_v61 = vcombine.low %v4509_v22, %v4516_v30  ;;  %v8942_v57 = vcombine.low %v1354_v16, %v1361_v32  ;;  %526 = vadd.xlane.f32.xlu1 %v525_v51 }
  0xfc   :  { %523 = vadd.xlane.f32.xlu0 %v522_v15  ;;  %v4380_v42 = vrot.slane %v8578_v44, %v8384_v40  ;;  %v4543_v43 = vrot.slane %v8775_v33, %v8384_v40  ;;  %v1424_v41 = vrot.slane %v11609_v25, %v8330_v4  ;;  %v1431_v3 = vrot.slane %v11609_v25, %v8333_v6  ;;  %v8957_v16 = vpop.xlane.xlu1 %322  ;;  %v8959_v31 = vpop.xlane.xlu0 %319  ;;  %v11612_v44 = vld [vmem:[#allocation11_spill] sm:$0xff] }
  0xfd   :  { %11607 = vst [vmem:[#allocation50_spill] sm:$0xff] %v8938_v38  ;;  %11608 = vst [vmem:[#allocation51_spill] sm:$0xff] %v8942_v57  ;;  %v1438_v30 = vrot.slane %v11609_v25, %v8354_v18  ;;  %v1445_v51 = vrot.slane %v11609_v25, %v8366_v28  ;;  %v1396_v22 = vrot.slane %v11612_v44, %v8330_v4  ;;  %v11618_v38 = vld [vmem:[#allocation14_spill] sm:$0xff] }
  0xfe   :  { %11610 = vst [vmem:[#allocation10_spill] sm:$0xff] %v8957_v16  ;;  %11611 = vst [vmem:[#allocation52_spill] sm:$0xff] %v8959_v31  ;;  %v1403_v33 = vrot.slane %v11612_v44, %v8333_v6  ;;  %v1410_v15 = vrot.slane %v11612_v44, %v8354_v18  ;;  %v1417_v24 = vrot.slane %v11612_v44, %v8366_v28 }
  0xff   :  { %v1480_v60 = vrot.slane %v11613_v49, %v8330_v4  ;;  %v1487_v5 = vrot.slane %v11613_v49, %v8333_v6  ;;  %v1494_v26 = vrot.slane %v11613_v49, %v8354_v18  ;;  %v4550_v8 = vrot.slane %v8777_v1, %v8384_v40  ;;  %532 = vadd.xlane.f32.xlu1 %v531_v9 }
 0x100   :  { %v1501_v35 = vrot.slane %v11613_v49, %v8366_v28  ;;  %v1452_v48 = vrot.slane %v11614_v21, %v8330_v4  ;;  %v1459_v11 = vrot.slane %v11614_v21, %v8333_v6  ;;  %529 = vadd.xlane.f32.xlu0 %v528_v50  ;;  %v8983_v32 = vcombine.low %v1424_v41, %v1431_v3  ;;  %v8991_v44 = vpop.xlane.xlu1 %328  ;;  %v8993_v49 = vpop.xlane.xlu0 %325 }
 0x101   :  { %v8985_v34 = vcombine.low %v1438_v30, %v1445_v51  ;;  %v1466_v25 = vrot.slane %v11614_v21, %v8354_v18  ;;  %v1473_v1 = vrot.slane %v11614_v21, %v8366_v28  ;;  %11615 = vst [vmem:[#allocation11_spill] sm:$0xff] %v8991_v44  ;;  %11616 = vst [vmem:[#allocation12_spill] sm:$0xff] %v8993_v49 }
 0x102   :  { %v8995_v57 = vcombine.low %v1396_v22, %v1403_v33  ;;  %v1536_v9 = vrot.slane %v11618_v38, %v8330_v4  ;;  %v1543_v50 = vrot.slane %v11618_v38, %v8333_v6  ;;  %v9001_v41 = vcombine.low %v4373_v19, %v4380_v42  ;;  %v11622_v42 = vld [vmem:[#allocation15_spill] sm:$0xff] }
 0x103   :  { %v9003_v3 = vcombine.low %v1410_v15, %v1417_v24  ;;  %v1550_v30 = vrot.slane %v11618_v38, %v8354_v18  ;;  %v1557_v51 = vrot.slane %v11618_v38, %v8366_v28  ;;  %v4390_v22 = vrot.slane %v8640_v55, %v8384_v40 }
 0x104   :  { %11617 = vst [vmem:[#allocation13_spill] sm:$0xff] %v8995_v57  ;;  %v9011_v33 = vcombine.low %v1480_v60, %v1487_v5  ;;  %v9013_v21 = vcombine.low %v1494_v26, %v1501_v35  ;;  %v9015_v57 = vcombine.low %v1452_v48, %v1459_v11  ;;  %v9017_v63 = vcombine.low %v4543_v43, %v4550_v8  ;;  %v9023_v24 = vpop.xlane.xlu1 %334  ;;  %v11627_v35 = vld [vmem:[#allocation16_spill] sm:$0xff] }
 0x105   :  { %11619 = vst [vmem:[#allocation14_spill] sm:$0xff] %v9003_v3  ;;  %v9019_v19 = vcombine.low %v1466_v25, %v1473_v1  ;;  %v1508_v15 = vrot.slane %v11622_v42, %v8330_v4  ;;  %11623 = vst [vmem:[#allocation15_spill] sm:$0xff] %v9023_v24  ;;  %v9025_v3 = vpop.xlane.xlu0 %331  ;;  %v4397_v55 = vrot.slane %v8642_v56, %v8384_v40 }
 0x106   :  { %11620 = vst [vmem:[#allocation53_spill] sm:$0xff] %v9015_v57  ;;  %11624 = vst [vmem:[#allocation55_spill] sm:$0xff] %v9025_v3  ;;  %v4577_v38 = vrot.slane %v8823_v20, %v8384_v40  ;;  %v9031_v60 = vcombine.low %v1536_v9, %v1543_v50  ;;  %v1515_v43 = vrot.slane %v11622_v42, %v8333_v6  ;;  %v11628_v9 = vld [vmem:[#allocation17_spill] sm:$0xff] }
 0x107   :  { %11621 = vst [vmem:[#allocation54_spill] sm:$0xff] %v9019_v19  ;;  %v1522_v5 = vrot.slane %v11622_v42, %v8354_v18  ;;  %v1529_v26 = vrot.slane %v11622_v42, %v8366_v28  ;;  %v9039_v8 = vcombine.low %v1550_v30, %v1557_v51  ;;  %v1592_v48 = vrot.slane %v11627_v35, %v8330_v4 }
 0x108   :  { %11625 = vst [vmem:[#allocation56_spill] sm:$0xff] %v9031_v60  ;;  %v4584_v56 = vrot.slane %v8825_v14, %v8384_v40  ;;  %v4424_v20 = vrot.slane %v8670_v17, %v8384_v40  ;;  %v1599_v11 = vrot.slane %v11627_v35, %v8333_v6  ;;  %v1606_v25 = vrot.slane %v11627_v35, %v8354_v18  ;;  %v9061_v51 = vpop.xlane.xlu1 %340 }
 0x109   :  { %11626 = vst [vmem:[#allocation57_spill] sm:$0xff] %v9039_v8  ;;  %v1613_v1 = vrot.slane %v11627_v35, %v8366_v28  ;;  %v1564_v50 = vrot.slane %v11628_v9, %v8330_v4  ;;  %v1571_v30 = vrot.slane %v11628_v9, %v8333_v6  ;;  %v1578_v14 = vrot.slane %v11628_v9, %v8354_v18  ;;  %v9063_v42 = vpop.xlane.xlu0 %337  ;;  %v11631_v35 = vld [vmem:[#allocation18_spill] sm:$0xff] }
 0x10a   :  { %v1585_v17 = vrot.slane %v11628_v9, %v8366_v28  ;;  %11629 = vst [vmem:[#allocation16_spill] sm:$0xff] %v9061_v51  ;;  %11630 = vst [vmem:[#allocation17_spill] sm:$0xff] %v9063_v42  ;;  %v4431_v19 = vrot.slane %v8672_v36, %v8384_v40  ;;  %v1648_v57 = vrot.slane %v11631_v35, %v8330_v4  ;;  %v11632_v9 = vld [vmem:[#allocation19_spill] sm:$0xff] }
 0x10b   :  { %v1655_v3 = vrot.slane %v11631_v35, %v8333_v6  ;;  %v1662_v24 = vrot.slane %v11631_v35, %v8354_v18  ;;  %v1669_v49 = vrot.slane %v11631_v35, %v8366_v28  ;;  %v1620_v51 = vrot.slane %v11632_v9, %v8330_v4 }
 0x10c   :  { %v1627_v42 = vrot.slane %v11632_v9, %v8333_v6  ;;  %v1634_v36 = vrot.slane %v11632_v9, %v8354_v18  ;;  %v1641_v44 = vrot.slane %v11632_v9, %v8366_v28  ;;  %v9083_v2 = vcombine.low %v1592_v48, %v1599_v11  ;;  %v9097_v10 = vpop.xlane.xlu1 %346 }
 0x10d   :  { %v9085_v31 = vcombine.low %v1508_v15, %v1515_v43  ;;  %v9087_v8 = vcombine.low %v1522_v5, %v1529_v26  ;;  %v9089_v60 = vcombine.low %v4390_v22, %v4397_v55  ;;  %v9091_v35 = vcombine.low %v1606_v25, %v1613_v1  ;;  %v9099_v47 = vpop.xlane.xlu0 %343  ;;  %v11638_v15 = vld [vmem:[#allocation20_spill] sm:$0xff] }
 0x10e   :  { %v9093_v16 = vcombine.low %v1564_v50, %v1571_v30  ;;  %v9095_v46 = vcombine.low %v1578_v14, %v1585_v17  ;;  %11637 = vst [vmem:[#allocation60_spill] sm:$0xff] %v9099_v47  ;;  %v9101_v12 = vcombine.low %v4577_v38, %v4584_v56  ;;  %v9103_v48 = vcombine.low %v1648_v57, %v1655_v3 }
 0x10f   :  { %11633 = vst [vmem:[#allocation18_spill] sm:$0xff] %v9085_v31  ;;  %11634 = vst [vmem:[#allocation19_spill] sm:$0xff] %v9087_v8  ;;  %v1704_v43 = vrot.slane %v11638_v15, %v8330_v4  ;;  %v1711_v22 = vrot.slane %v11638_v15, %v8333_v6  ;;  %v4611_v55 = vrot.slane %v8855_v62, %v8384_v40  ;;  %v11649_v8 = vld [vmem:[#allocation24_spill] sm:$0xff] }
 0x110   :  { %11635 = vst [vmem:[#allocation58_spill] sm:$0xff] %v9093_v16  ;;  %11636 = vst [vmem:[#allocation59_spill] sm:$0xff] %v9095_v46  ;;  %v9111_v5 = vcombine.low %v1662_v24, %v1669_v49  ;;  %v9113_v26 = vcombine.low %v1620_v51, %v1627_v42  ;;  %v9115_v11 = vcombine.low %v1634_v36, %v1641_v44  ;;  %v11641_v49 = vld [vmem:[#allocation21_spill] sm:$0xff]  ;;  %6426 = vperm.xlu1 %7828, %v8585_v53  }
 0x111   :  { %v9117_v25 = vcombine.low %v4424_v20, %v4431_v19  ;;  %v1718_v57 = vrot.slane %v11638_v15, %v8354_v18  ;;  %v1725_v3 = vrot.slane %v11638_v15, %v8366_v28  ;;  %v4618_v38 = vrot.slane %v8857_v0, %v8384_v40  ;;  %v9135_v20 = vpop.xlane.xlu1 %352  ;;  %v9138_v0 = vpop.xlane.xlu0 %349 }
 0x112   :  { %11639 = vst [vmem:[#allocation20_spill] sm:$0xff] %v9113_v26  ;;  %11640 = vst [vmem:[#allocation61_spill] sm:$0xff] %v9115_v11  ;;  %v4458_v62 = vrot.slane %v8725_v13, %v8384_v40  ;;  %v1676_v24 = vrot.slane %v11641_v49, %v8330_v4  ;;  %v1683_v44 = vrot.slane %v11641_v49, %v8333_v6 }
 0x113   :  { %v1690_v19 = vrot.slane %v11641_v49, %v8354_v18  ;;  %v1697_v56 = vrot.slane %v11641_v49, %v8366_v28  ;;  %11642 = vst [vmem:[#allocation21_spill] sm:$0xff] %v9135_v20  ;;  %11643 = vst [vmem:[#allocation62_spill] sm:$0xff] %v9138_v0  ;;  %v9140_v1 = vcombine.low %v1704_v43, %v1711_v22  ;;  %v11646_v49 = vld [vmem:[#allocation22_spill] sm:$0xff] }
 0x114   :  { %v1760_v13 = vrot.slane %v8591_v27, %v8330_v4  ;;  %v4465_v50 = vrot.slane %v8727_v37, %v8384_v40  ;;  %v4645_v30 = vrot.slane %v8911_v54, %v8384_v40  ;;  %v1767_v14 = vrot.slane %v8591_v27, %v8333_v6  ;;  %6429 = vperm.xlu1 %7828, %v11646_v49  }
 0x115   :  { %11644 = vst [vmem:[#allocation63_spill] sm:$0xff] %v9140_v1  ;;  %v1774_v17 = vrot.slane %v8591_v27, %v8354_v18  ;;  %v1781_v53 = vrot.slane %v8591_v27, %v8366_v28  ;;  %v1732_v51 = vrot.slane %v8593_v39, %v8330_v4  ;;  %v1739_v42 = vrot.slane %v8593_v39, %v8333_v6  ;;  %v9172_v22 = vpop.xlane.xlu1 %358 }
 0x116   :  { %v1746_v37 = vrot.slane %v8593_v39, %v8354_v18  ;;  %v1753_v54 = vrot.slane %v8593_v39, %v8366_v28  ;;  %v4652_v9 = vrot.slane %v8913_v23, %v8384_v40  ;;  %v1816_v36 = vrot.slane %v8633_v45, %v8330_v4  ;;  %11645 = vst [vmem:[#allocation64_spill] sm:$0xff] %v9172_v22  ;;  %v9175_v39 = vpop.xlane.xlu0 %355  ;;  %v11648_v23 = vld [vmem:[#allocation23_spill] sm:$0xff] }
 0x117   :  { %v1823_v27 = vrot.slane %v8633_v45, %v8333_v6  ;;  %v1830_v15 = vrot.slane %v8633_v45, %v8354_v18  ;;  %v1837_v43 = vrot.slane %v8633_v45, %v8366_v28  ;;  %11647 = vst [vmem:[#allocation22_spill] sm:$0xff] %v9175_v39  ;;  %v1788_v11 = vrot.slane %v11648_v23, %v8330_v4 }
 0x118   :  { %v1795_v26 = vrot.slane %v11648_v23, %v8333_v6  ;;  %v1802_v46 = vrot.slane %v11648_v23, %v8354_v18  ;;  %v1809_v16 = vrot.slane %v11648_v23, %v8366_v28  ;;  %6423 = vperm.xlu0 %7827, %v11649_v8   ;;  %v9186_v45 = vcombine.low %v1718_v57, %v1725_v3  ;;  %v11654_v3 = vld [vmem:[#allocation31_spill] sm:$0xff] }
 0x119   :  { %v9188_v31 = vcombine.low %v1676_v24, %v1683_v44  ;;  %v9190_v49 = vcombine.low %v1690_v19, %v1697_v56  ;;  %v9192_v39 = vcombine.low %v4611_v55, %v4618_v38  ;;  %v9194_v22 = vcombine.low %v1760_v13, %v1767_v14  ;;  %v9208_v57 = vpop.xlane.xlu1 %364  ;;  %6432 = vperm.xlu1 %7828, %v8668_v58   ;;  %v11658_v56 = vld [vmem:[#allocation32_spill] sm:$0xff] }
 0x11a   :  { %v9196_v0 = vcombine.low %v1774_v17, %v1781_v53  ;;  %v9198_v20 = vcombine.low %v1732_v51, %v1739_v42  ;;  %v9200_v1 = vcombine.low %v4458_v62, %v4465_v50  ;;  %v9202_v47 = vcombine.low %v1816_v36, %v1823_v27  ;;  %v9211_v55 = vpop.xlane.xlu0 %361  ;;  %v11657_v62 = vld [vmem:[#allocation29_spill] sm:$0xff]  ;;  %v11661_v51 = vld [vmem:[#allocation27_spill] sm:$0xff]  ;;  %v11663_v36 = vld [vmem:[#allocation30_spill] sm:$0xff] }
 0x11b   :  { %11650 = vst [vmem:[#allocation23_spill] sm:$0xff] %v9188_v31  ;;  %11651 = vst [vmem:[#allocation24_spill] sm:$0xff] %v9190_v49  ;;  %v9204_v23 = vcombine.low %v1830_v15, %v1837_v43  ;;  %v9206_v8 = vcombine.low %v1746_v37, %v1753_v54  ;;  %v4492_v38 = vrot.slane %v11654_v3, %v8384_v40  ;;  %v11659_v50 = vld [vmem:[#allocation25_spill] sm:$0xff]  ;;  %v11665_v3 = vld [vmem:[#allocation28_spill] sm:$0xff] }
 0x11c   :  { %11652 = vst [vmem:[#allocation65_spill] sm:$0xff] %v9198_v20  ;;  %v9215_v24 = vcombine.low %v1788_v11, %v1795_v26  ;;  %v9217_v44 = vcombine.low %v1802_v46, %v1809_v16  ;;  %6450 = vperm.xlu0 %7827, %v11657_v62   ;;  %v9220_v19 = vcombine.low %v4645_v30, %v4652_v9  ;;  %v11660_v16 = vld [vmem:[#allocation26_spill] sm:$0xff] }
 0x11d   :  { %11653 = vst [vmem:[#allocation66_spill] sm:$0xff] %v9206_v8  ;;  %v4499_v13 = vrot.slane %v11658_v56, %v8384_v40  ;;  %v1872_v14 = vrot.slane %v11659_v50, %v8330_v4  ;;  %v1879_v58 = vrot.slane %v11659_v50, %v8333_v6  ;;  %v1886_v17 = vrot.slane %v11659_v50, %v8354_v18  ;;  %v9246_v9 = vpop.xlane.xlu1 %370 }
 0x11e   :  { %11655 = vst [vmem:[#allocation31_spill] sm:$0xff] %v9215_v24  ;;  %11656 = vst [vmem:[#allocation67_spill] sm:$0xff] %v9217_v44  ;;  %v1893_v46 = vrot.slane %v11659_v50, %v8366_v28  ;;  %v1844_v26 = vrot.slane %v11660_v16, %v8330_v4  ;;  %v1851_v11 = vrot.slane %v11660_v16, %v8333_v6  ;;  %6435 = vperm.xlu1 %7828, %v11663_v36   ;;  %v9249_v27 = vpop.xlane.xlu0 %367  ;;  %v11666_v50 = vld [vmem:[#allocation39_spill] sm:$0xff] }
 0x11f   :  { %v1858_v30 = vrot.slane %v11660_v16, %v8354_v18  ;;  %v4679_v53 = vrot.slane %v8934_v7, %v8384_v40  ;;  %v1928_v42 = vrot.slane %v11661_v51, %v8330_v4  ;;  %v1935_v37 = vrot.slane %v11661_v51, %v8333_v6  ;;  %11662 = vst [vmem:[#allocation29_spill] sm:$0xff] %v9246_v9 }
 0x120   :  { %v1865_v54 = vrot.slane %v11660_v16, %v8366_v28  ;;  %11664 = vst [vmem:[#allocation32_spill] sm:$0xff] %v9249_v27  ;;  %v4686_v15 = vrot.slane %v8936_v29, %v8384_v40  ;;  %v1942_v7 = vrot.slane %v11661_v51, %v8354_v18  ;;  %v1949_v43 = vrot.slane %v11661_v51, %v8366_v28  ;;  %v11670_v51 = vld [vmem:[#allocation33_spill] sm:$0xff] }
 0x121   :  { %v1900_v62 = vrot.slane %v11665_v3, %v8330_v4  ;;  %v1907_v56 = vrot.slane %v11665_v3, %v8333_v6  ;;  %6456 = vperm.xlu0 %7827, %v11666_v50   ;;  %v9262_v16 = vcombine.low %v1872_v14, %v1879_v58  ;;  %v9264_v36 = vcombine.low %v1886_v17, %v1893_v46  ;;  %v9284_v46 = vpop.xlane.xlu1 %376 }
 0x122   :  { %v1914_v29 = vrot.slane %v11665_v3, %v8354_v18  ;;  %v1921_v44 = vrot.slane %v11665_v3, %v8366_v28  ;;  %v9270_v24 = vcombine.low %v1844_v26, %v1851_v11  ;;  %v1984_v8 = vrot.slane %v11670_v51, %v8330_v4  ;;  %11672 = vst [vmem:[#allocation28_spill] sm:$0xff] %v9284_v46  ;;  %v11673_v26 = vld [vmem:[#allocation40_spill] sm:$0xff]  ;;  %v9287_v11 = vpop.xlane.xlu0 %373  ;;  %v11675_v3 = vld [vmem:[#allocation37_spill] sm:$0xff] }
 0x123   :  { %11667 = vst [vmem:[#allocation25_spill] sm:$0xff] %v9262_v16  ;;  %11668 = vst [vmem:[#allocation26_spill] sm:$0xff] %v9264_v36  ;;  %v1991_v20 = vrot.slane %v11670_v51, %v8333_v6  ;;  %v9276_v49 = vcombine.low %v4492_v38, %v4499_v13  ;;  %v9278_v14 = vcombine.low %v1858_v30, %v1865_v54  ;;  %6438 = vperm.xlu1 %7828, %v11673_v26  }
 0x124   :  { %11669 = vst [vmem:[#allocation27_spill] sm:$0xff] %v9270_v24  ;;  %v1998_v58 = vrot.slane %v11670_v51, %v8354_v18  ;;  %v2005_v17 = vrot.slane %v11670_v51, %v8366_v28  ;;  %11674 = vst [vmem:[#allocation39_spill] sm:$0xff] %v9287_v11  ;;  %v4526_v50 = vrot.slane %v11675_v3, %v8384_v40  ;;  %v11680_v51 = vld [vmem:[#allocation34_spill] sm:$0xff] }
 0x125   :  { %11671 = vst [vmem:[#allocation30_spill] sm:$0xff] %v9278_v14  ;;  %v9291_v24 = vcombine.low %v1928_v42, %v1935_v37  ;;  %v9293_v38 = vcombine.low %v1942_v7, %v1949_v43  ;;  %v9295_v13 = vcombine.low %v1900_v62, %v1907_v56  ;;  %6462 = vperm.xlu0 %7827, %v8909_v52   ;;  %v11681_v14 = vld [vmem:[#allocation38_spill] sm:$0xff]  ;;  %v9320_v62 = vpop.xlane.xlu1 %382 }
 0x126   :  { %v9298_v30 = vcombine.low %v4679_v53, %v4686_v15  ;;  %v9300_v54 = vcombine.low %v1914_v29, %v1921_v44  ;;  %v1956_v26 = vrot.slane %v11680_v51, %v8330_v4  ;;  %v4533_v31 = vrot.slane %v11681_v14, %v8384_v40  ;;  %v11684_v15 = vld [vmem:[#allocation35_spill] sm:$0xff] }
 0x127   :  { %11676 = vst [vmem:[#allocation33_spill] sm:$0xff] %v9291_v24  ;;  %11677 = vst [vmem:[#allocation40_spill] sm:$0xff] %v9293_v38  ;;  %v4713_v42 = vrot.slane %v8983_v32, %v8384_v40  ;;  %v9308_v37 = vcombine.low %v1984_v8, %v1991_v20  ;;  %v1963_v7 = vrot.slane %v11680_v51, %v8333_v6  ;;  %6441 = vperm.xlu1 %7828, %v8930_v59   ;;  %v9323_v32 = vpop.xlane.xlu0 %379  ;;  %v11687_v8 = vld [vmem:[#allocation41_spill] sm:$0xff] }
 0x128   :  { %11678 = vst [vmem:[#allocation37_spill] sm:$0xff] %v9295_v13  ;;  %11679 = vst [vmem:[#allocation68_spill] sm:$0xff] %v9300_v54  ;;  %v1970_v52 = vrot.slane %v11680_v51, %v8354_v18  ;;  %v1977_v44 = vrot.slane %v11680_v51, %v8366_v28  ;;  %v9316_v53 = vcombine.low %v1998_v58, %v2005_v17  ;;  %v11688_v17 = vld [vmem:[#allocation36_spill] sm:$0xff]  ;;  %v11690_v13 = vld [vmem:[#allocation43_spill] sm:$0xff] }
 0x129   :  { %11682 = vst [vmem:[#allocation34_spill] sm:$0xff] %v9308_v37  ;;  %v2040_v43 = vrot.slane %v11684_v15, %v8330_v4  ;;  %11685 = vst [vmem:[#allocation35_spill] sm:$0xff] %v9320_v62  ;;  %v4720_v20 = vrot.slane %v8985_v34, %v8384_v40  ;;  %v4560_v56 = vrot.slane %v11687_v8, %v8384_v40  ;;  %6468 = vperm.xlu0 %7827, %v8940_v61   ;;  %v11689_v8 = vld [vmem:[#allocation42_spill] sm:$0xff]  ;;  %v9362_v62 = vpop.xlane.xlu1 %388 }
 0x12a   :  { %11683 = vst [vmem:[#allocation38_spill] sm:$0xff] %v9316_v53  ;;  %11686 = vst [vmem:[#allocation69_spill] sm:$0xff] %v9323_v32  ;;  %v2047_v29 = vrot.slane %v11684_v15, %v8333_v6  ;;  %v2054_v14 = vrot.slane %v11684_v15, %v8354_v18  ;;  %v2061_v58 = vrot.slane %v11684_v15, %v8366_v28  ;;  %v11691_v32 = vld [vmem:[#allocation44_spill] sm:$0xff] }
 0x12b   :  { %v2012_v59 = vrot.slane %v11688_v17, %v8330_v4  ;;  %v2019_v34 = vrot.slane %v11688_v17, %v8333_v6  ;;  %v2026_v3 = vrot.slane %v11688_v17, %v8354_v18  ;;  %v2033_v51 = vrot.slane %v11688_v17, %v8366_v28  ;;  %11692 = vst [vmem:[#allocation41_spill] sm:$0xff] %v9362_v62  ;;  %v9365_v11 = vpop.xlane.xlu0 %385 }
 0x12c   :  { %v4567_v54 = vrot.slane %v11689_v8, %v8384_v40  ;;  %v2096_v15 = vrot.slane %v11690_v13, %v8330_v4  ;;  %v2103_v53 = vrot.slane %v11690_v13, %v8333_v6  ;;  %v2110_v61 = vrot.slane %v11690_v13, %v8354_v18  ;;  %6444 = vperm.xlu1 %7828, %v9001_v41  }
 0x12d   :  { %v2117_v37 = vrot.slane %v11690_v13, %v8366_v28  ;;  %v2068_v38 = vrot.slane %v11691_v32, %v8330_v4  ;;  %v2075_v17 = vrot.slane %v11691_v32, %v8333_v6  ;;  %v2082_v8 = vrot.slane %v11691_v32, %v8354_v18  ;;  %6474 = vperm.xlu0 %7827, %v9017_v63  }
 0x12e   :  { %v2089_v24 = vrot.slane %v11691_v32, %v8366_v28  ;;  %v9367_v36 = vcombine.low %v2040_v43, %v2047_v29  ;;  %v9369_v13 = vcombine.low %v1956_v26, %v1963_v7  ;;  %v9371_v16 = vcombine.low %v1970_v52, %v1977_v44  ;;  %v11697_v43 = vld [vmem:[#allocation6_spill] sm:$0xff]  ;;  %v9398_v44 = vpop.xlane.xlu1 %394 }
 0x12f   :  { %v9374_v46 = vcombine.low %v4526_v50, %v4533_v31  ;;  %v9376_v27 = vcombine.low %v2054_v14, %v2061_v58  ;;  %v9378_v9 = vcombine.low %v2012_v59, %v2019_v34  ;;  %v9380_v32 = vcombine.low %v2026_v3, %v2033_v51  ;;  %v11703_v34 = vld [vmem:[#allocation8_spill] sm:$0xff] }
 0x130   :  { %11693 = vst [vmem:[#allocation36_spill] sm:$0xff] %v9369_v13  ;;  %11694 = vst [vmem:[#allocation42_spill] sm:$0xff] %v9371_v16  ;;  %v9382_v62 = vcombine.low %v4713_v42, %v4720_v20  ;;  %v9384_v41 = vcombine.low %v2096_v15, %v2103_v53  ;;  %v2152_v26 = vrot.slane %v11697_v43, %v8330_v4  ;;  %6447 = vperm.xlu1 %7828, %v9089_v60   ;;  %v9401_v42 = vpop.xlane.xlu0 %391  ;;  %v11701_v60 = vld [vmem:[#allocation45_spill] sm:$0xff] }
 0x131   :  { %11695 = vst [vmem:[#allocation43_spill] sm:$0xff] %v9378_v9  ;;  %11696 = vst [vmem:[#allocation44_spill] sm:$0xff] %v9380_v32  ;;  %v2159_v7 = vrot.slane %v11697_v43, %v8333_v6  ;;  %v4747_v63 = vrot.slane %v9011_v33, %v8384_v40  ;;  %v9392_v31 = vcombine.low %v2110_v61, %v2117_v37  ;;  %6480 = vperm.xlu0 %7827, %v9101_v12   ;;  %v11702_v12 = vld [vmem:[#allocation46_spill] sm:$0xff]  ;;  %v11704_v61 = vld [vmem:[#allocation47_spill] sm:$0xff] }
 0x132   :  { %v9394_v50 = vcombine.low %v2068_v38, %v2075_v17  ;;  %v9396_v52 = vcombine.low %v2082_v8, %v2089_v24  ;;  %v9403_v53 = vcombine.low %v4560_v56, %v4567_v54  ;;  %v2166_v20 = vrot.slane %v11697_v43, %v8354_v18  ;;  %v11700_v38 = vld [vmem:[#allocation7_spill] sm:$0xff] }
 0x133   :  { %v2173_v33 = vrot.slane %v11697_v43, %v8366_v28  ;;  %v4754_v24 = vrot.slane %v9013_v21, %v8384_v40  ;;  %v4594_v37 = vrot.slane %v11700_v38, %v8384_v40  ;;  %v2124_v29 = vrot.slane %v11701_v60, %v8330_v4  ;;  %v9438_v43 = vpop.xlane.xlu1 %400 }
 0x134   :  { %11698 = vst [vmem:[#allocation6_spill] sm:$0xff] %v9394_v50  ;;  %11699 = vst [vmem:[#allocation70_spill] sm:$0xff] %v9396_v52  ;;  %v2131_v54 = vrot.slane %v11701_v60, %v8333_v6  ;;  %v2138_v56 = vrot.slane %v11701_v60, %v8354_v18  ;;  %v2145_v14 = vrot.slane %v11701_v60, %v8366_v28  ;;  %6453 = vperm.xlu1 %7828, %v9117_v25  }
 0x135   :  { %v9422_v58 = vcombine.low %v2152_v26, %v2159_v7  ;;  %v2208_v21 = vrot.slane %v11702_v12, %v8330_v4  ;;  %v2215_v59 = vrot.slane %v11702_v12, %v8333_v6  ;;  %v4601_v3 = vrot.slane %v11703_v34, %v8384_v40  ;;  %v9441_v26 = vpop.xlane.xlu0 %397  ;;  %6486 = vperm.xlu0 %7827, %v9192_v39   ;;  %v11705_v34 = vld [vmem:[#allocation10_spill] sm:$0xff]  ;;  %v11709_v39 = vld [vmem:[#allocation56_spill] sm:$0xff] }
 0x136   :  { %v2222_v51 = vrot.slane %v11702_v12, %v8354_v18  ;;  %v2229_v15 = vrot.slane %v11702_v12, %v8366_v28  ;;  %v2180_v17 = vrot.slane %v11704_v61, %v8330_v4  ;;  %v2187_v8 = vrot.slane %v11704_v61, %v8333_v6 }
 0x137   :  { %v9443_v7 = vcombine.low %v2166_v20, %v2173_v33  ;;  %v2194_v38 = vrot.slane %v11704_v61, %v8354_v18  ;;  %v2201_v60 = vrot.slane %v11704_v61, %v8366_v28  ;;  %v9450_v12 = vcombine.low %v4747_v63, %v4754_v24  ;;  %v9472_v16 = vpop.xlane.xlu1 %406 }
 0x138   :  { %v2264_v52 = vrot.slane %v11705_v34, %v8330_v4  ;;  %v2271_v25 = vrot.slane %v11705_v34, %v8333_v6  ;;  %v2278_v20 = vrot.slane %v11705_v34, %v8354_v18  ;;  %v2285_v33 = vrot.slane %v11705_v34, %v8366_v28  ;;  %6459 = vperm.xlu1 %7828, %v9200_v1  }
 0x139   :  { %v9460_v50 = vcombine.low %v2208_v21, %v2215_v59  ;;  %v9462_v32 = vcombine.low %v2124_v29, %v2131_v54  ;;  %v9464_v61 = vcombine.low %v2138_v56, %v2145_v14  ;;  %v4781_v63 = vrot.slane %v11709_v39, %v8384_v40  ;;  %v9475_v13 = vpop.xlane.xlu0 %403  ;;  %v11712_v29 = vld [vmem:[#allocation57_spill] sm:$0xff]  ;;  %v11714_v14 = vld [vmem:[#allocation52_spill] sm:$0xff]  ;;  %6492 = vperm.xlu0 %7827, %v9220_v19  }
 0x13a   :  { %v9468_v24 = vcombine.low %v2222_v51, %v2229_v15  ;;  %v9470_v9 = vcombine.low %v2180_v17, %v2187_v8  ;;  %v9477_v34 = vcombine.low %v4594_v37, %v4601_v3  ;;  %v4788_v54 = vrot.slane %v11712_v29, %v8384_v40  ;;  %v11715_v51 = vld [vmem:[#allocation48_spill] sm:$0xff]  ;;  %v11718_v8 = vld [vmem:[#allocation11_spill] sm:$0xff] }
 0x13b   :  { %11706 = vst [vmem:[#allocation7_spill] sm:$0xff] %v9460_v50  ;;  %11707 = vst [vmem:[#allocation45_spill] sm:$0xff] %v9462_v32  ;;  %v9481_v56 = vcombine.low %v2194_v38, %v2201_v60  ;;  %v2236_v21 = vrot.slane %v11714_v14, %v8330_v4  ;;  %v2243_v59 = vrot.slane %v11714_v14, %v8333_v6 }
 0x13c   :  { %11708 = vst [vmem:[#allocation46_spill] sm:$0xff] %v9464_v61  ;;  %11710 = vst [vmem:[#allocation8_spill] sm:$0xff] %v9468_v24  ;;  %v4628_v1 = vrot.slane %v11715_v51, %v8384_v40  ;;  %v9490_v15 = vcombine.low %v2264_v52, %v2271_v25  ;;  %v9492_v37 = vcombine.low %v2278_v20, %v2285_v33  ;;  %v11719_v25 = vld [vmem:[#allocation12_spill] sm:$0xff]  ;;  %v9508_v33 = vpop.xlane.xlu1 %412  ;;  %6465 = vperm.xlu1 %7828, %v9276_v49  }
 0x13d   :  { %11711 = vst [vmem:[#allocation47_spill] sm:$0xff] %v9470_v9  ;;  %11713 = vst [vmem:[#allocation10_spill] sm:$0xff] %v9481_v56  ;;  %v2250_v3 = vrot.slane %v11714_v14, %v8354_v18  ;;  %v2257_v17 = vrot.slane %v11714_v14, %v8366_v28  ;;  %v2320_v38 = vrot.slane %v11718_v8, %v8330_v4  ;;  %v9511_v39 = vpop.xlane.xlu0 %409  ;;  %v11722_v14 = vld [vmem:[#allocation49_spill] sm:$0xff]  ;;  %6498 = vperm.xlu0 %7827, %v9298_v30  }
 0x13e   :  { %11716 = vst [vmem:[#allocation56_spill] sm:$0xff] %v9490_v15  ;;  %11717 = vst [vmem:[#allocation57_spill] sm:$0xff] %v9492_v37  ;;  %v2327_v60 = vrot.slane %v11718_v8, %v8333_v6  ;;  %v2334_v19 = vrot.slane %v11718_v8, %v8354_v18  ;;  %v2341_v52 = vrot.slane %v11718_v8, %v8366_v28 }
 0x13f   :  { %v2292_v20 = vrot.slane %v11719_v25, %v8330_v4  ;;  %11720 = vst [vmem:[#allocation52_spill] sm:$0xff] %v9508_v33  ;;  %11721 = vst [vmem:[#allocation48_spill] sm:$0xff] %v9511_v39  ;;  %v9513_v29 = vcombine.low %v4781_v63, %v4788_v54  ;;  %v4635_v51 = vrot.slane %v11722_v14, %v8384_v40  ;;  %v11723_v63 = vld [vmem:[#allocation15_spill] sm:$0xff] }
 0x140   :  { %v4815_v37 = vrot.slane %v9083_v2, %v8384_v40  ;;  %v2299_v8 = vrot.slane %v11719_v25, %v8333_v6  ;;  %v2306_v15 = vrot.slane %v11719_v25, %v8354_v18  ;;  %v2313_v24 = vrot.slane %v11719_v25, %v8366_v28  ;;  %v9548_v39 = vpop.xlane.xlu1 %418  ;;  %6471 = vperm.xlu1 %7828, %v9374_v46  }
 0x141   :  { %v4822_v49 = vrot.slane %v9091_v35, %v8384_v40  ;;  %v2376_v54 = vrot.slane %v11723_v63, %v8330_v4  ;;  %v2383_v2 = vrot.slane %v11723_v63, %v8333_v6  ;;  %v2390_v14 = vrot.slane %v11723_v63, %v8354_v18  ;;  %v11728_v35 = vld [vmem:[#allocation55_spill] sm:$0xff]  ;;  %v9551_v33 = vpop.xlane.xlu0 %415  ;;  %6504 = vperm.xlu0 %7827, %v9382_v62  }
 0x142   :  { %v2397_v50 = vrot.slane %v11723_v63, %v8366_v28  ;;  %v9536_v56 = vcombine.low %v2320_v38, %v2327_v60  ;;  %v9538_v25 = vcombine.low %v2334_v19, %v2341_v52  ;;  %v9540_v30 = vcombine.low %v2236_v21, %v2243_v59  ;;  %v11729_v38 = vld [vmem:[#allocation50_spill] sm:$0xff]  ;;  %v11730_v21 = vld [vmem:[#allocation51_spill] sm:$0xff] }
 0x143   :  { %v9542_v9 = vcombine.low %v2250_v3, %v2257_v17  ;;  %v2348_v61 = vrot.slane %v11728_v35, %v8330_v4  ;;  %v2355_v32 = vrot.slane %v11728_v35, %v8333_v6  ;;  %v4662_v60 = vrot.slane %v11729_v38, %v8384_v40 }
 0x144   :  { %11724 = vst [vmem:[#allocation11_spill] sm:$0xff] %v9536_v56  ;;  %11725 = vst [vmem:[#allocation12_spill] sm:$0xff] %v9538_v25  ;;  %v4669_v59 = vrot.slane %v11730_v21, %v8384_v40  ;;  %v9557_v3 = vcombine.low %v2292_v20, %v2299_v8  ;;  %v9559_v17 = vcombine.low %v2306_v15, %v2313_v24  ;;  %v11735_v21 = vld [vmem:[#allocation16_spill] sm:$0xff]  ;;  %6477 = vperm.xlu1 %7828, %v9403_v53  }
 0x145   :  { %11726 = vst [vmem:[#allocation49_spill] sm:$0xff] %v9540_v30  ;;  %11727 = vst [vmem:[#allocation15_spill] sm:$0xff] %v9542_v9  ;;  %v2362_v19 = vrot.slane %v11728_v35, %v8354_v18  ;;  %v4636_v52 = vcombine.low %v4628_v1, %v4635_v51  ;;  %v9564_v63 = vcombine.low %v2376_v54, %v2383_v2  ;;  %v9583_v51 = vpop.xlane.xlu0 %421  ;;  %6510 = vperm.xlu0 %7827, %v9450_v12  }
 0x146   :  { %11731 = vst [vmem:[#allocation55_spill] sm:$0xff] %v9557_v3  ;;  %11732 = vst [vmem:[#allocation50_spill] sm:$0xff] %v9559_v17  ;;  %v9566_v46 = vcombine.low %v2390_v14, %v2397_v50  ;;  %v2369_v38 = vrot.slane %v11728_v35, %v8366_v28  ;;  %v4823_v25 = vcombine.low %v4815_v37, %v4822_v49  ;;  %v9580_v50 = vpop.xlane.xlu1 %424 }
 0x147   :  { %11733 = vst [vmem:[#allocation51_spill] sm:$0xff] %v9564_v63  ;;  %v2432_v20 = vrot.slane %v11735_v21, %v8330_v4  ;;  %v2439_v24 = vrot.slane %v11735_v21, %v8333_v6  ;;  %v2446_v15 = vrot.slane %v11735_v21, %v8354_v18  ;;  %v2453_v62 = vrot.slane %v11735_v21, %v8366_v28 }
 0x148   :  { %11734 = vst [vmem:[#allocation71_spill] sm:$0xff] %v9566_v46  ;;  %v9578_v1 = vcombine.low %v2348_v61, %v2355_v32  ;;  %11737 = vst [vmem:[#allocation72_spill] sm:$0xff] %v9583_v51  ;;  %v4670_v37 = vcombine.low %v4662_v60, %v4669_v59  ;;  %v4849_v8 = vrot.slane %v9103_v48, %v8384_v40  ;;  %v11741_v60 = vld [vmem:[#allocation14_spill] sm:$0xff]  ;;  %6483 = vperm.xlu1 %7828, %v9477_v34   ;;  %v11756_v46 = vld [vmem:[#allocation64_spill] sm:$0xff] }
 0x149   :  { %v4856_v49 = vrot.slane %v9111_v5, %v8384_v40  ;;  %v2488_v54 = vrot.slane %v9097_v10, %v8330_v4  ;;  %v2495_v32 = vrot.slane %v9097_v10, %v8333_v6  ;;  %v2502_v61 = vrot.slane %v9097_v10, %v8354_v18  ;;  %v11740_v5 = vld [vmem:[#allocation13_spill] sm:$0xff]  ;;  %6516 = vperm.xlu0 %7827, %v9513_v29  }
 0x14a   :  { %11736 = vst [vmem:[#allocation16_spill] sm:$0xff] %v9578_v1  ;;  %v2509_v53 = vrot.slane %v9097_v10, %v8366_v28  ;;  %v9598_v2 = vcombine.low %v2362_v19, %v2369_v38  ;;  %v4696_v35 = vrot.slane %v11740_v5, %v8384_v40  ;;  %v4703_v59 = vrot.slane %v11741_v60, %v8384_v40  ;;  %v11744_v19 = vld [vmem:[#allocation60_spill] sm:$0xff]  ;;  %v9618_v5 = vpop.xlane.xlu1 %430 }
 0x14b   :  { %v9606_v21 = vcombine.low %v2432_v20, %v2439_v24  ;;  %v9608_v1 = vcombine.low %v2446_v15, %v2453_v62  ;;  %v2460_v38 = vrot.slane %v11744_v19, %v8330_v4  ;;  %v2467_v14 = vrot.slane %v11744_v19, %v8333_v6  ;;  %11745 = vst [vmem:[#allocation60_spill] sm:$0xff] %v9618_v5  ;;  %v9621_v20 = vpop.xlane.xlu0 %427  ;;  %v11747_v15 = vld [vmem:[#allocation63_spill] sm:$0xff] }
 0x14c   :  { %11738 = vst [vmem:[#allocation73_spill] sm:$0xff] %v9598_v2  ;;  %11746 = vst [vmem:[#allocation74_spill] sm:$0xff] %v9621_v20  ;;  %v4857_v24 = vcombine.low %v4849_v8, %v4856_v49  ;;  %v4883_v62 = vrot.slane %v11747_v15, %v8384_v40  ;;  %v9625_v60 = vcombine.low %v2488_v54, %v2495_v32  ;;  %v11750_v8 = vld [vmem:[#allocation53_spill] sm:$0xff]  ;;  %v11751_v54 = vld [vmem:[#allocation54_spill] sm:$0xff]  ;;  %6489 = vperm.xlu1 %7828, %v4636_v52  }
 0x14d   :  { %11742 = vst [vmem:[#allocation13_spill] sm:$0xff] %v9606_v21  ;;  %11743 = vst [vmem:[#allocation14_spill] sm:$0xff] %v9608_v1  ;;  %v9627_v10 = vcombine.low %v2502_v61, %v2509_v53  ;;  %v2474_v12 = vrot.slane %v11744_v19, %v8354_v18  ;;  %v2481_v48 = vrot.slane %v11744_v19, %v8366_v28  ;;  %v11752_v61 = vld [vmem:[#allocation21_spill] sm:$0xff]  ;;  %6522 = vperm.xlu0 %7827, %v4823_v25  }
 0x14e   :  { %11748 = vst [vmem:[#allocation63_spill] sm:$0xff] %v9625_v60  ;;  %v4704_v1 = vcombine.low %v4696_v35, %v4703_v59  ;;  %v4890_v34 = vrot.slane %v9186_v45, %v8384_v40  ;;  %v4730_v49 = vrot.slane %v11750_v8, %v8384_v40  ;;  %v4737_v32 = vrot.slane %v11751_v54, %v8384_v40  ;;  %v11753_v45 = vld [vmem:[#allocation62_spill] sm:$0xff]  ;;  %v9656_v21 = vpop.xlane.xlu1 %436 }
 0x14f   :  { %11749 = vst [vmem:[#allocation75_spill] sm:$0xff] %v9627_v10  ;;  %v2544_v53 = vrot.slane %v11752_v61, %v8330_v4  ;;  %v2551_v15 = vrot.slane %v11752_v61, %v8333_v6  ;;  %v2558_v19 = vrot.slane %v11752_v61, %v8354_v18  ;;  %v2565_v29 = vrot.slane %v11752_v61, %v8366_v28  ;;  %v9658_v2 = vpop.xlane.xlu0 %433 }
 0x150   :  { %v2516_v35 = vrot.slane %v11753_v45, %v8330_v4  ;;  %v2523_v59 = vrot.slane %v11753_v45, %v8333_v6  ;;  %v2530_v8 = vrot.slane %v11753_v45, %v8354_v18  ;;  %v2537_v54 = vrot.slane %v11753_v45, %v8366_v28  ;;  %11754 = vst [vmem:[#allocation53_spill] sm:$0xff] %v9656_v21  ;;  %v11757_v45 = vld [vmem:[#allocation22_spill] sm:$0xff] }
 0x151   :  { %11755 = vst [vmem:[#allocation54_spill] sm:$0xff] %v9658_v2  ;;  %v2600_v61 = vrot.slane %v11756_v46, %v8330_v4  ;;  %v2607_v63 = vrot.slane %v11756_v46, %v8333_v6  ;;  %v2614_v17 = vrot.slane %v11756_v46, %v8354_v18  ;;  %v2621_v3 = vrot.slane %v11756_v46, %v8366_v28 }
 0x152   :  { %v2572_v56 = vrot.slane %v11757_v45, %v8330_v4  ;;  %v2579_v52 = vrot.slane %v11757_v45, %v8333_v6  ;;  %v4917_v2 = vrot.slane %v9194_v22, %v8384_v40  ;;  %v4924_v21 = vrot.slane %v9196_v0, %v8384_v40  ;;  %v9688_v51 = vpop.xlane.xlu1 %442  ;;  %6495 = vperm.xlu1 %7828, %v4670_v37   ;;  %v11764_v37 = vld [vmem:[#allocation18_spill] sm:$0xff] }
 0x153   :  { %v9676_v9 = vcombine.low %v2544_v53, %v2551_v15  ;;  %v9678_v30 = vcombine.low %v2558_v19, %v2565_v29  ;;  %v9680_v20 = vcombine.low %v2460_v38, %v2467_v14  ;;  %v9682_v46 = vcombine.low %v2474_v12, %v2481_v48  ;;  %11760 = vst [vmem:[#allocation64_spill] sm:$0xff] %v9688_v51  ;;  %v9690_v10 = vpop.xlane.xlu0 %439  ;;  %v11766_v29 = vld [vmem:[#allocation58_spill] sm:$0xff] }
 0x154   :  { %v9684_v25 = vcombine.low %v2516_v35, %v2523_v59  ;;  %v9686_v5 = vcombine.low %v2530_v8, %v2537_v54  ;;  %v4891_v22 = vcombine.low %v4883_v62, %v4890_v34  ;;  %v4738_v60 = vcombine.low %v4730_v49, %v4737_v32  ;;  %6528 = vperm.xlu0 %7827, %v4857_v24   ;;  %v11765_v62 = vld [vmem:[#allocation19_spill] sm:$0xff]  ;;  %v11768_v54 = vld [vmem:[#allocation29_spill] sm:$0xff] }
 0x155   :  { %11758 = vst [vmem:[#allocation21_spill] sm:$0xff] %v9676_v9  ;;  %11759 = vst [vmem:[#allocation62_spill] sm:$0xff] %v9678_v30  ;;  %v9692_v0 = vcombine.low %v2600_v61, %v2607_v63  ;;  %v9694_v53 = vcombine.low %v2614_v17, %v2621_v3  ;;  %v2586_v14 = vrot.slane %v11757_v45, %v8354_v18  ;;  %v11767_v59 = vld [vmem:[#allocation59_spill] sm:$0xff]  ;;  %v11774_v30 = vld [vmem:[#allocation28_spill] sm:$0xff] }
 0x156   :  { %v2593_v48 = vrot.slane %v11757_v45, %v8366_v28  ;;  %v9700_v12 = vcombine.low %v2572_v56, %v2579_v52  ;;  %v4925_v38 = vcombine.low %v4917_v2, %v4924_v21  ;;  %v4764_v15 = vrot.slane %v11764_v37, %v8384_v40  ;;  %v9722_v32 = vpop.xlane.xlu1 %448  ;;  %6501 = vperm.xlu1 %7828, %v4704_v1  }
 0x157   :  { %11761 = vst [vmem:[#allocation22_spill] sm:$0xff] %v9692_v0  ;;  %11762 = vst [vmem:[#allocation76_spill] sm:$0xff] %v9694_v53  ;;  %v4771_v34 = vrot.slane %v11765_v62, %v8384_v40  ;;  %v2656_v3 = vrot.slane %v9208_v57, %v8330_v4  ;;  %v2663_v17 = vrot.slane %v9208_v57, %v8333_v6  ;;  %v9724_v19 = vpop.xlane.xlu0 %445 }
 0x158   :  { %11763 = vst [vmem:[#allocation77_spill] sm:$0xff] %v9700_v12  ;;  %v2670_v63 = vrot.slane %v9208_v57, %v8354_v18  ;;  %v4951_v56 = vrot.slane %v9202_v47, %v8384_v40  ;;  %v2677_v2 = vrot.slane %v9208_v57, %v8366_v28  ;;  %v2628_v21 = vrot.slane %v9211_v55, %v8330_v4 }
 0x159   :  { %v2635_v24 = vrot.slane %v9211_v55, %v8333_v6  ;;  %v2642_v49 = vrot.slane %v9211_v55, %v8354_v18  ;;  %v2649_v47 = vrot.slane %v9211_v55, %v8366_v28  ;;  %6534 = vperm.xlu0 %7827, %v4891_v22   ;;  %v4958_v57 = vrot.slane %v9204_v23, %v8384_v40  ;;  %v11769_v23 = vld [vmem:[#allocation32_spill] sm:$0xff] }
 0x15a   :  { %v4798_v35 = vrot.slane %v11766_v29, %v8384_v40  ;;  %v4805_v8 = vrot.slane %v11767_v59, %v8384_v40  ;;  %v2712_v61 = vrot.slane %v11768_v54, %v8330_v4  ;;  %v2719_v1 = vrot.slane %v11768_v54, %v8333_v6  ;;  %v9756_v0 = vpop.xlane.xlu1 %454  ;;  %6507 = vperm.xlu1 %7828, %v4738_v60  }
 0x15b   :  { %v2726_v45 = vrot.slane %v11768_v54, %v8354_v18  ;;  %v2733_v55 = vrot.slane %v11768_v54, %v8366_v28  ;;  %v2684_v52 = vrot.slane %v11769_v23, %v8330_v4  ;;  %v2691_v22 = vrot.slane %v11769_v23, %v8333_v6  ;;  %11773 = vst [vmem:[#allocation59_spill] sm:$0xff] %v9756_v0  ;;  %v9758_v12 = vpop.xlane.xlu0 %451 }
 0x15c   :  { %v2698_v37 = vrot.slane %v11769_v23, %v8354_v18  ;;  %v2705_v62 = vrot.slane %v11769_v23, %v8366_v28  ;;  %v9750_v29 = vcombine.low %v2656_v3, %v2663_v17  ;;  %v9752_v59 = vcombine.low %v2670_v63, %v2677_v2  ;;  %v11775_v3 = vld [vmem:[#allocation25_spill] sm:$0xff]  ;;  %v11776_v63 = vld [vmem:[#allocation26_spill] sm:$0xff] }
 0x15d   :  { %v9754_v53 = vcombine.low %v2586_v14, %v2593_v48  ;;  %v4772_v54 = vcombine.low %v4764_v15, %v4771_v34  ;;  %v2768_v9 = vrot.slane %v11774_v30, %v8330_v4  ;;  %v2775_v51 = vrot.slane %v11774_v30, %v8333_v6  ;;  %6540 = vperm.xlu0 %7827, %v4925_v38  }
 0x15e   :  { %11770 = vst [vmem:[#allocation18_spill] sm:$0xff] %v9750_v29  ;;  %11771 = vst [vmem:[#allocation19_spill] sm:$0xff] %v9752_v59  ;;  %v4985_v17 = vrot.slane %v11775_v3, %v8384_v40  ;;  %v4992_v14 = vrot.slane %v11776_v63, %v8384_v40  ;;  %v9768_v48 = vcombine.low %v2712_v61, %v2719_v1  ;;  %v11783_v61 = vld [vmem:[#allocation39_spill] sm:$0xff] }
 0x15f   :  { %11772 = vst [vmem:[#allocation58_spill] sm:$0xff] %v9754_v53  ;;  %v9770_v2 = vcombine.low %v2726_v45, %v2733_v55  ;;  %v9772_v60 = vcombine.low %v2628_v21, %v2635_v24  ;;  %v9774_v15 = vcombine.low %v2642_v49, %v2649_v47  ;;  %v9776_v34 = vcombine.low %v2684_v52, %v2691_v22  ;;  %v9788_v24 = vpop.xlane.xlu1 %460  ;;  %v9790_v49 = vpop.xlane.xlu0 %457  ;;  %v11788_v45 = vld [vmem:[#allocation20_spill] sm:$0xff]  ;;  %v11789_v52 = vld [vmem:[#allocation61_spill] sm:$0xff] }
 0x160   :  { %11777 = vst [vmem:[#allocation29_spill] sm:$0xff] %v9768_v48  ;;  %v9778_v23 = vcombine.low %v2698_v37, %v2705_v62  ;;  %v4959_v59 = vcombine.low %v4951_v56, %v4958_v57  ;;  %v4806_v38 = vcombine.low %v4798_v35, %v4805_v8  ;;  %v2782_v3 = vrot.slane %v11774_v30, %v8354_v18  ;;  %v11787_v35 = vld [vmem:[#allocation35_spill] sm:$0xff] }
 0x161   :  { %11778 = vst [vmem:[#allocation32_spill] sm:$0xff] %v9770_v2  ;;  %11779 = vst [vmem:[#allocation28_spill] sm:$0xff] %v9772_v60  ;;  %v2789_v63 = vrot.slane %v11774_v30, %v8366_v28  ;;  %v2740_v1 = vrot.slane %v11783_v61, %v8330_v4  ;;  %v2747_v21 = vrot.slane %v11783_v61, %v8333_v6  ;;  %6513 = vperm.xlu1 %7828, %v4772_v54   ;;  %v11791_v54 = vld [vmem:[#allocation40_spill] sm:$0xff]  ;;  %v11795_v48 = vld [vmem:[#allocation23_spill] sm:$0xff] }
 0x162   :  { %11780 = vst [vmem:[#allocation25_spill] sm:$0xff] %v9774_v15  ;;  %11781 = vst [vmem:[#allocation26_spill] sm:$0xff] %v9776_v34  ;;  %v9792_v47 = vcombine.low %v2768_v9, %v2775_v51  ;;  %v2754_v56 = vrot.slane %v11783_v61, %v8354_v18  ;;  %v2761_v57 = vrot.slane %v11783_v61, %v8366_v28  ;;  %6546 = vperm.xlu0 %7827, %v4959_v59   ;;  %v11790_v9 = vld [vmem:[#allocation33_spill] sm:$0xff] }
 0x163   :  { %11782 = vst [vmem:[#allocation78_spill] sm:$0xff] %v9778_v23  ;;  %11784 = vst [vmem:[#allocation39_spill] sm:$0xff] %v9788_v24  ;;  %v4993_v30 = vcombine.low %v4985_v17, %v4992_v14  ;;  %v2824_v8 = vrot.slane %v11787_v35, %v8330_v4  ;;  %v4832_v55 = vrot.slane %v11788_v45, %v8384_v40  ;;  %v11792_v14 = vld [vmem:[#allocation69_spill] sm:$0xff]  ;;  %v9824_v2 = vpop.xlane.xlu0 %463  ;;  %v11796_v23 = vld [vmem:[#allocation24_spill] sm:$0xff] }
 0x164   :  { %11785 = vst [vmem:[#allocation79_spill] sm:$0xff] %v9790_v49  ;;  %11786 = vst [vmem:[#allocation80_spill] sm:$0xff] %v9792_v47  ;;  %v4839_v22 = vrot.slane %v11789_v52, %v8384_v40  ;;  %v5019_v51 = vrot.slane %v11790_v9, %v8384_v40  ;;  %v2831_v37 = vrot.slane %v11787_v35, %v8333_v6  ;;  %v9822_v47 = vpop.xlane.xlu1 %466  ;;  %v11801_v49 = vld [vmem:[#allocation34_spill] sm:$0xff] }
 0x165   :  { %v2838_v62 = vrot.slane %v11787_v35, %v8354_v18  ;;  %v2845_v59 = vrot.slane %v11787_v35, %v8366_v28  ;;  %v5026_v17 = vrot.slane %v11791_v54, %v8384_v40  ;;  %v2796_v61 = vrot.slane %v11792_v14, %v8330_v4  ;;  %11793 = vst [vmem:[#allocation35_spill] sm:$0xff] %v9822_v47 }
 0x166   :  { %v2803_v45 = vrot.slane %v11792_v14, %v8333_v6  ;;  %v2810_v52 = vrot.slane %v11792_v14, %v8354_v18  ;;  %v2817_v9 = vrot.slane %v11792_v14, %v8366_v28  ;;  %6519 = vperm.xlu1 %7828, %v4806_v38   ;;  %11794 = vst [vmem:[#allocation20_spill] sm:$0xff] %v9824_v2 }
 0x167   :  { %v2852_v35 = vrot.slane %v9365_v11, %v8330_v4  ;;  %v2859_v54 = vrot.slane %v9365_v11, %v8333_v6  ;;  %6552 = vperm.xlu0 %7827, %v4993_v30   ;;  %v4866_v29 = vrot.slane %v11795_v48, %v8384_v40  ;;  %v4873_v34 = vrot.slane %v11796_v23, %v8384_v40  ;;  %v11802_v30 = vld [vmem:[#allocation38_spill] sm:$0xff] }
 0x168   :  { %v9834_v15 = vcombine.low %v2782_v3, %v2789_v63  ;;  %v9836_v14 = vcombine.low %v2740_v1, %v2747_v21  ;;  %v9838_v38 = vcombine.low %v2754_v56, %v2761_v57  ;;  %v4840_v2 = vcombine.low %v4832_v55, %v4839_v22  ;;  %v9854_v63 = vpop.xlane.xlu1 %472  ;;  %v9856_v1 = vpop.xlane.xlu0 %469 }
 0x169   :  { %v9840_v47 = vcombine.low %v2824_v8, %v2831_v37  ;;  %v5027_v60 = vcombine.low %v5019_v51, %v5026_v17  ;;  %v5053_v24 = vrot.slane %v11801_v49, %v8384_v40  ;;  %v5060_v0 = vrot.slane %v11802_v30, %v8384_v40  ;;  %11806 = vst [vmem:[#allocation38_spill] sm:$0xff] %v9854_v63  ;;  %v11809_v51 = vld [vmem:[#allocation66_spill] sm:$0xff] }
 0x16a   :  { %11797 = vst [vmem:[#allocation61_spill] sm:$0xff] %v9834_v15  ;;  %11798 = vst [vmem:[#allocation33_spill] sm:$0xff] %v9836_v14  ;;  %v9846_v48 = vcombine.low %v2838_v62, %v2845_v59  ;;  %v9848_v53 = vcombine.low %v2796_v61, %v2803_v45  ;;  %v9850_v23 = vcombine.low %v2810_v52, %v2817_v9  ;;  %6525 = vperm.xlu1 %7828, %v4840_v2   ;;  %v11808_v2 = vld [vmem:[#allocation65_spill] sm:$0xff]  ;;  %v11811_v9 = vld [vmem:[#allocation31_spill] sm:$0xff] }
 0x16b   :  { %11799 = vst [vmem:[#allocation40_spill] sm:$0xff] %v9838_v38  ;;  %11800 = vst [vmem:[#allocation69_spill] sm:$0xff] %v9840_v47  ;;  %v2866_v3 = vrot.slane %v9365_v11, %v8354_v18  ;;  %v2936_v21 = vrot.slane %v9398_v44, %v8330_v4  ;;  %v2873_v49 = vrot.slane %v9365_v11, %v8366_v28  ;;  %6558 = vperm.xlu0 %7827, %v5027_v60   ;;  %v11832_v14 = vld [vmem:[#allocation46_spill] sm:$0xff] }
 0x16c   :  { %11803 = vst [vmem:[#allocation23_spill] sm:$0xff] %v9846_v48  ;;  %11804 = vst [vmem:[#allocation24_spill] sm:$0xff] %v9848_v53  ;;  %v9862_v56 = vcombine.low %v2852_v35, %v2859_v54  ;;  %v4874_v57 = vcombine.low %v4866_v29, %v4873_v34  ;;  %v2943_v8 = vrot.slane %v9398_v44, %v8333_v6  ;;  %v11812_v54 = vld [vmem:[#allocation67_spill] sm:$0xff]  ;;  %v11831_v53 = vld [vmem:[#allocation45_spill] sm:$0xff] }
 0x16d   :  { %11805 = vst [vmem:[#allocation34_spill] sm:$0xff] %v9850_v23  ;;  %v2950_v55 = vrot.slane %v9398_v44, %v8354_v18  ;;  %v4900_v22 = vrot.slane %v11808_v2, %v8384_v40  ;;  %v4907_v37 = vrot.slane %v11809_v51, %v8384_v40  ;;  %v2957_v62 = vrot.slane %v9398_v44, %v8366_v28  ;;  %v9886_v44 = vpop.xlane.xlu1 %478 }
 0x16e   :  { %11807 = vst [vmem:[#allocation81_spill] sm:$0xff] %v9862_v56  ;;  %v5061_v11 = vcombine.low %v5053_v24, %v5060_v0  ;;  %v5087_v60 = vrot.slane %v9367_v36, %v8384_v40  ;;  %v5094_v29 = vrot.slane %v9376_v27, %v8384_v40  ;;  %v2908_v34 = vrot.slane %v9401_v42, %v8330_v4  ;;  %v9888_v0 = vpop.xlane.xlu0 %475 }
 0x16f   :  { %v2915_v59 = vrot.slane %v9401_v42, %v8333_v6  ;;  %v2922_v17 = vrot.slane %v9401_v42, %v8354_v18  ;;  %v2929_v61 = vrot.slane %v9401_v42, %v8366_v28  ;;  %11810 = vst [vmem:[#allocation65_spill] sm:$0xff] %v9886_v44  ;;  %6531 = vperm.xlu1 %7828, %v4874_v57  }
 0x170   :  { %v2992_v27 = vrot.slane %v9438_v43, %v8330_v4  ;;  %v2999_v36 = vrot.slane %v9438_v43, %v8333_v6  ;;  %v3006_v24 = vrot.slane %v9438_v43, %v8354_v18  ;;  %v3013_v45 = vrot.slane %v9438_v43, %v8366_v28  ;;  %6564 = vperm.xlu0 %7827, %v5061_v11  }
 0x171   :  { %v2964_v42 = vrot.slane %v9441_v26, %v8330_v4  ;;  %v4908_v52 = vcombine.low %v4900_v22, %v4907_v37  ;;  %v4934_v35 = vrot.slane %v11811_v9, %v8384_v40  ;;  %v4941_v30 = vrot.slane %v11812_v54, %v8384_v40  ;;  %v9918_v9 = vpop.xlane.xlu1 %484 }
 0x172   :  { %v2971_v57 = vrot.slane %v9441_v26, %v8333_v6  ;;  %v5095_v2 = vcombine.low %v5087_v60, %v5094_v29  ;;  %v5121_v51 = vrot.slane %v9384_v41, %v8384_v40  ;;  %v5128_v43 = vrot.slane %v9392_v31, %v8384_v40  ;;  %11814 = vst [vmem:[#allocation31_spill] sm:$0xff] %v9918_v9  ;;  %v9920_v60 = vpop.xlane.xlu0 %481  ;;  %v11816_v31 = vld [vmem:[#allocation27_spill] sm:$0xff] }
 0x173   :  { %v9910_v11 = vcombine.low %v2936_v21, %v2943_v8  ;;  %v9912_v48 = vcombine.low %v2866_v3, %v2873_v49  ;;  %v2978_v22 = vrot.slane %v9441_v26, %v8354_v18  ;;  %v2985_v37 = vrot.slane %v9441_v26, %v8366_v28  ;;  %6537 = vperm.xlu1 %7828, %v4908_v52   ;;  %v11817_v21 = vld [vmem:[#allocation30_spill] sm:$0xff] }
 0x174   :  { %11815 = vst [vmem:[#allocation67_spill] sm:$0xff] %v9920_v60  ;;  %v9922_v29 = vcombine.low %v2950_v55, %v2957_v62  ;;  %v9924_v41 = vcombine.low %v2908_v34, %v2915_v59  ;;  %6570 = vperm.xlu0 %7827, %v5095_v2   ;;  %v4968_v3 = vrot.slane %v11816_v31, %v8384_v40 }
 0x175   :  { %11813 = vst [vmem:[#allocation66_spill] sm:$0xff] %v9912_v48  ;;  %v4975_v49 = vrot.slane %v11817_v21, %v8384_v40  ;;  %v9930_v8 = vcombine.low %v2922_v17, %v2929_v61  ;;  %v4942_v54 = vcombine.low %v4934_v35, %v4941_v30  ;;  %v5155_v26 = vrot.slane %v9422_v58, %v8384_v40  ;;  %v9950_v35 = vpop.xlane.xlu1 %490 }
 0x176   :  { %v5162_v52 = vrot.slane %v9443_v7, %v8384_v40  ;;  %v9936_v55 = vcombine.low %v2992_v27, %v2999_v36  ;;  %v9938_v62 = vcombine.low %v3006_v24, %v3013_v45  ;;  %v9940_v34 = vcombine.low %v2964_v42, %v2971_v57  ;;  %v488_v7 = vpop.xlane.xlu0 %487  ;;  %v11818_v45 = vld [vmem:[#allocation37_spill] sm:$0xff]  ;;  %v11819_v57 = vld [vmem:[#allocation68_spill] sm:$0xff] }
 0x177   :  { %v5129_v59 = vcombine.low %v5121_v51, %v5128_v43  ;;  %v3048_v2 = vrot.slane %v9472_v16, %v8330_v4  ;;  %v3055_v17 = vrot.slane %v9472_v16, %v8333_v6  ;;  %v3062_v61 = vrot.slane %v9472_v16, %v8354_v18  ;;  %6543 = vperm.xlu1 %7828, %v4942_v54  }
 0x178   :  { %v9948_v58 = vcombine.low %v2978_v22, %v2985_v37  ;;  %v3069_v27 = vrot.slane %v9472_v16, %v8366_v28  ;;  %v3020_v36 = vrot.slane %v9475_v13, %v8330_v4  ;;  %v4976_v24 = vcombine.low %v4968_v3, %v4975_v49 }
 0x179   :  { %6576 = vperm.xlu0 %7827, %v5129_v59   ;;  %v5002_v42 = vrot.slane %v11818_v45, %v8384_v40  ;;  %v5163_v30 = vcombine.low %v5155_v26, %v5162_v52  ;;  %v5009_v51 = vrot.slane %v11819_v57, %v8384_v40  ;;  %v5342_v43 = vrot.slane %v9680_v20, %v8384_v40  ;;  %v9980_v54 = vpop.xlane.xlu1 %496  ;;  %v11820_v57 = vld [vmem:[#allocation36_spill] sm:$0xff] }
 0x17a   :  { %v5349_v22 = vrot.slane %v9682_v46, %v8384_v40  ;;  %v3356_v16 = vrot.slane %v9690_v10, %v8330_v4  ;;  %v3363_v37 = vrot.slane %v9690_v10, %v8333_v6  ;;  %v3370_v31 = vrot.slane %v9690_v10, %v8354_v18  ;;  %v9982_v26 = vpop.xlane.xlu0 %493 }
 0x17b   :  { %v3377_v3 = vrot.slane %v9690_v10, %v8366_v28  ;;  %v9972_v21 = vcombine.low %v3048_v2, %v3055_v17  ;;  %v3027_v20 = vrot.slane %v9475_v13, %v8333_v6  ;;  %v3034_v46 = vrot.slane %v9475_v13, %v8354_v18  ;;  %6549 = vperm.xlu1 %7828, %v4976_v24  }
 0x17c   :  { %v3041_v49 = vrot.slane %v9475_v13, %v8366_v28  ;;  %v3804_v52 = vrot.slane %v488_v7, %v8330_v4  ;;  %v3811_v10 = vrot.slane %v488_v7, %v8333_v6  ;;  %v3818_v59 = vrot.slane %v488_v7, %v8354_v18  ;;  %v11821_v13 = vld [vmem:[#allocation42_spill] sm:$0xff] }
 0x17d   :  { %v3825_v2 = vrot.slane %v488_v7, %v8366_v28  ;;  %6582 = vperm.xlu0 %7827, %v5163_v30   ;;  %v5010_v17 = vcombine.low %v5002_v42, %v5009_v51  ;;  %v5350_v45 = vcombine.low %v5342_v43, %v5349_v22  ;;  %v5036_v9 = vrot.slane %v11820_v57, %v8384_v40  ;;  %v11822_v7 = vld [vmem:[#allocation52_spill] sm:$0xff]  ;;  %v10004_v43 = vpop.xlane.xlu1 %502 }
 0x17e   :  { %v5043_v47 = vrot.slane %v11821_v13, %v8384_v40  ;;  %v5878_v24 = vcombine.low %v3356_v16, %v3363_v37  ;;  %v5879_v44 = vcombine.low %v3370_v31, %v3377_v3  ;;  %v5614_v48 = vrot.slane %v9924_v41, %v8384_v40  ;;  %v10006_v22 = vpop.xlane.xlu0 %499  ;;  %v11824_v3 = vld [vmem:[#allocation44_spill] sm:$0xff] }
 0x17f   :  { %v5621_v56 = vrot.slane %v9930_v8, %v8384_v40  ;;  %v9996_v15 = vcombine.low %v3062_v61, %v3069_v27  ;;  %v3104_v42 = vrot.slane %v11822_v7, %v8330_v4  ;;  %v3111_v30 = vrot.slane %v11822_v7, %v8333_v6  ;;  %6555 = vperm.xlu1 %7828, %v5010_v17   ;;  %v11825_v17 = vld [vmem:[#allocation48_spill] sm:$0xff] }
 0x180   :  { %v10002_v51 = vcombine.low %v3020_v36, %v3027_v20  ;;  %v3118_v41 = vrot.slane %v11822_v7, %v8354_v18  ;;  %v10010_v16 = vcombine.low %v3034_v46, %v3041_v49  ;;  %v6150_v8 = vcombine.low %v3804_v52, %v3811_v10  ;;  %v11823_v36 = vld [vmem:[#allocation43_spill] sm:$0xff] }
 0x181   :  { %v6151_v61 = vcombine.low %v3818_v59, %v3825_v2  ;;  %6615 = vperm.xlu0 %7827, %v5350_v45   ;;  %v3125_v27 = vrot.slane %v11822_v7, %v8366_v28  ;;  %v5044_v37 = vcombine.low %v5036_v9, %v5043_v47  ;;  %v5070_v31 = vrot.slane %v11823_v36, %v8384_v40  ;;  %v10030_v59 = vpop.xlane.xlu1 %508 }
 0x182   :  { %v5077_v20 = vrot.slane %v11824_v3, %v8384_v40  ;;  %v3076_v57 = vrot.slane %v11825_v17, %v8330_v4  ;;  %v5622_v13 = vcombine.low %v5614_v48, %v5621_v56  ;;  %v5886_v46 = vrot.slane %v5878_v24, %v8384_v40  ;;  %v10032_v2 = vpop.xlane.xlu0 %505 }
 0x183   :  { %v5893_v49 = vrot.slane %v5879_v44, %v8384_v40  ;;  %v10022_v52 = vcombine.low %v3104_v42, %v3111_v30  ;;  %v3083_v10 = vrot.slane %v11825_v17, %v8333_v6  ;;  %v3090_v47 = vrot.slane %v11825_v17, %v8354_v18  ;;  %6561 = vperm.xlu1 %7828, %v5044_v37   ;;  %v11826_v42 = vld [vmem:[#allocation6_spill] sm:$0xff] }
 0x184   :  { %v3097_v9 = vrot.slane %v11825_v17, %v8366_v28  ;;  %v3160_v48 = vrot.slane %v9548_v39, %v8330_v4  ;;  %v3167_v56 = vrot.slane %v9548_v39, %v8333_v6  ;;  %v6158_v44 = vrot.slane %v6150_v8, %v8384_v40  ;;  %v11827_v37 = vld [vmem:[#allocation70_spill] sm:$0xff] }
 0x185   :  { %6663 = vperm.xlu0 %7827, %v5622_v13   ;;  %v6165_v45 = vrot.slane %v6151_v61, %v8384_v40  ;;  %v3412_v24 = vrot.slane %v9724_v19, %v8330_v4  ;;  %v5078_v7 = vcombine.low %v5070_v31, %v5077_v20  ;;  %v5104_v30 = vrot.slane %v11826_v42, %v8384_v40 }
 0x186   :  { %v5111_v36 = vrot.slane %v11827_v37, %v8384_v40  ;;  %v3419_v3 = vrot.slane %v9724_v19, %v8333_v6  ;;  %v3426_v17 = vrot.slane %v9724_v19, %v8354_v18  ;;  %v3433_v8 = vrot.slane %v9724_v19, %v8366_v28  ;;  %v10060_v37 = vpop.xlane.xlu1 %514  ;;  %v10062_v60 = vpop.xlane.xlu0 %511 }
 0x187   :  { %v5894_v61 = vcombine.low %v5886_v46, %v5893_v49  ;;  %v3174_v13 = vrot.slane %v9548_v39, %v8354_v18  ;;  %v3181_v31 = vrot.slane %v9548_v39, %v8366_v28  ;;  %v3132_v20 = vrot.slane %v9551_v33, %v8330_v4  ;;  %11828 = vst [vmem:[#allocation27_spill] sm:$0xff] %v10060_v37 }
 0x188   :  { %v3139_v42 = vrot.slane %v9551_v33, %v8333_v6  ;;  %6567 = vperm.xlu1 %7828, %v5078_v7   ;;  %11829 = vst [vmem:[#allocation30_spill] sm:$0xff] %v10062_v60  ;;  %v10064_v63 = vcombine.low %v3118_v41, %v3125_v27  ;;  %v10066_v19 = vcombine.low %v3076_v57, %v3083_v10 }
 0x189   :  { %v10068_v46 = vcombine.low %v3090_v47, %v3097_v9  ;;  %6711 = vperm.xlu0 %7827, %v5894_v61   ;;  %v6166_v49 = vcombine.low %v6158_v44, %v6165_v45  ;;  %v5112_v23 = vcombine.low %v5104_v30, %v5111_v36  ;;  %v5138_v38 = vrot.slane %v11831_v53, %v8384_v40  ;;  %v11839_v30 = vld [vmem:[#allocation10_spill] sm:$0xff] }
 0x18a   :  { %v5145_v7 = vrot.slane %v11832_v14, %v8384_v40  ;;  %v5912_v37 = vcombine.low %v3412_v24, %v3419_v3  ;;  %v5913_v60 = vcombine.low %v3426_v17, %v3433_v8  ;;  %v5376_v41 = vrot.slane %v9684_v25, %v8384_v40  ;;  %v10088_v53 = vpop.xlane.xlu1 %520  ;;  %v10090_v14 = vpop.xlane.xlu0 %517 }
 0x18b   :  { %11830 = vst [vmem:[#allocation37_spill] sm:$0xff] %v10068_v46  ;;  %v5383_v27 = vrot.slane %v9686_v5, %v8384_v40  ;;  %v10080_v57 = vcombine.low %v3160_v48, %v3167_v56  ;;  %v10082_v10 = vcombine.low %v3174_v13, %v3181_v31  ;;  %v3153_v47 = vrot.slane %v9551_v33, %v8366_v28  ;;  %v11840_v13 = vld [vmem:[#allocation64_spill] sm:$0xff] }
 0x18c   :  { %v10086_v9 = vcombine.low %v3132_v20, %v3139_v42  ;;  %11836 = vst [vmem:[#allocation52_spill] sm:$0xff] %v10088_v53  ;;  %6573 = vperm.xlu1 %7828, %v5112_v23   ;;  %11837 = vst [vmem:[#allocation43_spill] sm:$0xff] %v10090_v14  ;;  %v3216_v25 = vrot.slane %v9580_v50, %v8330_v4  ;;  %v3223_v5 = vrot.slane %v9580_v50, %v8333_v6  ;;  %v11838_v23 = vld [vmem:[#allocation47_spill] sm:$0xff] }
 0x18d   :  { %11833 = vst [vmem:[#allocation68_spill] sm:$0xff] %v10080_v57  ;;  %11834 = vst [vmem:[#allocation36_spill] sm:$0xff] %v10082_v10  ;;  %v3440_v48 = vrot.slane %v9722_v32, %v8330_v4  ;;  %v3447_v56 = vrot.slane %v9722_v32, %v8333_v6  ;;  %6759 = vperm.xlu0 %7827, %v6166_v49   ;;  %v3454_v44 = vrot.slane %v9722_v32, %v8354_v18 }
 0x18e   :  { %11835 = vst [vmem:[#allocation42_spill] sm:$0xff] %v10086_v9  ;;  %v5146_v45 = vcombine.low %v5138_v38, %v5145_v7  ;;  %v5172_v24 = vrot.slane %v11838_v23, %v8384_v40  ;;  %v5179_v36 = vrot.slane %v11839_v30, %v8384_v40  ;;  %v3461_v3 = vrot.slane %v9722_v32, %v8366_v28  ;;  %v10118_v49 = vpop.xlane.xlu1 %526  ;;  %v10120_v32 = vpop.xlane.xlu0 %523  ;;  %v11843_v7 = vld [vmem:[#allocation63_spill] sm:$0xff]  ;;  %v11845_v30 = vld [vmem:[#allocation72_spill] sm:$0xff]  ;;  %v11846_v9 = vld [vmem:[#allocation21_spill] sm:$0xff] }
 0x18f   :  { %v5384_v17 = vcombine.low %v5376_v41, %v5383_v27  ;;  %v5920_v8 = vrot.slane %v5912_v37, %v8384_v40  ;;  %v5927_v61 = vrot.slane %v5913_v60, %v8384_v40  ;;  %v3384_v31 = vrot.slane %v11840_v13, %v8330_v4  ;;  %11841 = vst [vmem:[#allocation44_spill] sm:$0xff] %v10118_v49  ;;  %v11844_v27 = vld [vmem:[#allocation75_spill] sm:$0xff] }
 0x190   :  { %v3391_v38 = vrot.slane %v11840_v13, %v8333_v6  ;;  %v3398_v20 = vrot.slane %v11840_v13, %v8354_v18  ;;  %v3405_v42 = vrot.slane %v11840_v13, %v8366_v28  ;;  %6579 = vperm.xlu1 %7828, %v5146_v45   ;;  %11842 = vst [vmem:[#allocation48_spill] sm:$0xff] %v10120_v32 }
 0x191   :  { %v3230_v60 = vrot.slane %v9580_v50, %v8354_v18  ;;  %v3237_v37 = vrot.slane %v9580_v50, %v8366_v28  ;;  %6621 = vperm.xlu0 %7827, %v5384_v17   ;;  %v5359_v41 = vrot.slane %v11843_v7, %v8384_v40  ;;  %v5366_v23 = vrot.slane %v11844_v27, %v8384_v40  ;;  %v11847_v17 = vld [vmem:[#allocation62_spill] sm:$0xff] }
 0x192   :  { %v3188_v13 = vrot.slane %v11845_v30, %v8330_v4  ;;  %v3195_v45 = vrot.slane %v11845_v30, %v8333_v6  ;;  %v5929_v39 = vcombine.low %v3440_v48, %v3447_v56  ;;  %v5180_v32 = vcombine.low %v5172_v24, %v5179_v36  ;;  %v10142_v46 = vpop.xlane.xlu1 %532 }
 0x193   :  { %v5930_v49 = vcombine.low %v3454_v44, %v3461_v3  ;;  %v5928_v14 = vcombine.low %v5920_v8, %v5927_v61  ;;  %v5393_v50 = vrot.slane %v11846_v9, %v8384_v40  ;;  %v5400_v10 = vrot.slane %v11847_v17, %v8384_v40  ;;  %11848 = vst [vmem:[#allocation6_spill] sm:$0xff] %v10142_v46  ;;  %v10154_v3 = vpop.xlane.xlu0 %529 }
 0x194   :  { %v5895_v7 = vcombine.low %v3384_v31, %v3391_v38  ;;  %v5896_v57 = vcombine.low %v3398_v20, %v3405_v42  ;;  %v3468_v27 = vrot.slane %v9758_v12, %v8330_v4  ;;  %v3475_v53 = vrot.slane %v9758_v12, %v8333_v6  ;;  %6585 = vperm.xlu1 %7828, %v5180_v32  }
 0x195   :  { %v3482_v48 = vrot.slane %v9758_v12, %v8354_v18  ;;  %v3832_v9 = vrot.slane %v9950_v35, %v8330_v4  ;;  %v3839_v56 = vrot.slane %v9950_v35, %v8333_v6  ;;  %6717 = vperm.xlu0 %7827, %v5928_v14   ;;  %v5367_v44 = vcombine.low %v5359_v41, %v5366_v23 }
 0x196   :  { %v3846_v24 = vrot.slane %v9950_v35, %v8354_v18  ;;  %v3853_v36 = vrot.slane %v9950_v35, %v8366_v28  ;;  %11849 = vst [vmem:[#allocation70_spill] sm:$0xff] %v10154_v3  ;;  %v5631_v8 = vrot.slane %v9910_v11, %v8384_v40  ;;  %v5638_v61 = vrot.slane %v9922_v29, %v8384_v40  ;;  %v10175_v41 = vpop.permute.xlu1 %6426  ;;  %v11895_v3 = vld [vmem:[#allocation36_spill] sm:$0xff] }
 0x197   :  { %v3489_v31 = vrot.slane %v9758_v12, %v8366_v28  ;;  %v5401_v38 = vcombine.low %v5393_v50, %v5400_v10  ;;  %v5937_v14 = vrot.slane %v5929_v39, %v8384_v40  ;;  %v5944_v20 = vrot.slane %v5930_v49, %v8384_v40  ;;  %11851 = vst [vmem:[#allocation45_spill] sm:$0xff] %v10175_v41 }
 0x198   :  { %v10164_v42 = vcombine.low %v3216_v25, %v3223_v5  ;;  %v11850_v35 = vrot.slane %v9551_v33, %v8354_v18  ;;  %v3202_v11 = vrot.slane %v11845_v30, %v8354_v18  ;;  %v3209_v29 = vrot.slane %v11845_v30, %v8366_v28  ;;  %6618 = vperm.xlu1 %7828, %v5367_v44   ;;  %v11852_v30 = vld [vmem:[#allocation77_spill] sm:$0xff]  ;;  %v11853_v44 = vld [vmem:[#allocation58_spill] sm:$0xff] }
 0x199   :  { %v10177_v12 = vcombine.low %v3230_v60, %v3237_v37  ;;  %v10179_v39 = vcombine.low %v3188_v13, %v3195_v45  ;;  %v5946_v10 = vcombine.low %v3468_v27, %v3475_v53  ;;  %v6167_v25 = vcombine.low %v3832_v9, %v3839_v56  ;;  %6624 = vperm.xlu0 %7827, %v5401_v38   ;;  %v11854_v53 = vld [vmem:[#allocation59_spill] sm:$0xff]  ;;  %v10197_v27 = vpop.permute.xlu0 %6423  ;;  %v11857_v38 = vld [vmem:[#allocation60_spill] sm:$0xff] }
 0x19a   :  { %v10169_v32 = vcombine.low %v11850_v35, %v3153_v47  ;;  %v6168_v5 = vcombine.low %v3846_v24, %v3853_v36  ;;  %v5639_v33 = vcombine.low %v5631_v8, %v5638_v61  ;;  %v5903_v47 = vrot.slane %v5895_v7, %v8384_v40  ;;  %11856 = vst [vmem:[#allocation47_spill] sm:$0xff] %v10197_v27 }
 0x19b   :  { %v5910_v49 = vrot.slane %v5896_v57, %v8384_v40  ;;  %v5947_v23 = vcombine.low %v3482_v48, %v3489_v31  ;;  %v5945_v50 = vcombine.low %v5937_v14, %v5944_v20  ;;  %v5410_v17 = vrot.slane %v11852_v30, %v8384_v40  ;;  %v10195_v57 = vpop.permute.xlu1 %6429 }
 0x19c   :  { %v5417_v60 = vrot.slane %v11853_v44, %v8384_v40  ;;  %v10187_v37 = vcombine.low %v3202_v11, %v3209_v29  ;;  %v3496_v13 = vrot.slane %v11854_v53, %v8330_v4  ;;  %v3503_v45 = vrot.slane %v11854_v53, %v8333_v6  ;;  %11855 = vst [vmem:[#allocation46_spill] sm:$0xff] %v10195_v57 }
 0x19d   :  { %v3510_v7 = vrot.slane %v11854_v53, %v8354_v18  ;;  %6666 = vperm.xlu1 %7828, %v5639_v33   ;;  %v3517_v48 = vrot.slane %v11854_v53, %v8366_v28  ;;  %v3860_v9 = vrot.slane %v9982_v26, %v8330_v4  ;;  %v3867_v56 = vrot.slane %v9982_v26, %v8333_v6 }
 0x19e   :  { %v3874_v24 = vrot.slane %v9982_v26, %v8354_v18  ;;  %6720 = vperm.xlu0 %7827, %v5945_v50   ;;  %v3881_v36 = vrot.slane %v9982_v26, %v8366_v28  ;;  %v5911_v8 = vcombine.low %v5903_v47, %v5910_v49  ;;  %v6175_v61 = vrot.slane %v6167_v25, %v8384_v40  ;;  %v11858_v25 = vld [vmem:[#allocation74_spill] sm:$0xff]  ;;  %v10225_v49 = vpop.permute.xlu0 %6450 }
 0x19f   :  { %v6182_v31 = vrot.slane %v6168_v5, %v8384_v40  ;;  %v3272_v14 = vrot.slane %v11857_v38, %v8330_v4  ;;  %v5418_v20 = vcombine.low %v5410_v17, %v5417_v60  ;;  %v5954_v35 = vrot.slane %v5946_v10, %v8384_v40  ;;  %v10223_v47 = vpop.permute.xlu1 %6432  ;;  %11860 = vst [vmem:[#allocation64_spill] sm:$0xff] %v10225_v49 }
 0x1a0   :  { %v5961_v11 = vrot.slane %v5947_v23, %v8384_v40  ;;  %v3279_v29 = vrot.slane %v11857_v38, %v8333_v6  ;;  %11859 = vst [vmem:[#allocation10_spill] sm:$0xff] %v10223_v47  ;;  %v5963_v10 = vcombine.low %v3496_v13, %v3503_v45  ;;  %v5964_v50 = vcombine.low %v3510_v7, %v3517_v48  ;;  %v11861_v23 = vld [vmem:[#allocation39_spill] sm:$0xff]  ;;  %v11862_v13 = vld [vmem:[#allocation22_spill] sm:$0xff]  ;;  %v11863_v7 = vld [vmem:[#allocation76_spill] sm:$0xff] }
 0x1a1   :  { %6714 = vperm.xlu1 %7828, %v5911_v8   ;;  %v3552_v30 = vrot.slane %v11861_v23, %v8330_v4  ;;  %v6184_v17 = vcombine.low %v3860_v9, %v3867_v56  ;;  %v6185_v44 = vcombine.low %v3874_v24, %v3881_v36  ;;  %v6183_v60 = vcombine.low %v6175_v61, %v6182_v31 }
 0x1a2   :  { %6627 = vperm.xlu0 %7827, %v5418_v20   ;;  %v5648_v53 = vrot.slane %v9940_v34, %v8384_v40  ;;  %v5655_v5 = vrot.slane %v9948_v58, %v8384_v40  ;;  %v3559_v8 = vrot.slane %v11861_v23, %v8333_v6  ;;  %v5962_v33 = vcombine.low %v5954_v35, %v5961_v11  ;;  %v11864_v34 = vld [vmem:[#allocation79_spill] sm:$0xff]  ;;  %v10249_v61 = vpop.permute.xlu0 %6456 }
 0x1a3   :  { %v5427_v45 = vrot.slane %v11862_v13, %v8384_v40  ;;  %v5434_v48 = vrot.slane %v11863_v7, %v8384_v40  ;;  %v3566_v9 = vrot.slane %v11861_v23, %v8354_v18  ;;  %v3573_v56 = vrot.slane %v11861_v23, %v8366_v28  ;;  %v10247_v36 = vpop.permute.xlu1 %6435  ;;  %11866 = vst [vmem:[#allocation75_spill] sm:$0xff] %v10249_v61 }
 0x1a4   :  { %v3524_v24 = vrot.slane %v11864_v34, %v8330_v4  ;;  %v3531_v58 = vrot.slane %v11864_v34, %v8333_v6  ;;  %11865 = vst [vmem:[#allocation63_spill] sm:$0xff] %v10247_v36  ;;  %v3538_v31 = vrot.slane %v11864_v34, %v8354_v18  ;;  %v3888_v20 = vrot.slane %v9980_v54, %v8330_v4 }
 0x1a5   :  { %6762 = vperm.xlu1 %7828, %v6183_v60   ;;  %v3895_v35 = vrot.slane %v9980_v54, %v8333_v6  ;;  %v3902_v11 = vrot.slane %v9980_v54, %v8354_v18  ;;  %v3909_v23 = vrot.slane %v9980_v54, %v8366_v28  ;;  %v5656_v13 = vcombine.low %v5648_v53, %v5655_v5 }
 0x1a6   :  { %6723 = vperm.xlu0 %7827, %v5962_v33   ;;  %v6192_v60 = vrot.slane %v6184_v17, %v8384_v40  ;;  %v6199_v7 = vrot.slane %v6185_v44, %v8384_v40  ;;  %v3545_v26 = vrot.slane %v11864_v34, %v8366_v28  ;;  %v5435_v61 = vcombine.low %v5427_v45, %v5434_v48  ;;  %v10277_v44 = vpop.permute.xlu0 %6462 }
 0x1a7   :  { %v5971_v49 = vrot.slane %v5963_v10, %v8384_v40  ;;  %v5978_v36 = vrot.slane %v5964_v50, %v8384_v40  ;;  %v10267_v47 = vcombine.low %v3272_v14, %v3279_v29  ;;  %v10275_v17 = vpop.permute.xlu1 %6438  ;;  %11868 = vst [vmem:[#allocation21_spill] sm:$0xff] %v10277_v44  ;;  %v10279_v53 = vcombine.low %v3552_v30, %v3559_v8  ;;  %v11870_v30 = vld [vmem:[#allocation25_spill] sm:$0xff]  ;;  %v11877_v44 = vld [vmem:[#allocation7_spill] sm:$0xff] }
 0x1a8   :  { %11867 = vst [vmem:[#allocation72_spill] sm:$0xff] %v10275_v17  ;;  %v10281_v10 = vcombine.low %v3566_v9, %v3573_v56  ;;  %v5980_v14 = vcombine.low %v3524_v24, %v3531_v58  ;;  %v6201_v29 = vcombine.low %v3888_v20, %v3895_v35  ;;  %v6202_v50 = vcombine.low %v3902_v11, %v3909_v23  ;;  %v11871_v9 = vld [vmem:[#allocation35_spill] sm:$0xff]  ;;  %v11874_v20 = vld [vmem:[#allocation20_spill] sm:$0xff] }
 0x1a9   :  { %6669 = vperm.xlu1 %7828, %v5656_v13   ;;  %v6200_v45 = vcombine.low %v6192_v60, %v6199_v7  ;;  %v5665_v48 = vrot.slane %v9936_v55, %v8384_v40  ;;  %v5672_v34 = vrot.slane %v9938_v62, %v8384_v40  ;;  %v5981_v54 = vcombine.low %v3538_v31, %v3545_v26  ;;  %v11869_v13 = vld [vmem:[#allocation28_spill] sm:$0xff] }
 0x1aa   :  { %6630 = vperm.xlu0 %7827, %v5435_v61   ;;  %v5979_v5 = vcombine.low %v5971_v49, %v5978_v36  ;;  %v5444_v33 = vrot.slane %v11869_v13, %v8384_v40  ;;  %v5451_v8 = vrot.slane %v11870_v30, %v8384_v40  ;;  %v3608_v56 = vrot.slane %v11871_v9, %v8330_v4  ;;  %v10301_v49 = vpop.permute.xlu0 %6468 }
 0x1ab   :  { %v3615_v24 = vrot.slane %v11871_v9, %v8333_v6  ;;  %v3622_v55 = vrot.slane %v11871_v9, %v8354_v18  ;;  %v3629_v62 = vrot.slane %v11871_v9, %v8366_v28  ;;  %v10299_v26 = vpop.permute.xlu1 %6441  ;;  %11873 = vst [vmem:[#allocation77_spill] sm:$0xff] %v10301_v49  ;;  %v3916_v58 = vrot.slane %v10006_v22, %v8330_v4 }
 0x1ac   :  { %11872 = vst [vmem:[#allocation62_spill] sm:$0xff] %v10299_v26  ;;  %v3923_v36 = vrot.slane %v10006_v22, %v8333_v6  ;;  %v3930_v61 = vrot.slane %v10006_v22, %v8354_v18  ;;  %v3937_v31 = vrot.slane %v10006_v22, %v8366_v28  ;;  %v3580_v35 = vrot.slane %v11874_v20, %v8330_v4 }
 0x1ad   :  { %6765 = vperm.xlu1 %7828, %v6200_v45   ;;  %v5673_v11 = vcombine.low %v5665_v48, %v5672_v34  ;;  %v6209_v23 = vrot.slane %v6201_v29, %v8384_v40  ;;  %v6216_v60 = vrot.slane %v6202_v50, %v8384_v40  ;;  %v3587_v7 = vrot.slane %v11874_v20, %v8333_v6 }
 0x1ae   :  { %6726 = vperm.xlu0 %7827, %v5979_v5   ;;  %v5452_v45 = vcombine.low %v5444_v33, %v5451_v8  ;;  %v5988_v13 = vrot.slane %v5980_v14, %v8384_v40  ;;  %v5995_v30 = vrot.slane %v5981_v54, %v8384_v40  ;;  %v10319_v9 = vcombine.low %v3608_v56, %v3615_v24  ;;  %v10330_v34 = vpop.permute.xlu0 %6474 }
 0x1af   :  { %v3594_v22 = vrot.slane %v11874_v20, %v8354_v18  ;;  %v3601_v5 = vrot.slane %v11874_v20, %v8366_v28  ;;  %v11875_v48 = vlaneseq  ;;  %v10328_v50 = vpop.permute.xlu1 %6444  ;;  %v4000_v33 = vrot.slane %v10030_v59, %v8330_v4 }
 0x1b0   :  { %11876 = vst [vmem:[#allocation58_spill] sm:$0xff] %v10328_v50  ;;  %v4007_v54 = vrot.slane %v10030_v59, %v8333_v6  ;;  %v6218_v14 = vcombine.low %v3916_v58, %v3923_v36  ;;  %v6219_v8 = vcombine.low %v3930_v61, %v3937_v31  ;;  %v4014_v56 = vrot.slane %v10030_v59, %v8354_v18  ;;  %v11878_v58 = vld [vmem:[#allocation8_spill] sm:$0xff] }
 0x1b1   :  { %v10326_v29 = vand.u32 127, %v11875_v48  ;;  %6672 = vperm.xlu1 %7828, %v5673_v11   ;;  %v6217_v24 = vcombine.low %v6209_v23, %v6216_v60  ;;  %v5682_v20 = vrot.slane %v10002_v51, %v8384_v40  ;;  %v5689_v11 = vrot.slane %v10010_v16, %v8384_v40 }
 0x1b2   :  { %6633 = vperm.xlu0 %7827, %v5452_v45   ;;  %v4021_v48 = vrot.slane %v10030_v59, %v8366_v28  ;;  %v5996_v49 = vcombine.low %v5988_v13, %v5995_v30  ;;  %v5189_v50 = vrot.slane %v11877_v44, %v8384_v40  ;;  %v5196_v36 = vrot.slane %v11878_v58, %v8384_v40  ;;  %v10358_v23 = vpop.permute.xlu0 %6480 }
 0x1b3   :  { %v3636_v61 = vrot.slane %v9856_v1, %v8330_v4  ;;  %v3643_v31 = vrot.slane %v9856_v1, %v8333_v6  ;;  %v3650_v51 = vrot.slane %v9856_v1, %v8354_v18  ;;  %v3657_v16 = vrot.slane %v9856_v1, %v8366_v28  ;;  %v10356_v59 = vpop.permute.xlu1 %6447 }
 0x1b4   :  { %11879 = vst [vmem:[#allocation59_spill] sm:$0xff] %v10356_v59  ;;  %v3944_v44 = vrot.slane %v10004_v43, %v8330_v4  ;;  %v3951_v60 = vrot.slane %v10004_v43, %v8333_v6  ;;  %v3958_v45 = vrot.slane %v10004_v43, %v8354_v18  ;;  %v3965_v13 = vrot.slane %v10004_v43, %v8366_v28 }
 0x1b5   :  { %6768 = vperm.xlu1 %7828, %v6217_v24   ;;  %v6269_v30 = vcombine.low %v4000_v33, %v4007_v54  ;;  %v5690_v1 = vcombine.low %v5682_v20, %v5689_v11  ;;  %v6226_v58 = vrot.slane %v6218_v14, %v8384_v40  ;;  %v6233_v24 = vrot.slane %v6219_v8, %v8384_v40 }
 0x1b6   :  { %6729 = vperm.xlu0 %7827, %v5996_v49   ;;  %v6270_v59 = vcombine.low %v4014_v56, %v4021_v48  ;;  %v5197_v26 = vcombine.low %v5189_v50, %v5196_v36  ;;  %v5733_v17 = vrot.slane %v10022_v52, %v8384_v40  ;;  %v5740_v57 = vrot.slane %v10064_v63, %v8384_v40  ;;  %v10383_v54 = vpop.permute.xlu0 %6486  ;;  %v11882_v36 = vld [vmem:[#allocation9_spill] sm:$0xff] }
 0x1b7   :  { %v10374_v41 = vcombine.low %v3622_v55, %v3629_v62  ;;  %v10376_v27 = vcombine.low %v3580_v35, %v3587_v7  ;;  %v10378_v43 = vcombine.low %v3594_v22, %v3601_v5  ;;  %v6812_v49 = vadd.s32 4294967288, %v10326_v29  ;;  %v10381_v33 = vpop.permute.xlu1 %6453  ;;  %v11891_v22 = vld [vmem:[#allocation52_spill] sm:$0xff] }
 0x1b8   :  { %11880 = vst [vmem:[#allocation60_spill] sm:$0xff] %v10381_v33  ;;  %v10385_v50 = vcombine.low %v3636_v61, %v3643_v31  ;;  %v10387_v14 = vcombine.low %v3650_v51, %v3657_v16  ;;  %v6235_v52 = vcombine.low %v3944_v44, %v3951_v60  ;;  %v6819_v63 = vadd.s32 4294967280, %v10326_v29 }
 0x1b9   :  { %6675 = vperm.xlu1 %7828, %v5690_v1   ;;  %v6236_v55 = vcombine.low %v3958_v45, %v3965_v13  ;;  %v6234_v62 = vcombine.low %v6226_v58, %v6233_v24  ;;  %v5699_v35 = vrot.slane %v9972_v21, %v8384_v40  ;;  %v5706_v7 = vrot.slane %v9996_v15, %v8384_v40  ;;  %v11883_v45 = vld [vmem:[#allocation26_spill] sm:$0xff]  ;;  %v11885_v58 = vld [vmem:[#allocation27_spill] sm:$0xff] }
 0x1ba   :  { %6588 = vperm.xlu0 %7827, %v5197_v26   ;;  %v5741_v5 = vcombine.low %v5733_v17, %v5740_v57  ;;  %v6277_v8 = vrot.slane %v6269_v30, %v8384_v40  ;;  %v6284_v56 = vrot.slane %v6270_v59, %v8384_v40  ;;  %v3972_v20 = vrot.slane %v10032_v2, %v8330_v4  ;;  %v10408_v57 = vpop.permute.xlu0 %6492  ;;  %v11884_v30 = vld [vmem:[#allocation78_spill] sm:$0xff] }
 0x1bb   :  { %v3979_v26 = vrot.slane %v10032_v2, %v8333_v6  ;;  %v3986_v21 = vrot.slane %v10032_v2, %v8354_v18  ;;  %v3993_v15 = vrot.slane %v10032_v2, %v8366_v28  ;;  %v10406_v11 = vpop.permute.xlu1 %6459  ;;  %v10415_v61 = vsub.s32 %v6812_v49, %v11882_v36 }
 0x1bc   :  { %11881 = vst [vmem:[#allocation74_spill] sm:$0xff] %v10406_v11  ;;  %v10418_v31 = vsub.s32 %v6819_v63, %v11882_v36  ;;  %v10422_v2 = vsub.s32 %v10326_v29, %v11882_v36  ;;  %v5707_v51 = vcombine.low %v5699_v35, %v5706_v7  ;;  %v6243_v16 = vrot.slane %v6235_v52, %v8384_v40 }
 0x1bd   :  { %6771 = vperm.xlu1 %7828, %v6234_v62   ;;  %v6250_v59 = vrot.slane %v6236_v55, %v8384_v40  ;;  %v6826_v44 = vadd.s32 4294967272, %v10326_v29  ;;  %v6285_v60 = vcombine.low %v6277_v8, %v6284_v56  ;;  %v5478_v13 = vrot.slane %v11883_v45, %v8384_v40 }
 0x1be   :  { %6684 = vperm.xlu0 %7827, %v5741_v5   ;;  %v5485_v1 = vrot.slane %v11884_v30, %v8384_v40  ;;  %v4056_v24 = vrot.slane %v11885_v58, %v8330_v4  ;;  %v4063_v49 = vrot.slane %v11885_v58, %v8333_v6  ;;  %v6252_v63 = vcombine.low %v3972_v20, %v3979_v26  ;;  %v10437_v55 = vpop.permute.xlu0 %6498  ;;  %v11887_v5 = vld [vmem:[#allocation30_spill] sm:$0xff] }
 0x1bf   :  { %v6253_v62 = vcombine.low %v3986_v21, %v3993_v15  ;;  %v10435_v52 = vpop.permute.xlu1 %6465  ;;  %v4070_v35 = vrot.slane %v11885_v58, %v8354_v18  ;;  %v4077_v7 = vrot.slane %v11885_v58, %v8366_v28  ;;  %v4028_v8 = vrot.slane %v11887_v5, %v8330_v4  ;;  %v11888_v15 = vld [vmem:[#allocation37_spill] sm:$0xff] }
 0x1c0   :  { %11886 = vst [vmem:[#allocation39_spill] sm:$0xff] %v10435_v52  ;;  %v4035_v56 = vrot.slane %v11887_v5, %v8333_v6  ;;  %v4042_v20 = vrot.slane %v11887_v5, %v8354_v18  ;;  %v6251_v26 = vcombine.low %v6243_v16, %v6250_v59  ;;  %v5716_v21 = vrot.slane %v10066_v19, %v8384_v40 }
 0x1c1   :  { %6678 = vperm.xlu1 %7828, %v5707_v51   ;;  %v5723_v51 = vrot.slane %v11888_v15, %v8384_v40  ;;  %v4049_v45 = vrot.slane %v11887_v5, %v8366_v28  ;;  %v5486_v30 = vcombine.low %v5478_v13, %v5485_v1  ;;  %v6022_v58 = vrot.slane %v10376_v27, %v8384_v40 }
 0x1c2   :  { %6780 = vperm.xlu0 %7827, %v6285_v60   ;;  %v6029_v60 = vrot.slane %v10378_v43, %v8384_v40  ;;  %v10459_v48 = vcombine.low %v4056_v24, %v4063_v49  ;;  %v10462_v16 = vsub.s32 %v6826_v44, %v11882_v36  ;;  %v10464_v59 = vpop.permute.xlu0 %6504  ;;  %v10466_v15 = vcombine.low %v4070_v35, %v4077_v7  ;;  %v11889_v7 = vld [vmem:[#allocation56_spill] sm:$0xff] }
 0x1c3   :  { %v6472_v19 = vpop.permute.xlu1 %6471  ;;  %v10468_v13 = vcombine.low %v4028_v8, %v4035_v56  ;;  %v10471_v27 = vadd.s32 4294967224, %v10326_v29  ;;  %v6833_v43 = vadd.s32 4294967264, %v10326_v29  ;;  %v5724_v24 = vcombine.low %v5716_v21, %v5723_v51  ;;  %v11890_v56 = vld [vmem:[#allocation57_spill] sm:$0xff] }
 0x1c4   :  { %v6920_v1 = vrot.slane %v6472_v19, %v10422_v2  ;;  %v6260_v44 = vrot.slane %v6252_v63, %v8384_v40  ;;  %v6267_v49 = vrot.slane %v6253_v62, %v8384_v40  ;;  %v10477_v5 = vcombine.low %v4042_v20, %v4049_v45 }
 0x1c5   :  { %6774 = vperm.xlu1 %7828, %v6251_v26   ;;  %v6030_v35 = vcombine.low %v6022_v58, %v6029_v60  ;;  %v5223_v8 = vrot.slane %v11889_v7, %v8384_v40  ;;  %v5230_v26 = vrot.slane %v11890_v56, %v8384_v40  ;;  %v4112_v17 = vrot.slane %v11891_v22, %v8330_v4 }
 0x1c6   :  { %6639 = vperm.xlu0 %7827, %v5486_v30   ;;  %v4119_v30 = vrot.slane %v11891_v22, %v8333_v6  ;;  %v6840_v21 = vadd.s32 4294967256, %v10326_v29  ;;  %v6924_v63 = vrot.slane %v10330_v34, %v10415_v61  ;;  %v10490_v20 = vpop.permute.xlu0 %6510  ;;  %v10495_v45 = vsub.s32 %v6833_v43, %v11882_v36  ;;  %v11892_v34 = vld [vmem:[#allocation18_spill] sm:$0xff]  ;;  %v11894_v43 = vld [vmem:[#allocation68_spill] sm:$0xff] }
 0x1c7   :  { %v6478_v62 = vpop.permute.xlu1 %6477  ;;  %v6847_v58 = vadd.s32 4294967248, %v10326_v29  ;;  %v6268_v7 = vcombine.low %v6260_v44, %v6267_v49  ;;  %v5461_v56 = vrot.slane %v11892_v34, %v8384_v40  ;;  %v5231_v51 = vcombine.low %v5223_v8, %v5230_v26 }
 0x1c8   :  { %v6929_v60 = vrot.slane %v6478_v62, %v10418_v31  ;;  %v6925_v19 = vsel %vm6817_vm1, %v6924_v63, %v6920_v1  ;;  %v5767_v33 = vrot.slane %v11894_v43, %v8384_v40  ;;  %v5774_v46 = vrot.slane %v11895_v3, %v8384_v40 }
 0x1c9   :  { %6681 = vperm.xlu1 %7828, %v5724_v24   ;;  %v11893_v24 = vld [vmem:[#allocation19_spill] sm:$0xff]  ;;  %v10512_v1 = vsub.s32 %v6840_v21, %v11882_v36  ;;  %v6934_v44 = vrot.slane %v10358_v23, %v10462_v16  ;;  %v10519_v8 = vsub.s32 %v6847_v58, %v11882_v36  ;;  %v6854_v26 = vadd.s32 4294967240, %v10326_v29 }
 0x1ca   :  { %6735 = vperm.xlu0 %7827, %v6030_v35   ;;  %v5468_v52 = vrot.slane %v11893_v24, %v8384_v40  ;;  %v6930_v11 = vsel %vm6824_vm2, %v6929_v60, %v6925_v19  ;;  %v4133_v35 = vrot.slane %v11891_v22, %v8366_v28  ;;  %v10516_v63 = vpop.permute.xlu0 %6516  ;;  %v6861_v3 = vadd.s32 4294967232, %v10326_v29 }
 0x1cb   :  { %v6484_v49 = vpop.permute.xlu1 %6483  ;;  %v6935_v21 = vsel %vm6831_vm3, %v6934_v44, %v6930_v11  ;;  %v6005_v23 = vrot.slane %v10279_v53, %v8384_v40  ;;  %v6012_v19 = vrot.slane %v10281_v10, %v8384_v40  ;;  %v5775_v58 = vcombine.low %v5767_v33, %v5774_v46 }
 0x1cc   :  { %v6939_v62 = vrot.slane %v6484_v49, %v10495_v45  ;;  %v5469_v60 = vcombine.low %v5461_v56, %v5468_v52  ;;  %v6311_v34 = vrot.slane %v10459_v48, %v8384_v40  ;;  %v6318_v24 = vrot.slane %v10466_v15, %v8384_v40 }
 0x1cd   :  { %6777 = vperm.xlu1 %7828, %v6268_v7   ;;  %v10534_v43 = vcombine.low %v4112_v17, %v4119_v30  ;;  %v6944_v11 = vrot.slane %v10383_v54, %v10512_v1  ;;  %v10541_v10 = vsub.s32 %v6854_v26, %v11882_v36  ;;  %v10544_v46 = vsub.s32 %v6861_v3, %v11882_v36  ;;  %v11896_v54 = vld [vmem:[#allocation49_spill] sm:$0xff] }
 0x1ce   :  { %6594 = vperm.xlu0 %7827, %v5231_v51   ;;  %v6940_v7 = vsel %vm6838_vm4, %v6939_v62, %v6935_v21  ;;  %v10538_v52 = vpop.permute.xlu0 %6522  ;;  %v6875_v33 = vadd.s32 4294967216, %v10326_v29  ;;  %v6013_v15 = vcombine.low %v6005_v23, %v6012_v19  ;;  %v5206_v30 = vrot.slane %v11896_v54, %v8384_v40  ;;  %v11897_v51 = vld [vmem:[#allocation15_spill] sm:$0xff]  ;;  %v11898_v26 = vld [vmem:[#allocation33_spill] sm:$0xff]  ;;  %v11899_v62 = vld [vmem:[#allocation40_spill] sm:$0xff] }
 0x1cf   :  { %v6490_v53 = vpop.permute.xlu1 %6489  ;;  %v6945_v48 = vsel %vm6845_vm5, %v6944_v11, %v6940_v7  ;;  %v5213_v56 = vrot.slane %v11897_v51, %v8384_v40  ;;  %v6319_v49 = vcombine.low %v6311_v34, %v6318_v24  ;;  %v5512_v3 = vrot.slane %v11898_v26, %v8384_v40 }
 0x1d0   :  { %v6949_v17 = vrot.slane %v6490_v53, %v10519_v8  ;;  %v5519_v21 = vrot.slane %v11899_v62, %v8384_v40  ;;  %v6882_v23 = vadd.s32 4294967208, %v10326_v29  ;;  %v6954_v19 = vrot.slane %v10408_v57, %v10541_v10 }
 0x1d1   :  { %6636 = vperm.xlu1 %7828, %v5469_v60   ;;  %v10560_v60 = vsub.s32 %v10471_v27, %v11882_v36  ;;  %v10568_v34 = vsub.s32 %v6875_v33, %v11882_v36  ;;  %v6889_v24 = vadd.s32 4294967200, %v10326_v29  ;;  %v5214_v53 = vcombine.low %v5206_v30, %v5213_v56 }
 0x1d2   :  { %6690 = vperm.xlu0 %7827, %v5775_v58   ;;  %v6950_v44 = vsel %vm6852_vm6, %v6949_v17, %v6945_v48  ;;  %v10565_v58 = vpop.permute.xlu0 %6528  ;;  %v11900_v17 = vld [vmem:[#allocation42_spill] sm:$0xff]  ;;  %v5757_v57 = vrot.slane %v10169_v32, %v8384_v40  ;;  %v5520_v54 = vcombine.low %v5512_v3, %v5519_v21  ;;  %v6056_v33 = vrot.slane %v10385_v50, %v8384_v40 }
 0x1d3   :  { %v6496_v7 = vpop.permute.xlu1 %6495  ;;  %v6955_v27 = vsel %vm6859_vm7, %v6954_v19, %v6950_v44  ;;  %v5750_v48 = vrot.slane %v11900_v17, %v8384_v40  ;;  %v6063_v51 = vrot.slane %v10387_v14, %v8384_v40  ;;  %v6896_v30 = vadd.s32 4294967192, %v10326_v29 }
 0x1d4   :  { %v6959_v11 = vrot.slane %v6496_v7, %v10544_v46  ;;  %v6964_v56 = vrot.slane %v10437_v55, %v10560_v60  ;;  %v10591_v26 = vsub.s32 %v6889_v24, %v11882_v36  ;;  %v6903_v50 = vadd.s32 4294967184, %v10326_v29  ;;  %v11901_v7 = vld [vmem:[#allocation11_spill] sm:$0xff] }
 0x1d5   :  { %6732 = vperm.xlu1 %7828, %v6013_v15   ;;  %v5758_v62 = vcombine.low %v5750_v48, %v5757_v57  ;;  %v6294_v21 = vrot.slane %v10468_v13, %v8384_v40  ;;  %v6301_v55 = vrot.slane %v10477_v5, %v8384_v40  ;;  %v6064_v19 = vcombine.low %v6056_v33, %v6063_v51 }
 0x1d6   :  { %6786 = vperm.xlu0 %7827, %v6319_v49   ;;  %v6960_v15 = vsel %vm6866_vm8, %v6959_v11, %v6955_v27  ;;  %v10583_v49 = vsub.s32 %v6882_v23, %v11882_v36  ;;  %v10588_v32 = vpop.permute.xlu0 %6534  ;;  %v5257_v24 = vrot.slane %v11901_v7, %v8384_v40  ;;  %v11902_v11 = vld [vmem:[#allocation12_spill] sm:$0xff]  ;;  %v10612_v13 = vsub.s32 %v6896_v30, %v11882_v36 }
 0x1d7   :  { %v6502_v44 = vpop.permute.xlu1 %6501  ;;  %v6965_v3 = vsel %vm6873_vm9, %v6964_v56, %v6960_v15  ;;  %v5264_v27 = vrot.slane %v11902_v11, %v8384_v40  ;;  %v6910_v5 = vadd.s32 4294967176, %v10326_v29  ;;  %v6302_v33 = vcombine.low %v6294_v21, %v6301_v55  ;;  %v11904_v29 = vld [vmem:[#allocation29_spill] sm:$0xff] }
 0x1d8   :  { %v6969_v14 = vrot.slane %v6502_v44, %v10568_v34  ;;  %v6974_v48 = vrot.slane %v10464_v59, %v10583_v49  ;;  %v5495_v51 = vrot.slane %v11904_v29, %v8384_v40  ;;  %v11905_v59 = vld [vmem:[#allocation32_spill] sm:$0xff]  ;;  %v6984_v21 = vrot.slane %v10490_v20, %v10612_v13 }
 0x1d9   :  { %6591 = vperm.xlu1 %7828, %v5214_v53   ;;  %v11903_v53 = vrot.slane %v11891_v22, %v8354_v18  ;;  %v5502_v30 = vrot.slane %v11905_v59, %v8384_v40  ;;  %v5265_v44 = vcombine.low %v5257_v24, %v5264_v27  ;;  %v6046_v20 = vrot.slane %v10374_v41, %v8384_v40 }
 0x1da   :  { %6645 = vperm.xlu0 %7827, %v5520_v54   ;;  %v6970_v23 = vsel %vm6880_vm10, %v6969_v14, %v6965_v3  ;;  %v10617_v15 = vpop.permute.xlu0 %6540  ;;  %v10620_v54 = vsub.s32 %v6903_v50, %v11882_v36  ;;  %v5801_v14 = vrot.slane %v10164_v42, %v8384_v40  ;;  %v5808_v50 = vrot.slane %v10177_v12, %v8384_v40 }
 0x1db   :  { %v6338_v17 = vcombine.low %v11903_v53, %v4133_v35  ;;  %v6508_v57 = vpop.permute.xlu1 %6507  ;;  %v6975_v35 = vsel %vm6887_vm11, %v6974_v48, %v6970_v23  ;;  %v3713_v3 = vrot.slane %v9888_v0, %v8366_v28  ;;  %v6039_v12 = vrot.slane %v10319_v9, %v8384_v40  ;;  %v11908_v48 = vld [vmem:[#allocation43_spill] sm:$0xff] }
 0x1dc   :  { %v6979_v22 = vrot.slane %v6508_v57, %v10591_v26  ;;  %v5503_v7 = vcombine.low %v5495_v51, %v5502_v30  ;;  %v5809_v11 = vcombine.low %v5801_v14, %v5808_v50  ;;  %v6345_v27 = vrot.slane %v10534_v43, %v8384_v40  ;;  %v11911_v50 = vld [vmem:[#allocation50_spill] sm:$0xff] }
 0x1dd   :  { %6687 = vperm.xlu1 %7828, %v5758_v62   ;;  %v10636_v62 = vsub.s32 %v6910_v5, %v11882_v36  ;;  %v6352_v53 = vrot.slane %v6338_v17, %v8384_v40  ;;  %v11906_v9 = vrot.slane %v9888_v0, %v8333_v6  ;;  %v4084_v57 = vrot.slane %v11908_v48, %v8330_v4 }
 0x1de   :  { %6741 = vperm.xlu0 %7827, %v6064_v19   ;;  %v6980_v56 = vsel %vm6894_vm12, %v6979_v22, %v6975_v35  ;;  %v10640_v23 = vpop.permute.xlu0 %6546  ;;  %v4091_v41 = vrot.slane %v11908_v48, %v8333_v6  ;;  %v4098_v17 = vrot.slane %v11908_v48, %v8354_v18  ;;  %v7003_v29 = vrot.slane %v10538_v52, %v10415_v61 }
 0x1df   :  { %v6514_v55 = vpop.permute.xlu1 %6513  ;;  %v6994_v36 = vrot.slane %v10516_v63, %v10636_v62  ;;  %v6985_v19 = vsel %vm6901_vm13, %v6984_v21, %v6980_v56  ;;  %v11907_v63 = vrot.slane %v9888_v0, %v8330_v4  ;;  %v11909_v59 = vrot.slane %v9888_v0, %v8354_v18 }
 0x1e0   :  { %v6989_v42 = vrot.slane %v6514_v55, %v10620_v54  ;;  %v6047_v56 = vcombine.low %v6039_v12, %v6046_v20  ;;  %v5247_v21 = vrot.slane %v11911_v50, %v8384_v40  ;;  %v11914_v0 = vrot.slane %v11857_v38, %v8366_v28 }
 0x1e1   :  { %6783 = vperm.xlu1 %7828, %v6302_v33   ;;  %v6082_v5 = vcombine.low %v11907_v63, %v11906_v9  ;;  %v4105_v33 = vrot.slane %v11908_v48, %v8366_v28  ;;  %v6083_v30 = vcombine.low %v11909_v59, %v3713_v3  ;;  %v11915_v3 = vrot.slane %v11857_v38, %v8354_v18  ;;  %v11920_v38 = vld [vmem:[#allocation38_spill] sm:$0xff] }
 0x1e2   :  { %6600 = vperm.xlu0 %7827, %v5265_v44   ;;  %v6990_v24 = vsel %vm6908_vm14, %v6989_v42, %v6985_v19  ;;  %v10667_v43 = vpop.permute.xlu0 %6552  ;;  %v11910_v44 = vld [vmem:[#allocation55_spill] sm:$0xff]  ;;  %v6353_v42 = vcombine.low %v6345_v27, %v6352_v53  ;;  %v11913_v19 = vld [vmem:[#allocation34_spill] sm:$0xff]  ;;  %v11916_v20 = vrot.slane %v11858_v25, %v8333_v6  ;;  %v11918_v27 = vrot.slane %v11858_v25, %v8366_v28 }
 0x1e3   :  { %v10665_v22 = vsel %vm6915_vm15, %v6994_v36, %v6990_v24  ;;  %v6520_v35 = vpop.permute.xlu1 %6519  ;;  %v5240_v14 = vrot.slane %v11910_v44, %v8384_v40  ;;  %v11912_v36 = vld [vmem:[#allocation24_spill] sm:$0xff]  ;;  %v10694_v12 = vcombine.low %v11915_v3, %v11914_v0  ;;  %v11917_v24 = vrot.slane %v11858_v25, %v8330_v4 }
 0x1e4   :  { %v6999_v51 = vrot.slane %v6520_v35, %v10422_v2  ;;  %v5546_v52 = vrot.slane %v11912_v36, %v8384_v40  ;;  %v11919_v53 = vrot.slane %v11858_v25, %v8354_v18  ;;  %v3664_v63 = vrot.slane %v11920_v38, %v8330_v4 }
 0x1e5   :  { %6642 = vperm.xlu1 %7828, %v5503_v7   ;;  %v5553_v7 = vrot.slane %v11913_v19, %v8384_v40  ;;  %v6321_v59 = vcombine.low %v4098_v17, %v4105_v33  ;;  %v7013_v25 = vrot.slane %v10565_v58, %v10462_v16  ;;  %v5248_v50 = vcombine.low %v5240_v14, %v5247_v21  ;;  %v11921_v17 = vld [vmem:[#allocation44_spill] sm:$0xff] }
 0x1e6   :  { %6696 = vperm.xlu0 %7827, %v5809_v11   ;;  %v7004_v55 = vsel %vm6817_vm1, %v7003_v29, %v6999_v51  ;;  %v10702_v11 = vcombine.low %v11917_v24, %v11916_v20  ;;  %v10710_v9 = vcombine.low %v11919_v53, %v11918_v27  ;;  %v10714_v35 = vpop.permute.xlu0 %6558  ;;  %v3671_v29 = vrot.slane %v11920_v38, %v8333_v6  ;;  %v11922_v53 = vld [vmem:[#allocation51_spill] sm:$0xff] }
 0x1e7   :  { %v6526_v48 = vpop.permute.xlu1 %6525  ;;  %v6320_v51 = vcombine.low %v4084_v57, %v4091_v41  ;;  %v5784_v36 = vrot.slane %v10179_v39, %v8384_v40  ;;  %v5554_v0 = vcombine.low %v5546_v52, %v5553_v7  ;;  %v6090_v3 = vrot.slane %v6082_v5, %v8384_v40 }
 0x1e8   :  { %v7008_v44 = vrot.slane %v6526_v48, %v10418_v31  ;;  %v6097_v57 = vrot.slane %v6083_v30, %v8384_v40  ;;  %v3678_v41 = vrot.slane %v11920_v38, %v8354_v18  ;;  %v3685_v58 = vrot.slane %v11920_v38, %v8366_v28  ;;  %v11923_v48 = vld [vmem:[#allocation71_spill] sm:$0xff] }
 0x1e9   :  { %6738 = vperm.xlu1 %7828, %v6047_v56   ;;  %v5791_v56 = vrot.slane %v10187_v37, %v8384_v40  ;;  %v4168_v33 = vrot.slane %v11921_v17, %v8330_v4  ;;  %v4175_v5 = vrot.slane %v11921_v17, %v8333_v6  ;;  %v4182_v30 = vrot.slane %v11921_v17, %v8354_v18 }
 0x1ea   :  { %6792 = vperm.xlu0 %7827, %v6353_v42   ;;  %v7009_v19 = vsel %vm6824_vm2, %v7008_v44, %v7004_v55  ;;  %v4189_v21 = vrot.slane %v11921_v17, %v8366_v28  ;;  %v7023_v42 = vrot.slane %v10588_v32, %v10512_v1  ;;  %v6328_v7 = vrot.slane %v6320_v51, %v8384_v40 }
 0x1eb   :  { %v6532_v39 = vpop.permute.xlu1 %6531  ;;  %v7014_v14 = vsel %vm6831_vm3, %v7013_v25, %v7009_v19  ;;  %v10735_v37 = vpop.permute.xlu0 %6564  ;;  %v5792_v52 = vcombine.low %v5784_v36, %v5791_v56  ;;  %v6335_v20 = vrot.slane %v6321_v59, %v8384_v40  ;;  %v6098_v27 = vcombine.low %v6090_v3, %v6097_v57  ;;  %v11924_v25 = vld [vmem:[#allocation53_spill] sm:$0xff]  ;;  %v11925_v59 = vld [vmem:[#allocation67_spill] sm:$0xff] }
 0x1ec   :  { %v7018_v55 = vrot.slane %v6532_v39, %v10495_v45  ;;  %v5291_v38 = vrot.slane %v11922_v53, %v8384_v40  ;;  %v5298_v44 = vrot.slane %v11923_v48, %v8384_v40  ;;  %v6065_v19 = vcombine.low %v3664_v63, %v3671_v29  ;;  %v11926_v63 = vld [vmem:[#allocation80_spill] sm:$0xff] }
 0x1ed   :  { %6597 = vperm.xlu1 %7828, %v5248_v50   ;;  %v3328_v50 = vrot.slane %v11924_v25, %v8330_v4  ;;  %v3748_v56 = vrot.slane %v11925_v59, %v8330_v4  ;;  %v6371_v3 = vcombine.low %v4168_v33, %v4175_v5  ;;  %v6372_v57 = vcombine.low %v4182_v30, %v4189_v21 }
 0x1ee   :  { %6651 = vperm.xlu0 %7827, %v5554_v0   ;;  %v7019_v24 = vsel %vm6838_vm4, %v7018_v55, %v7014_v14  ;;  %v6066_v0 = vcombine.low %v3678_v41, %v3685_v58  ;;  %v7033_v39 = vrot.slane %v10617_v15, %v10541_v10  ;;  %v6336_v14 = vcombine.low %v6328_v7, %v6335_v20  ;;  %v11927_v41 = vld [vmem:[#allocation61_spill] sm:$0xff] }
 0x1ef   :  { %v6538_v32 = vpop.permute.xlu1 %6537  ;;  %v7024_v36 = vsel %vm6845_vm5, %v7023_v42, %v7019_v24  ;;  %v10756_v51 = vpop.permute.xlu0 %6570  ;;  %v5529_v29 = vrot.slane %v11926_v63, %v8384_v40  ;;  %v5536_v58 = vrot.slane %v11927_v41, %v8384_v40  ;;  %v5299_v42 = vcombine.low %v5291_v38, %v5298_v44 }
 0x1f0   :  { %v7028_v17 = vrot.slane %v6538_v32, %v10519_v8  ;;  %v5835_v33 = vrot.slane %v10267_v47, %v8384_v40  ;;  %v5842_v5 = vrot.slane %v10694_v12, %v8384_v40  ;;  %v3755_v30 = vrot.slane %v11925_v59, %v8333_v6 }
 0x1f1   :  { %6693 = vperm.xlu1 %7828, %v5792_v52   ;;  %v3762_v15 = vrot.slane %v11925_v59, %v8354_v18  ;;  %v3769_v21 = vrot.slane %v11925_v59, %v8366_v28  ;;  %v3335_v47 = vrot.slane %v11924_v25, %v8333_v6  ;;  %v3342_v12 = vrot.slane %v11924_v25, %v8354_v18 }
 0x1f2   :  { %6747 = vperm.xlu0 %7827, %v6098_v27   ;;  %v7029_v55 = vsel %vm6852_vm6, %v7028_v17, %v7024_v36  ;;  %v3349_v24 = vrot.slane %v11924_v25, %v8366_v28  ;;  %v7043_v53 = vrot.slane %v10640_v23, %v10560_v60  ;;  %v5537_v38 = vcombine.low %v5529_v29, %v5536_v58 }
 0x1f3   :  { %v6544_v52 = vpop.permute.xlu1 %6543  ;;  %v7034_v7 = vsel %vm6859_vm7, %v7033_v39, %v7029_v55  ;;  %v6073_v48 = vrot.slane %v6065_v19, %v8384_v40  ;;  %v6080_v44 = vrot.slane %v6066_v0, %v8384_v40  ;;  %v5843_v36 = vcombine.low %v5835_v33, %v5842_v5  ;;  %v11929_v55 = vld [vmem:[#allocation16_spill] sm:$0xff]  ;;  %v11930_v33 = vld [vmem:[#allocation73_spill] sm:$0xff] }
 0x1f4   :  { %v10779_v20 = vpop.permute.xlu0 %6576  ;;  %v7038_v27 = vrot.slane %v6544_v52, %v10544_v46  ;;  %v6379_v59 = vrot.slane %v6371_v3, %v8384_v40  ;;  %v6386_v17 = vrot.slane %v6372_v57, %v8384_v40  ;;  %v6116_v39 = vcombine.low %v3748_v56, %v3755_v30 }
 0x1f5   :  { %6789 = vperm.xlu1 %7828, %v6336_v14   ;;  %v6117_v25 = vcombine.low %v3762_v15, %v3769_v21  ;;  %v11928_v14 = vld [vmem:[#allocation48_spill] sm:$0xff]  ;;  %v7053_v57 = vrot.slane %v10667_v43, %v10583_v49  ;;  %v6081_v58 = vcombine.low %v6073_v48, %v6080_v44  ;;  %v5281_v5 = vrot.slane %v11930_v33, %v8384_v40  ;;  %v11931_v21 = vld [vmem:[#allocation81_spill] sm:$0xff] }
 0x1f6   :  { %6606 = vperm.xlu0 %7827, %v5299_v42   ;;  %v7039_v32 = vsel %vm6866_vm8, %v7038_v27, %v7034_v7  ;;  %v4140_v63 = vrot.slane %v11928_v14, %v8330_v4  ;;  %v4147_v19 = vrot.slane %v11928_v14, %v8333_v6  ;;  %v4154_v0 = vrot.slane %v11928_v14, %v8354_v18  ;;  %v11932_v7 = vld [vmem:[#allocation66_spill] sm:$0xff]  ;;  %v11933_v43 = vld [vmem:[#allocation65_spill] sm:$0xff] }
 0x1f7   :  { %v6550_v41 = vpop.permute.xlu1 %6549  ;;  %v7044_v23 = vsel %vm6873_vm9, %v7043_v53, %v7039_v32  ;;  %v4161_v3 = vrot.slane %v11928_v14, %v8366_v28  ;;  %v5274_v42 = vrot.slane %v11929_v55, %v8384_v40  ;;  %v6387_v15 = vcombine.low %v6379_v59, %v6386_v17 }
 0x1f8   :  { %v10798_v29 = vpop.permute.xlu0 %6582  ;;  %v7048_v56 = vrot.slane %v6550_v41, %v10568_v34  ;;  %v5580_v52 = vrot.slane %v11931_v21, %v8384_v40  ;;  %v5587_v27 = vrot.slane %v11932_v7, %v8384_v40  ;;  %v10818_v53 = vcombine.low %v3328_v50, %v3335_v47  ;;  %v11935_v7 = vld [vmem:[#allocation13_spill] sm:$0xff] }
 0x1f9   :  { %6648 = vperm.xlu1 %7828, %v5537_v38   ;;  %v10820_v38 = vcombine.low %v3342_v12, %v3349_v24  ;;  %v3720_v48 = vrot.slane %v11933_v43, %v8330_v4  ;;  %v3727_v59 = vrot.slane %v11933_v43, %v8333_v6  ;;  %v6354_v17 = vcombine.low %v4140_v63, %v4147_v19 }
 0x1fa   :  { %6702 = vperm.xlu0 %7827, %v5843_v36   ;;  %v7049_v30 = vsel %vm6880_vm10, %v7048_v56, %v7044_v23  ;;  %v6355_v14 = vcombine.low %v4154_v0, %v4161_v3  ;;  %v7063_v50 = vrot.slane %v10714_v35, %v10612_v13  ;;  %v5282_v47 = vcombine.low %v5274_v42, %v5281_v5  ;;  %v11934_v0 = vld [vmem:[#allocation6_spill] sm:$0xff] }
 0x1fb   :  { %v6556_v44 = vpop.permute.xlu1 %6555  ;;  %v7054_v32 = vsel %vm6887_vm11, %v7053_v57, %v7049_v30  ;;  %v5818_v12 = vrot.slane %v10702_v11, %v8384_v40  ;;  %v5825_v24 = vrot.slane %v10710_v9, %v8384_v40  ;;  %v5588_v56 = vcombine.low %v5580_v52, %v5587_v27 }
 0x1fc   :  { %v10825_v36 = vpop.permute.xlu0 %6615  ;;  %v7058_v41 = vrot.slane %v6556_v44, %v10591_v26  ;;  %v6124_v57 = vrot.slane %v6116_v39, %v8384_v40  ;;  %v6131_v63 = vrot.slane %v6117_v25, %v8384_v40  ;;  %v3734_v19 = vrot.slane %v11933_v43, %v8354_v18 }
 0x1fd   :  { %6744 = vperm.xlu1 %7828, %v6081_v58   ;;  %v3741_v35 = vrot.slane %v11933_v43, %v8366_v28  ;;  %v4224_v3 = vrot.slane %v11934_v0, %v8330_v4  ;;  %v4231_v39 = vrot.slane %v11934_v0, %v8333_v6  ;;  %v4238_v25 = vrot.slane %v11934_v0, %v8354_v18  ;;  %v11936_v43 = vld [vmem:[#allocation14_spill] sm:$0xff] }
 0x1fe   :  { %6798 = vperm.xlu0 %7827, %v6387_v15   ;;  %v7059_v23 = vsel %vm6894_vm12, %v7058_v41, %v7054_v32  ;;  %v4245_v55 = vrot.slane %v11934_v0, %v8366_v28  ;;  %v7073_v33 = vrot.slane %v10735_v37, %v10636_v62  ;;  %v5826_v5 = vcombine.low %v5818_v12, %v5825_v24  ;;  %v11937_v32 = vld [vmem:[#allocation17_spill] sm:$0xff] }
 0x1ff   :  { %v6562_v11 = vpop.permute.xlu1 %6561  ;;  %v7064_v58 = vsel %vm6901_vm13, %v7063_v50, %v7059_v23  ;;  %v6362_v30 = vrot.slane %v6354_v17, %v8384_v40  ;;  %v6369_v15 = vrot.slane %v6355_v14, %v8384_v40  ;;  %v6132_v52 = vcombine.low %v6124_v57, %v6131_v63 }
 0x200   :  { %v10846_v9 = vpop.permute.xlu0 %6663  ;;  %v7068_v42 = vrot.slane %v6562_v11, %v10620_v54  ;;  %v5325_v27 = vrot.slane %v11935_v7, %v8384_v40  ;;  %v5332_v44 = vrot.slane %v11936_v43, %v8384_v40  ;;  %v2425_v41 = vrot.slane %v11937_v32, %v8366_v28 }
 0x201   :  { %6603 = vperm.xlu1 %7828, %v5282_v47   ;;  %v11938_v37 = vrot.slane %v11937_v32, %v8333_v6  ;;  %v11939_v17 = vrot.slane %v11937_v32, %v8330_v4  ;;  %v6099_v14 = vcombine.low %v3720_v48, %v3727_v59  ;;  %v6100_v23 = vcombine.low %v3734_v19, %v3741_v35  ;;  %v11941_v59 = vld [vmem:[#allocation23_spill] sm:$0xff]  ;;  %v11942_v35 = vld [vmem:[#allocation54_spill] sm:$0xff] }
 0x202   :  { %6657 = vperm.xlu0 %7827, %v5588_v56   ;;  %v7069_v21 = vsel %vm6908_vm14, %v7068_v42, %v7064_v58  ;;  %v6405_v56 = vcombine.low %v4224_v3, %v4231_v39  ;;  %v7082_v57 = vrot.slane %v10756_v51, %v10415_v61  ;;  %v6406_v0 = vcombine.low %v4238_v25, %v4245_v55  ;;  %v11940_v58 = vld [vmem:[#allocation69_spill] sm:$0xff] }
 0x203   :  { %v10872_v50 = vcombine.low %v11939_v17, %v11938_v37  ;;  %v10875_v47 = vsel %vm6915_vm15, %v7073_v33, %v7069_v21  ;;  %v6568_v12 = vpop.permute.xlu1 %6567  ;;  %v6370_v11 = vcombine.low %v6362_v30, %v6369_v15  ;;  %v5563_v48 = vrot.slane %v11940_v58, %v8384_v40  ;;  %v11944_v21 = vld [vmem:[#allocation41_spill] sm:$0xff]  ;;  %v11945_v58 = vld [vmem:[#allocation70_spill] sm:$0xff] }
 0x204   :  { %v10877_v24 = vpop.permute.xlu0 %6711  ;;  %v7078_v63 = vrot.slane %v6568_v12, %v10422_v2  ;;  %v5570_v42 = vrot.slane %v11941_v59, %v8384_v40  ;;  %v5869_v19 = vrot.slane %v10818_v53, %v8384_v40  ;;  %v5876_v51 = vrot.slane %v10820_v38, %v8384_v40 }
 0x205   :  { %6699 = vperm.xlu1 %7828, %v5826_v5   ;;  %v5333_v5 = vcombine.low %v5325_v27, %v5332_v44  ;;  %v3300_v3 = vrot.slane %v11942_v35, %v8330_v4  ;;  %v3307_v39 = vrot.slane %v11942_v35, %v8333_v6  ;;  %v3314_v25 = vrot.slane %v11942_v35, %v8354_v18 }
 0x206   :  { %6753 = vperm.xlu0 %7827, %v6132_v52   ;;  %v7083_v33 = vsel %vm6817_vm1, %v7082_v57, %v7078_v63  ;;  %v3321_v55 = vrot.slane %v11942_v35, %v8366_v28  ;;  %v11943_v53 = vrot.slane %v11937_v32, %v8354_v18  ;;  %v2880_v52 = vrot.slane %v11944_v21, %v8330_v4 }
 0x207   :  { %v6574_v30 = vpop.permute.xlu1 %6573  ;;  %v2887_v7 = vrot.slane %v11944_v21, %v8333_v6  ;;  %v7092_v43 = vrot.slane %v10779_v20, %v10462_v16  ;;  %v5571_v44 = vcombine.low %v5563_v48, %v5570_v42  ;;  %v6107_v37 = vrot.slane %v6099_v14, %v8384_v40 }
 0x208   :  { %v10899_v15 = vpop.permute.xlu0 %6759  ;;  %v5301_v38 = vcombine.low %v11943_v53, %v2425_v41  ;;  %v7087_v27 = vrot.slane %v6574_v30, %v10418_v31  ;;  %v6114_v17 = vrot.slane %v6100_v23, %v8384_v40  ;;  %v5877_v41 = vcombine.low %v5869_v19, %v5876_v51 }
 0x209   :  { %6795 = vperm.xlu1 %7828, %v6370_v11   ;;  %v6413_v12 = vrot.slane %v6405_v56, %v8384_v40  ;;  %v6420_v57 = vrot.slane %v6406_v0, %v8384_v40  ;;  %v5844_v63 = vcombine.low %v3300_v3, %v3307_v39  ;;  %v5845_v11 = vcombine.low %v3314_v25, %v3321_v55  ;;  %v7530_v55 = vld [vmem:[%s11474_s1 + $0xf8] sm:$0xff] }
 0x20a   :  { %6612 = vperm.xlu0 %7827, %v5333_v5   ;;  %v7088_v32 = vsel %vm6824_vm2, %v7087_v27, %v7083_v33  ;;  %v4196_v59 = vrot.slane %v11945_v58, %v8330_v4  ;;  %v4203_v14 = vrot.slane %v11945_v58, %v8333_v6  ;;  %v4210_v23 = vrot.slane %v11945_v58, %v8354_v18 }
 0x20b   :  { %v6580_v5 = vpop.permute.xlu1 %6579  ;;  %v7093_v20 = vsel %vm6831_vm3, %v7092_v43, %v7088_v32  ;;  %v4217_v56 = vrot.slane %v11945_v58, %v8366_v28  ;;  %v7102_v42 = vrot.slane %v10798_v29, %v10512_v1  ;;  %v6115_v33 = vcombine.low %v6107_v37, %v6114_v17  ;;  %v7562_v29 = vld [vmem:[%s11474_s1 + $0x1f8] sm:$0xff]  ;;  %7750 = vmatprep.subr.mxu0 %v7530_v55  ;;  %v7512_v55 = vld [vmem:[%s11474_s1 + $0x68] sm:$0xff] }
 0x20c   :  { %v10919_v48 = vpop.permute.xlu0 %6621  ;;  %v7097_v0 = vrot.slane %v6580_v5, %v10495_v45  ;;  %v5308_v19 = vrot.slane %v10872_v50, %v8384_v40  ;;  %v5315_v51 = vrot.slane %v5301_v38, %v8384_v40  ;;  %v2894_v35 = vrot.slane %v11944_v21, %v8354_v18  ;;  %7785 = vmatprep.subr.mxu1 %v7562_v29  ;;  %v7544_v29 = vld [vmem:[%s11474_s1 + $0x168] sm:$0xff] }
 0x20d   :  { %6654 = vperm.xlu1 %7828, %v5571_v44   ;;  %v2901_v3 = vrot.slane %v11944_v21, %v8366_v28  ;;  %v6421_v25 = vcombine.low %v6413_v12, %v6420_v57  ;;  %v6388_v38 = vcombine.low %v4196_v59, %v4203_v14  ;;  %v6389_v27 = vcombine.low %v4210_v23, %v4217_v56  ;;  %v11946_v12 = vld [vmem:[#allocation31_spill] sm:$0xff] }
 0x20e   :  { %6708 = vperm.xlu0 %7827, %v5877_v41   ;;  %v7098_v39 = vsel %vm6838_vm4, %v7097_v0, %v7093_v20  ;;  %v5316_v43 = vcombine.low %v5308_v19, %v5315_v51  ;;  %v5852_v44 = vrot.slane %v5844_v63, %v8384_v40  ;;  %v5859_v37 = vrot.slane %v5845_v11, %v8384_v40  ;;  %v7561_v20 = vld [vmem:[%s11474_s1 + $0x1f0] sm:$0xff] }
 0x20f   :  { %v6586_v50 = vpop.permute.xlu1 %6585  ;;  %v7103_v30 = vsel %vm6845_vm5, %v7102_v42, %v7098_v39  ;;  %v10950_v17 = vcombine.low %v2880_v52, %v2887_v7  ;;  %v10952_v32 = vcombine.low %v2894_v35, %v2901_v3  ;;  %v3776_v57 = vrot.slane %v11946_v12, %v8330_v4  ;;  %v7514_v7 = vld [vmem:[%s11474_s1 + $0x78] sm:$0xff]  ;;  %v7513_v14 = vld [vmem:[%s11474_s1 + $0x70] sm:$0xff]  ;;  %v7528_v42 = vld [vmem:[%s11474_s1 + $0xe8] sm:$0xff] }
 0x210   :  { %v10945_v53 = vpop.permute.xlu0 %6717  ;;  %v7107_v21 = vrot.slane %v6586_v50, %v10519_v8  ;;  %v3783_v58 = vrot.slane %v11946_v12, %v8333_v6  ;;  %v3790_v59 = vrot.slane %v11946_v12, %v8354_v18  ;;  %v3797_v63 = vrot.slane %v11946_v12, %v8366_v28  ;;  %v7546_v4 = vld [vmem:[%s11474_s1 + $0x178] sm:$0xff]  ;;  %v7529_v6 = vld [vmem:[%s11474_s1 + $0xf0] sm:$0xff]  ;;  %7751 = vmatpush3.msra.mxu0 %v7514_v7  ;;  %v7527_v50 = vld [vmem:[%s11474_s1 + $0xe0] sm:$0xff] }
 0x211   :  { %6750 = vperm.xlu1 %7828, %v6115_v33   ;;  %v7157_v18 = vrot.slane %v10825_v36, %v10422_v2  ;;  %v6396_v5 = vrot.slane %v6388_v38, %v8384_v40  ;;  %7786 = vmatpush3.msra.mxu1 %v7546_v4  ;;  %v7545_v23 = vld [vmem:[%s11474_s1 + $0x170] sm:$0xff]  ;;  %v7166_v36 = vrot.slane %v10919_v48, %v10418_v31  ;;  %v7560_v33 = vld [vmem:[%s11474_s1 + $0x1e8] sm:$0xff]  ;;  %v7558_v12 = vld [vmem:[%s11474_s1 + $0x1d8] sm:$0xff] }
 0x212   :  { %6804 = vperm.xlu0 %7827, %v6421_v25   ;;  %v10955_v41 = vsel %vm6852_vm6, %v7107_v21, %v7103_v30  ;;  %v5860_v56 = vcombine.low %v5852_v44, %v5859_v37  ;;  %v6403_v0 = vrot.slane %v6389_v27, %v8384_v40  ;;  %7752 = vmatprep.subr.mxu0 %v7529_v6  ;;  %v7559_v27 = vld [vmem:[%s11474_s1 + $0x1e0] sm:$0xff]  ;;  %v7525_v7 = vld [vmem:[%s11474_s1 + $0xd0] sm:$0xff] }
 0x213   :  { %v6619_v11 = vpop.permute.xlu1 %6618  ;;  %7787 = vmatprep.subr.mxu1 %v7561_v20  ;;  %7753 = vmatpush3.msra.mxu0 %v7513_v14  ;;  %v5597_v39 = vrot.slane %v10950_v17, %v8384_v40  ;;  %v5604_v25 = vrot.slane %v10952_v32, %v8384_v40  ;;  %v7236_v30 = vrot.slane %v10846_v9, %v10422_v2  ;;  %v7543_v44 = vld [vmem:[%s11474_s1 + $0x160] sm:$0xff]  ;;  %v7526_v32 = vld [vmem:[%s11474_s1 + $0xd8] sm:$0xff] }
 0x214   :  { %v6625_v52 = vpop.permute.xlu0 %6624  ;;  %v7161_v28 = vrot.slane %v6619_v11, %v10415_v61  ;;  %7788 = vmatpush3.msra.mxu1 %v7545_v23  ;;  %7754 = vmatprep.subr.mxu0 %v7528_v42  ;;  %v6133_v37 = vcombine.low %v3776_v57, %v3783_v58  ;;  %v6134_v9 = vcombine.low %v3790_v59, %v3797_v63  ;;  %v7510_v59 = vld [vmem:[%s11474_s1 + $0x58] sm:$0xff]  ;;  %v7541_v23 = vld [vmem:[%s11474_s1 + $0x150] sm:$0xff]  ;;  %v7556_v42 = vld [vmem:[%s11474_s1 + $0x1c8] sm:$0xff] }
 0x215   :  { %6609 = vperm.xlu1 %7828, %v5316_v43   ;;  %v7171_v51 = vrot.slane %v6625_v52, %v10462_v16  ;;  %7789 = vmatprep.subr.mxu1 %v7560_v33  ;;  %v7511_v43 = vld [vmem:[%s11474_s1 + $0x60] sm:$0xff]  ;;  %v6404_v17 = vcombine.low %v6396_v5, %v6403_v0  ;;  %v5605_v58 = vcombine.low %v5597_v39, %v5604_v25  ;;  %v7542_v63 = vld [vmem:[%s11474_s1 + $0x158] sm:$0xff]  ;;  %v7509_v5 = vld [vmem:[%s11474_s1 + $0x50] sm:$0xff] }
 0x216   :  { %v7162_v19 = vsel %vm6817_vm1, %v7161_v28, %v7157_v18  ;;  %7755 = vmatpush3.msra.mxu0 %v7512_v55  ;;  %7790 = vmatpush3.msra.mxu1 %v7544_v29  ;;  %v7315_v4 = vrot.slane %v10877_v24, %v10422_v2  ;;  %v7557_v28 = vld [vmem:[%s11474_s1 + $0x1d0] sm:$0xff]  ;;  %v7324_v20 = vrot.slane %v10945_v53, %v10418_v31  ;;  %v7523_v39 = vld [vmem:[%s11474_s1 + $0xc0] sm:$0xff] }
 0x217   :  { %v7167_v48 = vsel %vm6824_vm2, %v7166_v36, %v7162_v19  ;;  %7756 = vmatprep.subr.mxu0 %v7527_v50  ;;  %7791 = vmatprep.subr.mxu1 %v7559_v27  ;;  %v6141_v14 = vrot.slane %v6133_v37, %v8384_v40  ;;  %v6148_v24 = vrot.slane %v6134_v9, %v8384_v40  ;;  %v7524_v36 = vld [vmem:[%s11474_s1 + $0xc8] sm:$0xff]  ;;  %v7555_v29 = vld [vmem:[%s11474_s1 + $0x1c0] sm:$0xff] }
 0x218   :  { %v6667_v35 = vpop.permute.xlu1 %6666  ;;  %v7172_v38 = vsel %vm6831_vm3, %v7171_v51, %v7167_v48  ;;  %7757 = vmatpush3.msra.mxu0 %v7511_v43  ;;  %7792 = vmatpush3.msra.mxu1 %v7543_v44  ;;  %v7394_v33 = vrot.slane %v10899_v15, %v10422_v2  ;;  %v7522_v43 = vld [vmem:[%s11474_s1 + $0xb8] sm:$0xff] }
 0x219   :  { %6705 = vperm.xlu1 %7828, %v5860_v56   ;;  %v10999_v3 = vpop.permute.xlu0 %6720  ;;  %v7240_v21 = vrot.slane %v6667_v35, %v10415_v61  ;;  %7758 = vmatprep.subr.mxu0 %v7526_v32  ;;  %v7508_v35 = vld [vmem:[%s11474_s1 + $0x48] sm:$0xff]  ;;  %v6149_v50 = vcombine.low %v6141_v14, %v6148_v24  ;;  %v7554_v44 = vld [vmem:[%s11474_s1 + $0x1b8] sm:$0xff] }
 0x21a   :  { %7793 = vmatprep.subr.mxu1 %v7558_v12  ;;  %7759 = vmatpush3.msra.mxu0 %v7510_v59  ;;  %v7329_v56 = vrot.slane %v10999_v3, %v10462_v16  ;;  %v7540_v3 = vld [vmem:[%s11474_s1 + $0x148] sm:$0xff]  ;;  %v7538_v32 = vld [vmem:[%s11474_s1 + $0x138] sm:$0xff]  ;;  %v7505_v59 = vld [vmem:[%s11474_s1 + $0x30] sm:$0xff] }
 0x21b   :  { %v11034_v11 = vsel %vm6817_vm1, %v7240_v21, %v7236_v30  ;;  %7794 = vmatpush3.msra.mxu1 %v7542_v63  ;;  %7760 = vmatprep.subr.mxu0 %v7525_v7  ;;  %v7507_v30 = vld [vmem:[%s11474_s1 + $0x40] sm:$0xff]  ;;  %v7537_v63 = vld [vmem:[%s11474_s1 + $0x130] sm:$0xff] }
 0x21c   :  { %v6715_v52 = vpop.permute.xlu1 %6714  ;;  %7795 = vmatprep.subr.mxu1 %v7557_v28  ;;  %7761 = vmatpush3.msra.mxu0 %v7509_v5 }
 0x21d   :  { %6801 = vperm.xlu1 %7828, %v6404_v17   ;;  %v6628_v57 = vpop.permute.xlu0 %6627  ;;  %v7319_v6 = vrot.slane %v6715_v52, %v10415_v61  ;;  %7796 = vmatpush3.msra.mxu1 %v7541_v23  ;;  %v7506_v17 = vld [vmem:[%s11474_s1 + $0x38] sm:$0xff]  ;;  %v7519_v23 = vld [vmem:[%s11474_s1 + $0xa0] sm:$0xff] }
 0x21e   :  { %v7176_v18 = vrot.slane %v6628_v57, %v10495_v45  ;;  %7762 = vmatprep.subr.mxu0 %v7524_v36  ;;  %7797 = vmatprep.subr.mxu1 %v7556_v42  ;;  %v7521_v57 = vld [vmem:[%s11474_s1 + $0xb0] sm:$0xff]  ;;  %v7551_v36 = vld [vmem:[%s11474_s1 + $0x1a0] sm:$0xff] }
 0x21f   :  { %v7320_v0 = vsel %vm6817_vm1, %v7319_v6, %v7315_v4  ;;  %7763 = vmatpush3.msra.mxu0 %v7508_v35  ;;  %7798 = vmatpush3.msra.mxu1 %v7540_v3  ;;  %v7520_v6 = vld [vmem:[%s11474_s1 + $0xa8] sm:$0xff]  ;;  %v7502_v35 = vld [vmem:[%s11474_s1 + $0x18] sm:$0xff] }
 0x220   :  { %v7177_v53 = vsel %vm6838_vm4, %v7176_v18, %v7172_v38  ;;  %v7325_v19 = vsel %vm6824_vm2, %v7324_v20, %v7320_v0  ;;  %v6763_v51 = vpop.permute.xlu1 %6762  ;;  %v7539_v38 = vld [vmem:[%s11474_s1 + $0x140] sm:$0xff]  ;;  %7764 = vmatprep.subr.mxu0 %v7523_v39  ;;  %7799 = vmatprep.subr.mxu1 %v7555_v29  ;;  %v7552_v18 = vld [vmem:[%s11474_s1 + $0x1a8] sm:$0xff]  ;;  %v7534_v3 = vld [vmem:[%s11474_s1 + $0x118] sm:$0xff] }
 0x221   :  { %6660 = vperm.xlu1 %7828, %v5605_v58   ;;  %v6724_v48 = vpop.permute.xlu0 %6723  ;;  %v7398_v15 = vrot.slane %v6763_v51, %v10415_v61  ;;  %v7330_v25 = vsel %vm6831_vm3, %v7329_v56, %v7325_v19  ;;  %7765 = vmatpush3.msra.mxu0 %v7507_v30  ;;  %v7553_v58 = vld [vmem:[%s11474_s1 + $0x1b0] sm:$0xff]  ;;  %v7536_v20 = vld [vmem:[%s11474_s1 + $0x128] sm:$0xff]  ;;  %v7503_v56 = vld [vmem:[%s11474_s1 + $0x20] sm:$0xff] }
 0x222   :  { %v7334_v55 = vrot.slane %v6724_v48, %v10495_v45  ;;  %7800 = vmatpush3.msra.mxu1 %v7539_v38  ;;  %7766 = vmatprep.subr.mxu0 %v7522_v43  ;;  %v7535_v0 = vld [vmem:[%s11474_s1 + $0x120] sm:$0xff]  ;;  %v7550_v19 = vld [vmem:[%s11474_s1 + $0x198] sm:$0xff]  ;;  %v7501_v29 = vld [vmem:[%s11474_s1 + $0x10] sm:$0xff] }
 0x223   :  { %v7399_v21 = vsel %vm6817_vm1, %v7398_v15, %v7394_v33  ;;  %7801 = vmatprep.subr.mxu1 %v7554_v44  ;;  %7767 = vmatpush3.msra.mxu0 %v7506_v17  ;;  %v7518_v33 = vld [vmem:[%s11474_s1 + $0x98] sm:$0xff] }
 0x224   :  { %v7335_v27 = vsel %vm6838_vm4, %v7334_v55, %v7330_v25  ;;  %v6670_v37 = vpop.permute.xlu1 %6669  ;;  %7802 = vmatpush3.msra.mxu1 %v7538_v32  ;;  %7768 = vmatprep.subr.mxu0 %v7521_v57  ;;  %v7517_v25 = vld [vmem:[%s11474_s1 + $0x90] sm:$0xff]  ;;  %v7499_v57 = vld [vmem:[%s11474_s1] sm:$0xff] }
 0x225   :  { %6756 = vperm.xlu1 %7828, %v6149_v50   ;;  %v6631_v9 = vpop.permute.xlu0 %6630  ;;  %v7245_v12 = vrot.slane %v6670_v37, %v10418_v31  ;;  %7803 = vmatprep.subr.mxu1 %v7553_v58  ;;  %v7549_v55 = vld [vmem:[%s11474_s1 + $0x190] sm:$0xff]  ;;  %v7500_v37 = vld [vmem:[%s11474_s1 + $0x8] sm:$0xff]  ;;  %v7531_v58 = vld [vmem:[%s11474_s1 + $0x100] sm:$0xff] }
 0x226   :  { %v7181_v52 = vrot.slane %v6631_v9, %v10512_v1  ;;  %7769 = vmatpush3.msra.mxu0 %v7505_v59  ;;  %7804 = vmatpush3.msra.mxu1 %v7537_v63  ;;  %v7533_v50 = vld [vmem:[%s11474_s1 + $0x110] sm:$0xff]  ;;  %v7532_v9 = vld [vmem:[%s11474_s1 + $0x108] sm:$0xff] }
 0x227   :  { %v7246_v7 = vsel %vm6824_vm2, %v7245_v12, %v11034_v11  ;;  %v7504_v11 = vld [vmem:[%s11474_s1 + $0x28] sm:$0xff]  ;;  %7770 = vmatprep.subr.mxu0 %v7520_v6  ;;  %7805 = vmatprep.subr.mxu1 %v7552_v18  ;;  %v7515_v12 = vld [vmem:[%s11474_s1 + $0x80] sm:$0xff] }
 0x228   :  { %v7182_v4 = vsel %vm6845_vm5, %v7181_v52, %v7177_v53  ;;  %v6766_v28 = vpop.permute.xlu1 %6765  ;;  %7771 = vmatpush3.msra.mxu0 %v7504_v11  ;;  %7806 = vmatpush3.msra.mxu1 %v7536_v20  ;;  %v7547_v52 = vld [vmem:[%s11474_s1 + $0x180] sm:$0xff] }
 0x229   :  { %v6727_v5 = vpop.permute.xlu0 %6726  ;;  %v7403_v14 = vrot.slane %v6766_v28, %v10418_v31  ;;  %7772 = vmatprep.subr.mxu0 %v7519_v23  ;;  %7807 = vmatprep.subr.mxu1 %v7551_v36 }
 0x22a   :  { %v7339_v24 = vrot.slane %v6727_v5, %v10512_v1  ;;  %7773 = vmatpush3.msra.mxu0 %v7503_v56  ;;  %7808 = vmatpush3.msra.mxu1 %v7535_v0 }
 0x22b   :  { %v7404_v53 = vsel %vm6824_vm2, %v7403_v14, %v7399_v21  ;;  %7774 = vmatprep.subr.mxu0 %v7518_v33  ;;  %7809 = vmatprep.subr.mxu1 %v7550_v19  ;;  %v7516_v21 = vld [vmem:[%s11474_s1 + $0x88] sm:$0xff] }
 0x22c   :  { %v7340_v42 = vsel %vm6845_vm5, %v7339_v24, %v7335_v27  ;;  %v6673_v51 = vpop.permute.xlu1 %6672  ;;  %7775 = vmatpush3.msra.mxu0 %v7502_v35  ;;  %7810 = vmatpush3.msra.mxu1 %v7534_v3  ;;  %v7548_v27 = vld [vmem:[%s11474_s1 + $0x188] sm:$0xff] }
 0x22d   :  { %v6634_v48 = vpop.permute.xlu0 %6633  ;;  %v7250_v39 = vrot.slane %v6673_v51, %v10462_v16  ;;  %7776 = vmatprep.subr.mxu0 %v7517_v25  ;;  %7811 = vmatprep.subr.mxu1 %v7549_v55 }
 0x22e   :  { %v7186_v15 = vrot.slane %v6634_v48, %v10519_v8  ;;  %7777 = vmatpush3.msra.mxu0 %v7501_v29  ;;  %7812 = vmatpush3.msra.mxu1 %v7533_v50 }
 0x22f   :  { %v7251_v30 = vsel %vm6831_vm3, %v7250_v39, %v7246_v7  ;;  %7778 = vmatprep.subr.mxu0 %v7516_v21  ;;  %7813 = vmatprep.subr.mxu1 %v7548_v27 }
 0x230   :  { %v11183_v38 = vsel %vm6852_vm6, %v7186_v15, %v7182_v4  ;;  %v6769_v43 = vpop.permute.xlu1 %6768  ;;  %7779 = vmatpush3.msra.mxu0 %v7500_v37  ;;  %7814 = vmatpush3.msra.mxu1 %v7532_v9 }
 0x231   :  { %v6730_v44 = vpop.permute.xlu0 %6729  ;;  %v7408_v17 = vrot.slane %v6769_v43, %v10462_v16  ;;  %7780 = vmatprep.subr.mxu0 %v7515_v12  ;;  %7815 = vmatprep.subr.mxu1 %v7547_v52 }
 0x232   :  { %v7344_v32 = vrot.slane %v6730_v44, %v10519_v8  ;;  %7781 = vmatpush3.msra.mxu0 %v7499_v57  ;;  %7816 = vmatpush3.msra.mxu1 %v7531_v58 }
 0x233   :  { %v7409_v59 = vsel %vm6831_vm3, %v7408_v17, %v7404_v53 }
 0x234   :  { %v7345_v63 = vsel %vm6852_vm6, %v7344_v32, %v7340_v42  ;;  %v6676_v7 = vpop.permute.xlu1 %6675 }
 0x235   :  { %v6589_v4 = vpop.permute.xlu0 %6588  ;;  %v7255_v6 = vrot.slane %v6676_v7, %v10495_v45 }
 0x236   :  { %v7112_v18 = vrot.slane %v6589_v4, %v10541_v10 }
 0x237   :  { %v7256_v28 = vsel %vm6838_vm4, %v7255_v6, %v7251_v30 }
 0x238   :  { %v7113_v5 = vsel %vm6859_vm7, %v7112_v18, %v10955_v41  ;;  %v6772_v11 = vpop.permute.xlu1 %6771 }
 0x239   :  { %v6685_v20 = vpop.permute.xlu0 %6684  ;;  %v7413_v14 = vrot.slane %v6772_v11, %v10495_v45 }
 0x23a   :  { %v7270_v35 = vrot.slane %v6685_v20, %v10541_v10 }
 0x23b   :  { %v7414_v24 = vsel %vm6838_vm4, %v7413_v14, %v7409_v59 }
 0x23c   :  { %v6679_v23 = vpop.permute.xlu1 %6678 }
 0x23d   :  { %v6781_v36 = vpop.permute.xlu0 %6780  ;;  %v7260_v56 = vrot.slane %v6679_v23, %v10512_v1 }
 0x23e   :  { %v7428_v29 = vrot.slane %v6781_v36, %v10541_v10 }
 0x23f   :  { %v7261_v0 = vsel %vm6845_vm5, %v7260_v56, %v7256_v28 }
 0x240   :  { %v6775_v53 = vpop.permute.xlu1 %6774 }
 0x241   :  { %v6640_v42 = vpop.permute.xlu0 %6639  ;;  %v7418_v33 = vrot.slane %v6775_v53, %v10512_v1 }
 0x242   :  { %v7196_v44 = vrot.slane %v6640_v42, %v10544_v46 }
 0x243   :  { %v7419_v19 = vsel %vm6845_vm5, %v7418_v33, %v7414_v24 }
 0x244   :  { %v6682_v51 = vpop.permute.xlu1 %6681 }
 0x245   :  { %v6736_v41 = vpop.permute.xlu0 %6735  ;;  %v7265_v48 = vrot.slane %v6682_v51, %v10519_v8 }
 0x246   :  { %v7354_v52 = vrot.slane %v6736_v41, %v10544_v46 }
 0x247   :  { %v7266_v3 = vsel %vm6852_vm6, %v7265_v48, %v7261_v0 }
 0x248   :  { %v6778_v39 = vpop.permute.xlu1 %6777  ;;  %v7271_v25 = vsel %vm6859_vm7, %v7270_v35, %v7266_v3  ;;  %v11948_v35 = vld [vmem:[#allocation45_spill] sm:$0xff] }
 0x249   :  { %v11227_v15 = vpop.permute.xlu0 %6594  ;;  %v7423_v55 = vrot.slane %v6778_v39, %v10519_v8  ;;  %v6816_v3 = vrot.slane %v11948_v35, %v10415_v61  ;;  %v11949_v39 = vld [vmem:[#allocation46_spill] sm:$0xff] }
 0x24b   :  { %v7424_v50 = vsel %vm6852_vm6, %v7423_v55, %v7419_v19  ;;  %v11947_v19 = vld [vmem:[#allocation47_spill] sm:$0xff] }
 0x24c   :  { %v6637_v30 = vpop.permute.xlu1 %6636  ;;  %v11236_v27 = vsel %vm6859_vm7, %v7428_v29, %v7424_v50  ;;  %v6811_v51 = vrot.slane %v11947_v19, %v10422_v2  ;;  %v11950_v29 = vld [vmem:[#allocation10_spill] sm:$0xff] }
 0x24d   :  { %v11233_v21 = vpop.permute.xlu0 %6690  ;;  %v7191_v43 = vrot.slane %v6637_v30, %v10541_v10  ;;  %v6830_v50 = vrot.slane %v11950_v29, %v10462_v16 }
 0x24e   :  { %v6818_v55 = vsel %vm6817_vm1, %v6816_v3, %v6811_v51  ;;  %vm7732_vm1 = vcmask 254976  }
 0x24f   :  { %v7192_v37 = vsel %vm6859_vm7, %v7191_v43, %v11183_v38  ;;  %v11951_v43 = vld [vmem:[#allocation63_spill] sm:$0xff] }
 0x250   :  { %v6733_v9 = vpop.permute.xlu1 %6732  ;;  %v11245_v32 = vsel %vm6866_vm8, %v7196_v44, %v7192_v37  ;;  %v6837_v2 = vrot.slane %v11951_v43, %v10495_v45  ;;  %v11952_v37 = vld [vmem:[#allocation72_spill] sm:$0xff]  ;;  %v11955_v45 = vld [vmem:[#allocation59_spill] sm:$0xff]  ;;  %v11958_v43 = vld [vmem:[#allocation74_spill] sm:$0xff] }
 0x251   :  { %v11242_v17 = vpop.permute.xlu0 %6786  ;;  %v7349_v12 = vrot.slane %v6733_v9, %v10541_v10  ;;  %v6844_v9 = vrot.slane %v11952_v37, %v10512_v1 }
 0x253   :  { %v7350_v57 = vsel %vm6859_vm7, %v7349_v12, %v7345_v63  ;;  %v11953_v12 = vld [vmem:[#allocation62_spill] sm:$0xff] }
 0x254   :  { %v6592_v58 = vpop.permute.xlu1 %6591  ;;  %v11253_v7 = vsel %vm6866_vm8, %v7354_v52, %v7350_v57  ;;  %v11954_v57 = vld [vmem:[#allocation58_spill] sm:$0xff] }
 0x255   :  { %v11250_v59 = vpop.permute.xlu0 %6645  ;;  %v7117_v38 = vrot.slane %v6592_v58, %v10544_v46  ;;  %v6858_v16 = vrot.slane %v11954_v57, %v10541_v10  ;;  %v11956_v10 = vld [vmem:[#allocation60_spill] sm:$0xff]  ;;  %v11960_v57 = vld [vmem:[#allocation39_spill] sm:$0xff] }
 0x256   :  { %v6879_v3 = vrot.slane %v11956_v10, %v10568_v34 }
 0x257   :  { %v11257_v4 = vsel %vm6866_vm8, %v7117_v38, %v7113_v5 }
 0x258   :  { %v6688_v6 = vpop.permute.xlu1 %6687 }
 0x259   :  { %v11259_v18 = vpop.permute.xlu0 %6741  ;;  %v7275_v28 = vrot.slane %v6688_v6, %v10544_v46  ;;  %v6865_v6 = vrot.slane %v11955_v45, %v10544_v46 }
 0x25b   :  { %v7276_v11 = vsel %vm6866_vm8, %v7275_v28, %v7271_v25  ;;  %v6823_v25 = vrot.slane %v11949_v39, %v10418_v31  ;;  %v6851_v31 = vrot.slane %v11953_v12, %v10519_v8  ;;  %v11957_v39 = vld [vmem:[#allocation64_spill] sm:$0xff] }
 0x25c   :  { %v11263_v20 = vpop.permute.xlu1 %6783 }
 0x25d   :  { %v11265_v63 = vpop.permute.xlu0 %6600  ;;  %v6825_v61 = vsel %vm6824_vm2, %v6823_v25, %v6818_v55  ;;  %v6872_v25 = vrot.slane %v11957_v39, %v10560_v60 }
 0x25e   :  { %v6832_v52 = vsel %vm6831_vm3, %v6830_v50, %v6825_v61 }
 0x25f   :  { %v6839_v38 = vsel %vm6838_vm4, %v6837_v2, %v6832_v52  ;;  %v6893_v2 = vrot.slane %v11958_v43, %v10591_v26  ;;  %v7206_v43 = vrot.slane %v11250_v59, %v10568_v34 }
 0x260   :  { %v11267_v14 = vpop.permute.xlu1 %6642  ;;  %v6846_v28 = vsel %vm6845_vm5, %v6844_v9, %v6839_v38  ;;  %v11959_v9 = vld [vmem:[#allocation75_spill] sm:$0xff]  ;;  %v11961_v38 = vld [vmem:[#allocation21_spill] sm:$0xff] }
 0x261   :  { %v11269_v24 = vpop.permute.xlu0 %6696  ;;  %v6853_v1 = vsel %vm6852_vm6, %v6851_v31, %v6846_v28  ;;  %v6886_v61 = vrot.slane %v11959_v9, %v10583_v49  ;;  %v6900_v45 = vrot.slane %v11961_v38, %v10612_v13  ;;  %v7201_v10 = vrot.slane %v11267_v14, %v10560_v60 }
 0x262   :  { %v6860_v8 = vsel %vm6859_vm7, %v6858_v16, %v6853_v1  ;;  %v6907_v16 = vrot.slane %v11960_v57, %v10620_v54 }
 0x263   :  { %v6867_v35 = vsel %vm6866_vm8, %v6865_v6, %v6860_v8  ;;  %v7433_v6 = vrot.slane %v11263_v20, %v10544_v46  ;;  %v7122_v20 = vrot.slane %v11227_v15, %v10560_v60  ;;  %v7290_v15 = vrot.slane %v11269_v24, %v10583_v49 }
 0x264   :  { %v11271_v23 = vpop.permute.xlu1 %6738  ;;  %v6874_v55 = vsel %vm6873_vm9, %v6872_v25, %v6867_v35  ;;  %v7280_v35 = vrot.slane %v11233_v21, %v10560_v60  ;;  %v7132_v24 = vrot.slane %v11265_v63, %v10583_v49 }
 0x265   :  { %v11273_v36 = vpop.permute.xlu0 %6792  ;;  %v6881_v50 = vsel %vm6880_vm10, %v6879_v3, %v6874_v55  ;;  %v7434_v21 = vsel %vm6866_vm8, %v7433_v6, %v11236_v27 }
 0x266   :  { %v6888_v12 = vsel %vm6887_vm11, %v6886_v61, %v6881_v50  ;;  %v7281_v25 = vsel %vm6873_vm9, %v7280_v35, %v7276_v11  ;;  %v7123_v11 = vsel %vm6873_vm9, %v7122_v20, %v11257_v4  ;;  %v7448_v63 = vrot.slane %v11273_v36, %v10583_v49 }
 0x267   :  { %v6895_v52 = vsel %vm6894_vm12, %v6893_v2, %v6888_v12 }
 0x268   :  { %v11275_v5 = vpop.permute.xlu1 %6597  ;;  %v6902_v8 = vsel %vm6901_vm13, %v6900_v45, %v6895_v52 }
 0x269   :  { %v11277_v56 = vpop.permute.xlu0 %6651  ;;  %v11356_v39 = vsel %vm6908_vm14, %v6907_v16, %v6902_v8  ;;  %v7127_v46 = vrot.slane %v11275_v5, %v10568_v34  ;;  %v7202_v5 = vsel %vm6873_vm9, %v7201_v10, %v11245_v32 }
 0x26a   :  { %v7216_v35 = vrot.slane %v11277_v56, %v10591_v26 }
 0x26c   :  { %v6694_v0 = vpop.permute.xlu1 %6693 }
 0x26d   :  { %v11279_v53 = vpop.permute.xlu0 %6747  ;;  %v7285_v28 = vrot.slane %v6694_v0, %v10568_v34  ;;  %v7438_v0 = vrot.slane %v11242_v17, %v10560_v60  ;;  %v7359_v17 = vrot.slane %v11271_v23, %v10560_v60 }
 0x26f   :  { %v7286_v14 = vsel %vm6880_vm10, %v7285_v28, %v7281_v25  ;;  %v7439_v60 = vsel %vm6873_vm9, %v7438_v0, %v7434_v21 }
 0x270   :  { %v11281_v42 = vpop.permute.xlu1 %6789  ;;  %v7291_v23 = vsel %vm6887_vm11, %v7290_v15, %v7286_v14 }
 0x271   :  { %v11283_v33 = vpop.permute.xlu0 %6606  ;;  %v7443_v55 = vrot.slane %v11281_v42, %v10568_v34  ;;  %v7364_v42 = vrot.slane %v11259_v18, %v10568_v34  ;;  %v7207_v34 = vsel %vm6880_vm10, %v7206_v43, %v7202_v5  ;;  %v11962_v43 = vld [vmem:[#allocation77_spill] sm:$0xff] }
 0x272   :  { %v7142_v52 = vrot.slane %v11283_v33, %v10612_v13 }
 0x273   :  { %v7444_v59 = vsel %vm6880_vm10, %v7443_v55, %v7439_v60 }
 0x274   :  { %v11287_v41 = vpop.permute.xlu1 %6648  ;;  %v7449_v38 = vsel %vm6887_vm11, %v7448_v63, %v7444_v59 }
 0x275   :  { %v11289_v48 = vpop.permute.xlu0 %6702  ;;  %v7211_v4 = vrot.slane %v11287_v41, %v10583_v49 }
 0x276   :  { %v7300_v61 = vrot.slane %v11289_v48, %v10612_v13 }
 0x278   :  { %v11298_v30 = vpop.permute.xlu1 %6744 }
 0x279   :  { %v11302_v44 = vpop.permute.xlu0 %6798  ;;  %v7369_v45 = vrot.slane %v11298_v30, %v10583_v49 }
 0x27a   :  { %v7458_v10 = vrot.slane %v11302_v44, %v10612_v13 }
 0x27c   :  { %v11312_v58 = vpop.permute.xlu1 %6603 }
 0x27d   :  { %v11319_v19 = vpop.permute.xlu0 %6657  ;;  %v7137_v32 = vrot.slane %v11312_v58, %v10591_v26  ;;  %v7360_v58 = vsel %vm6873_vm9, %v7359_v17, %v11253_v7  ;;  %v7212_v7 = vsel %vm6887_vm11, %v7211_v4, %v7207_v34 }
 0x27e   :  { %v7365_v49 = vsel %vm6880_vm10, %v7364_v42, %v7360_v58  ;;  %v7217_v21 = vsel %vm6894_vm12, %v7216_v35, %v7212_v7  ;;  %v6914_v42 = vrot.slane %v11962_v43, %v10636_v62 }
 0x27f   :  { %v7370_v55 = vsel %vm6887_vm11, %v7369_v45, %v7365_v49 }
 0x280   :  { %v6700_v51 = vpop.permute.xlu1 %6699 }
 0x281   :  { %v11331_v37 = vpop.permute.xlu0 %6753  ;;  %v7295_v50 = vrot.slane %v6700_v51, %v10591_v26  ;;  %v7128_v51 = vsel %vm6880_vm10, %v7127_v46, %v7123_v11 }
 0x282   :  { %v7133_v41 = vsel %vm6887_vm11, %v7132_v24, %v7128_v51 }
 0x283   :  { %v7296_v18 = vsel %vm6894_vm12, %v7295_v50, %v7291_v23  ;;  %v7138_v57 = vsel %vm6894_vm12, %v7137_v32, %v7133_v41 }
 0x284   :  { %v6796_v29 = vpop.permute.xlu1 %6795  ;;  %v7301_v48 = vsel %vm6901_vm13, %v7300_v61, %v7296_v18  ;;  %v7143_v46 = vsel %vm6901_vm13, %v7142_v52, %v7138_v57 }
 0x285   :  { %v11346_v1 = vpop.permute.xlu0 %6612  ;;  %v7453_v9 = vrot.slane %v6796_v29, %v10591_v26 }
 0x286   :  { %v7152_v56 = vrot.slane %v11346_v1, %v10636_v62  ;;  %v7226_v1 = vrot.slane %v11319_v19, %v10620_v54 }
 0x287   :  { %v7454_v6 = vsel %vm6894_vm12, %v7453_v9, %v7449_v38 }
 0x288   :  { %v11336_v31 = vpop.permute.xlu1 %6654  ;;  %v7459_v14 = vsel %vm6901_vm13, %v7458_v10, %v7454_v6 }
 0x289   :  { %v6709_v2 = vpop.permute.xlu0 %6708  ;;  %v7221_v33 = vrot.slane %v11336_v31, %v10612_v13 }
 0x28a   :  { %v7310_v36 = vrot.slane %v6709_v2, %v10636_v62  ;;  %v7384_v2 = vrot.slane %v11331_v37, %v10620_v54 }
 0x28b   :  { %v7222_v50 = vsel %vm6901_vm13, %v7221_v33, %v7217_v21 }
 0x28c   :  { %v11353_v3 = vpop.permute.xlu1 %6750  ;;  %v7227_v32 = vsel %vm6908_vm14, %v7226_v1, %v7222_v50 }
 0x28d   :  { %v6805_v28 = vpop.permute.xlu0 %6804  ;;  %v7379_v5 = vrot.slane %v11353_v3, %v10612_v13 }
 0x28e   :  { %v7468_v44 = vrot.slane %v6805_v28, %v10636_v62 }
 0x290   :  { %v6610_v27 = vpop.permute.xlu1 %6609 }
 0x291   :  { %v7147_v16 = vrot.slane %v6610_v27, %v10620_v54 }
 0x293   :  { %v7148_v30 = vsel %vm6908_vm14, %v7147_v16, %v7143_v46 }
 0x294   :  { %v6706_v12 = vpop.permute.xlu1 %6705  ;;  %v7153_v17 = vsel %vm6915_vm15, %v7152_v56, %v7148_v30 }
 0x295   :  { %v7305_v29 = vrot.slane %v6706_v12, %v10620_v54 }
 0x297   :  { %v7306_v8 = vsel %vm6908_vm14, %v7305_v29, %v7301_v48 }
 0x298   :  { %v7311_v20 = vsel %vm6915_vm15, %v7310_v36, %v7306_v8  ;;  %v6802_v0 = vpop.permute.xlu1 %6801 }
 0x299   :  { %v7463_v31 = vrot.slane %v6802_v0, %v10620_v54  ;;  %v7472_v25 = vsel %vm7470_vm0, %v7311_v20, %v10665_v22  ;;  %v7374_v22 = vrot.slane %v11279_v53, %v10591_v26  ;;  %v6916_v26 = vsel %vm6915_vm15, %v6914_v42, %v11356_v39 }
 0x29b   :  { %v7464_v15 = vsel %vm6908_vm14, %v7463_v31, %v7459_v14  ;;  %v7375_v3 = vsel %vm6894_vm12, %v7374_v22, %v7370_v55 }
 0x29c   :  { %v7469_v11 = vsel %vm6915_vm15, %v7468_v44, %v7464_v15  ;;  %v6661_v27 = vpop.permute.xlu1 %6660  ;;  %v7380_v53 = vsel %vm6901_vm13, %v7379_v5, %v7375_v3 }
 0x29d   :  { %v7231_v51 = vrot.slane %v6661_v27, %v10636_v62  ;;  %v7474_v13 = vsel %vm7470_vm0, %v7469_v11, %v7153_v17  ;;  %v7385_v59 = vsel %vm6908_vm14, %v7384_v2, %v7380_v53 }
 0x29f   :  { %v7232_v19 = vsel %vm6915_vm15, %v7231_v51, %v7227_v32 }
 0x2a0   :  { %v7471_v24 = vsel %vm7470_vm0, %v7232_v19, %v6916_v26  ;;  %v6757_v60 = vpop.permute.xlu1 %6756 }
 0x2a1   :  { %v7389_v4 = vrot.slane %v6757_v60, %v10636_v62  ;;  %v7475_v23 = vcombine.low %v7471_v24, %v7472_v25 }
 0x2a3   :  { %v7390_v34 = vsel %vm6915_vm15, %v7389_v4, %v7385_v59  ;;  %v7483_v9 = vrot.slane %v7475_v23, %v8384_v40 }
 0x2a4   :  { %v7473_v39 = vsel %vm7470_vm0, %v7390_v34, %v10875_v47  ;;  %v7748_v47 = vld [vmem:[%s11475_s2] ss:$0 sm:$0xff] }
 0x2a5   :  { %v7476_v18 = vcombine.low %v7473_v39, %v7474_v13 }
 0x2a7   :  { %v7490_v58 = vrot.slane %v7476_v18, %v8384_v40 }
 0x2a9   :  { %v7491_v63 = vcombine.low %v7483_v9, %v7490_v58  ;;  %v7749_v54 = vcombine.low %v7490_v58, %v7490_v58 }
 0x2ab   :  { %v7578_v37 = vrot.slane %v7491_v63, %v8384_v40  ;;  %v7585_v61 = vrot.slane %v7749_v54, %v8384_v40 }
 0x2ad   :  { %v7586_v62 = vcombine.high %v7578_v37, %v7578_v37  ;;  %v7587_v41 = vcombine.high %v7585_v61, %v7585_v61 }
 0x2af   :  { %7656 = vmatprep.mubr.f32.mxu0 %v7586_v62  ;;  %7726 = vmatprep.mubr.f32.mxu1 %v7587_v41 }
 0x2b0   :  { %7657 = vmatmul.mubr.f32.vlgmr.msra.gmra.mxu0 %v7578_v37  ;;  %7727 = vmatmul.mubr.f32.vlgmr.msra.gmra.mxu1 %v7585_v61 }
 0x370   :  { %v7782_v12 = vpop.f32.mrf.mxu0  ;;  %v7817_v52 = vpop.f32.mrf.mxu1 }
 0x372   :  { %v7783_v57 = vpop.f32.mrf.mxu0  ;;  %v7818_v16 = vpop.f32.mrf.mxu1 }
 0x373   :  { %v7784_v29 = vadd.f32 %v7783_v57, %v7782_v12  ;;  %v7819_v38 = vadd.f32 %v7818_v16, %v7817_v52 }
 0x375   :  { %v7659_v7 = vadd.f32 %v7784_v29, %v7748_v47 }
 0x377   :  { %v7729_v40 = vadd.f32 %v7819_v38, %v7659_v7 }
 0x379   :  { %7733 = vst.msk [vmem:[#allocation3] sm:$0x3] %vm7732_vm1, %v7729_v40 }
 0x37a   :  { %7840 = shalt.err (!%p7837_p4)
}
 0x37b   :  { %7743 = dma.vmem_to_hbm [thread:$0]  %s7741_s15, 32, %s11476_s3, [#allocation4]  }
 0x37c   :  { %7849 = dma.done.wait [#allocation4], 32  }
 0x37d   :  { %7850 = vsyncadd [#allocation4], 4294967264 }
 0x37e   :  { %7747 = vsyncpa [#allocation4], 1 }

</bundles_post_ra>
